<compile_context>
chip_gen: v5e
topology: v5e:2x2
jax: 0.10.0
libtpu: 0.0.40
codegen_flags: <defaults>
</compile_context>

<pallas_src>
import jax
import jax.numpy as jnp
from jax.experimental import pallas as pl
from jax.experimental.pallas import tpu as pltpu


def _round_up(a: int, b: int) -> int:
    return -(-a // b) * b


def _round_down(a: int, b: int) -> int:
    return (a // b) * b


# ---------------------------------------------------------------------------
# Kernel (feature-major / lane-dense)
# ---------------------------------------------------------------------------
def _grn_kernel(x_ref, c_ref, w1_ref, wc_ref, b1_ref,
                wg_ref, bg_ref, gamma_ref, beta_ref, o_ref):
    """Fused GRN on transposed tiles.

    x_ref   : (D_in, tile)  transposed input rows (also the residual; D_in==O)
    c_ref   : (C,    tile)  transposed context rows
    w1_ref  : (H, D_in)     fc1 weight^T
    wc_ref  : (H, C)        context weight^T (no bias)
    b1_ref  : (H, 1)        fc1 bias
    wg_ref  : (2O, H)       (fc2 folded into GLU fc) weight^T
    bg_ref  : (2O, 1)       fused bias
    gamma_ref, beta_ref : (O, 1) LayerNorm affine
    o_ref   : (O, tile)     transposed output rows
    """
    O = o_ref.shape[0]

    # --- stage 1: fc1(x) + context projection, feature-major on the MXU ---
    xm = x_ref[...].astype(w1_ref.dtype)
    cm = c_ref[...].astype(wc_ref.dtype)
    h = jnp.dot(w1_ref[...], xm, preferred_element_type=jnp.float32)
    h = h + jnp.dot(wc_ref[...], cm, preferred_element_type=jnp.float32)
    h = h + b1_ref[...]

    # ELU (alpha = 1); both where-branches are cheap, exp goes to the EUP slot.
    h = jnp.where(h > 0.0, h, jnp.exp(jnp.minimum(h, 0.0)) - 1.0)

    # --- stage 2: single fused (fc2 -> GLU) matmul -------------------------
    g = jnp.dot(wg_ref[...], h.astype(wg_ref.dtype),
                preferred_element_type=jnp.float32)
    g = g + bg_ref[...]
    val = g[:O, :]           # value half  (sublane slice, O % 8 == 0)
    gate = g[O:, :]          # gate half
    glu = val * jax.nn.sigmoid(gate)

    # --- AddNorm (trainable_add=False): LayerNorm(glu + residual) ----------
    # Residual read from the ref at point of use; the block IS the residual.
    y = glu + x_ref[...].astype(jnp.float32)
    # Single-pass LayerNorm over the feature (sublane) axis -> XLU reduction.
    mean = jnp.mean(y, axis=0, keepdims=True)          # (1, tile)
    msq = jnp.mean(y * y, axis=0, keepdims=True)       # (1, tile)
    inv = jax.lax.rsqrt(msq - mean * mean + 1e-5)      # (1, tile)
    o_ref[...] = ((y - mean) * inv * gamma_ref[...]
                  + beta_ref[...]).astype(o_ref.dtype)


# ---------------------------------------------------------------------------
# Wrapper
# ---------------------------------------------------------------------------
def _num_tensorcores() -> int:
    """1 TensorCore per device on v5e/v6e, 2 on v7x (heuristic on device_kind)."""
    try:
        kind = (jax.devices()[0].device_kind or "").lower()
    except Exception:
        return 1
    return 2 if ("v7" in kind or "7x" in kind) else 1


def _pick_tile(n_rows: int, num_cores: int) -> int:
    """>=2 grid steps per TensorCore (DMA/compute overlap), large tiles to
    amortize the ~0.35us/step overhead, multiple of 128 for lane density."""
    target_steps = 2 * max(num_cores, 1)
    max_tile = 2048 if num_cores > 1 else 4096
    tile = _round_down(max(n_rows // target_steps, 1), 128)
    if tile == 0:
        tile = 128
    tile = max(256, min(max_tile, tile))
    tile = min(tile, _round_up(n_rows, 128))   # don't exceed the problem
    return max(tile, 128)


def gated_residual_network(x, context, params, *, tile=None, matmul_dtype=None):
    """x: (B, T, D_in), context: (B, T, C) -> (B, T, O).

    matmul_dtype: optional reduced-precision dtype (e.g. jnp.bfloat16) for MXU
    operands on any TPU generation (v5e/v6e/v7x are all bf16-native MXUs);
    accumulation and all elementwise math stay in float32.
    """
    B, T, D_in = x.shape
    C = context.shape[-1]
    H = params["w1"].shape[1]
    O = params["gamma"].shape[-1]
    if D_in != O:
        raise ValueError(
            "This kernel covers the input_size == output_size configuration "
            "(no resample_norm branch); got input_size=%d output_size=%d"
            % (D_in, O))
    N = B * T

    # ---- parameter preprocessing (feature-major; fc2 folded into GLU) ----
    w1T = params["w1"].T                                   # (H, D_in)
    wcT = params["wc"].T                                   # (H, C)
    b1T = params["b1"].reshape(H, 1)                       # (H, 1)
    w2g = params["w2"] @ params["wg"]                      # (H, 2O)
    b2g = params["b2"] @ params["wg"] + params["bg"]       # (1, 2O)
    wgT = w2g.T                                            # (2O, H)
    bgT = b2g.reshape(2 * O, 1)                            # (2O, 1)
    gammaT = params["gamma"].reshape(O, 1)
    betaT = params["beta"].reshape(O, 1)

    if matmul_dtype is not None:
        w1T = w1T.astype(matmul_dtype)
        wcT = wcT.astype(matmul_dtype)
        wgT = wgT.astype(matmul_dtype)

    # ---- activations: feature-major so the lane axis is the row axis ------
    xT = x.reshape(N, D_in).T                              # (D_in, N)
    cT = context.reshape(N, C).T                           # (C, N)

    num_cores = _num_tensorcores()
    if tile is None:
        tile = _pick_tile(N, num_cores)
    grid = (pl.cdiv(N, tile),)   # ragged tail: Pallas masks the partial block

    row_spec = lambda rows: pl.BlockSpec((rows, tile), lambda i: (0, i))
    # Constant index_map: Pallas skips re-fetching these across grid steps.
    full_spec = lambda r, c: pl.BlockSpec((r, c), lambda i: (0, 0))

    # Advisory cost estimate so XLA can overlap this small custom call.
    flops = 2 * N * H * (D_in + C) + 2 * N * (2 * O) * H + 12 * N * O
    transcendentals = N * (H + O + 1)        # ELU exp + sigmoid + rsqrt
    bytes_accessed = 4 * (N * (D_in + C) + N * O) + sum(
        int(a.size) * a.dtype.itemsize
        for a in (w1T, wcT, b1T, wgT, bgT, gammaT, betaT))

    out_t = pl.pallas_call(
        _grn_kernel,
        out_shape=jax.ShapeDtypeStruct((O, N), x.dtype),
        grid_spec=pltpu.PrefetchScalarGridSpec(
            num_scalar_prefetch=0,
            grid=grid,
            in_specs=[
                row_spec(D_in),          # x^T (also residual)
                row_spec(C),             # context^T
                full_spec(H, D_in),      # fc1 weight^T
                full_spec(H, C),         # context weight^T
                full_spec(H, 1),         # fc1 bias
                full_spec(2 * O, H),     # fused fc2->GLU weight^T
                full_spec(2 * O, 1),     # fused fc2->GLU bias
                full_spec(O, 1),         # LayerNorm gamma
                full_spec(O, 1),         # LayerNorm beta
            ],
            out_specs=row_spec(O),
        ),
        compiler_params=pltpu.CompilerParams(
            dimension_semantics=("parallel",)),
        cost_estimate=pl.CostEstimate(
            flops=int(flops),
            transcendentals=int(transcendentals),
            bytes_accessed=int(bytes_accessed)),
    )(xT, cT, w1T, wcT, b1T, wgT, bgT, gammaT, betaT)

    return out_t.T.reshape(B, T, O)


# ---------------------------------------------------------------------------
# Pure-JAX reference (unfused, row-major) and parameter construction
# ---------------------------------------------------------------------------
def _reference(x, context, p):
    residual = x
    h = x @ p["w1"] + p["b1"]
    h = h + context @ p["wc"]
    h = jnp.where(h > 0, h, jnp.expm1(h))
    h = h @ p["w2"] + p["b2"]
    g = h @ p["wg"] + p["bg"]
    O = p["gamma"].shape[-1]
    glu = g[..., :O] * jax.nn.sigmoid(g[..., O:])
    y = glu + residual
    mean = jnp.mean(y, axis=-1, keepdims=True)
    var = jnp.mean((y - mean) ** 2, axis=-1, keepdims=True)
    return (y - mean) / jnp.sqrt(var + 1e-5) * p["gamma"] + p["beta"]


def make_params(key, d_in, hidden, out, ctx):
    ks = jax.random.split(key, 4)

    def kaiming(k, fan_in, shape):
        return jax.random.normal(k, shape, jnp.float32) * jnp.sqrt(2.0 / fan_in)

    def xavier(k, fan_in, fan_out, shape):
        lim = jnp.sqrt(6.0 / (fan_in + fan_out))
        return jax.random.uniform(k, shape, jnp.float32, -lim, lim)

    return {
        "w1": kaiming(ks[0], d_in, (d_in, hidden)),
        "b1": jnp.zeros((1, hidden), jnp.float32),
        "wc": xavier(ks[1], ctx, hidden, (ctx, hidden)),
        "w2": kaiming(ks[2], hidden, (hidden, hidden)),
        "b2": jnp.zeros((1, hidden), jnp.float32),
        "wg": xavier(ks[3], hidden, 2 * out, (hidden, 2 * out)),
        "bg": jnp.zeros((1, 2 * out), jnp.float32),
        "gamma": jnp.ones((1, out), jnp.float32),
        "beta": jnp.zeros((1, out), jnp.float32),
    }


if __name__ == "__main__":
    D_IN = HIDDEN = OUT = 32   # input_size == hidden_size == output_size
    CTX = 16                   # context_size

    key = jax.random.PRNGKey(0)
    kx, kc, kp = jax.random.split(key, 3)
    params = make_params(kp, D_IN, HIDDEN, OUT, CTX)

    # --- main test: N divisible by the tile -------------------------------
    B, T = 2, 1024                                   # N = 2048 rows
    x = jax.random.normal(kx, (B, T, D_IN), jnp.float32)
    context = jax.random.normal(kc, (B, T, CTX), jnp.float32)

    out = jax.block_until_ready(gated_residual_network(x, context, params))
    ref = _reference(x, context, params)
    assert out.shape == (B, T, OUT)
    assert jnp.allclose(out, ref, atol=1e-3, rtol=1e-3), \
        float(jnp.max(jnp.abs(out - ref)))

    # --- ragged-tail test: last grid block is partial (no wrapper pad) ----
    Tr = 999                                         # N = 1998 rows
    xr = jax.random.normal(kx, (B, Tr, D_IN), jnp.float32)
    cr = jax.random.normal(kc, (B, Tr, CTX), jnp.float32)
    out_r = jax.block_until_ready(gated_residual_network(xr, cr, params))
    ref_r = _reference(xr, cr, params)
    assert out_r.shape == (B, Tr, OUT)
    assert jnp.allclose(out_r, ref_r, atol=1e-3, rtol=1e-3), \
        float(jnp.max(jnp.abs(out_r - ref_r)))

    # --- bf16 MXU-operand path (valid on v5e/v6e/v7x); loose check only ---
    out_bf16 = jax.block_until_ready(
        gated_residual_network(x, context, params, matmul_dtype=jnp.bfloat16))
    assert bool(jnp.isfinite(out_bf16).all())
    assert float(jnp.max(jnp.abs(out_bf16 - ref))) < 0.25

    print("KERNEL_OK")
</pallas_src>

<mosaic_0001>
module attributes {stable_mosaic.version = 11 : i64} {
  func.func @_grn_kernel(%arg0: i32, %arg1: memref<32x1024xf32, #tpu.memory_space<vmem>>, %arg2: memref<16x1024xf32, #tpu.memory_space<vmem>>, %arg3: memref<32x32xf32, #tpu.memory_space<vmem>>, %arg4: memref<32x16xf32, #tpu.memory_space<vmem>>, %arg5: memref<32x1xf32, #tpu.memory_space<vmem>>, %arg6: memref<64x32xf32, #tpu.memory_space<vmem>>, %arg7: memref<64x1xf32, #tpu.memory_space<vmem>>, %arg8: memref<32x1xf32, #tpu.memory_space<vmem>>, %arg9: memref<32x1xf32, #tpu.memory_space<vmem>>, %arg10: memref<32x1024xf32, #tpu.memory_space<vmem>>) attributes {dimension_semantics = [#tpu.dimension_semantics<parallel>], iteration_bounds = array<i64: 2>, scalar_prefetch = 0 : i64, scratch_operands = 0 : i64, tpu.core_type = #tpu.core_type<tc>, window_params = [{transform_indices = @transform_0, window_bounds = array<i64: 32, 1024>}, {transform_indices = @transform_1, window_bounds = array<i64: 16, 1024>}, {pipeline_mode = #tpu.pipeline_mode<synchronous>, transform_indices = @transform_2, window_bounds = array<i64: 32, 32>}, {pipeline_mode = #tpu.pipeline_mode<synchronous>, transform_indices = @transform_3, window_bounds = array<i64: 32, 16>}, {pipeline_mode = #tpu.pipeline_mode<synchronous>, transform_indices = @transform_4, window_bounds = array<i64: 32, 1>}, {pipeline_mode = #tpu.pipeline_mode<synchronous>, transform_indices = @transform_5, window_bounds = array<i64: 64, 32>}, {pipeline_mode = #tpu.pipeline_mode<synchronous>, transform_indices = @transform_6, window_bounds = array<i64: 64, 1>}, {pipeline_mode = #tpu.pipeline_mode<synchronous>, transform_indices = @transform_7, window_bounds = array<i64: 32, 1>}, {pipeline_mode = #tpu.pipeline_mode<synchronous>, transform_indices = @transform_8, window_bounds = array<i64: 32, 1>}, {transform_indices = @transform_9, window_bounds = array<i64: 32, 1024>}]} {
    %c0 = arith.constant 0 : index
    %c0_0 = arith.constant 0 : index
    %0 = vector.load %arg1[%c0, %c0_0] : memref<32x1024xf32, #tpu.memory_space<vmem>>, vector<32x1024xf32>
    %c0_1 = arith.constant 0 : index
    %c0_2 = arith.constant 0 : index
    %1 = vector.load %arg2[%c0_1, %c0_2] : memref<16x1024xf32, #tpu.memory_space<vmem>>, vector<16x1024xf32>
    %c0_3 = arith.constant 0 : index
    %c0_4 = arith.constant 0 : index
    %2 = vector.load %arg3[%c0_3, %c0_4] : memref<32x32xf32, #tpu.memory_space<vmem>>, vector<32x32xf32>
    %cst = arith.constant dense<0.000000e+00> : vector<32x1024xf32>
    %3 = tpu.matmul %2, %0, %cst {dimension_numbers = #tpu.dot_dimension_numbers<[1], [0], [0], [1], [0, 0, 1, 1], [], []>} : vector<32x32xf32>, vector<32x1024xf32>, vector<32x1024xf32> -> vector<32x1024xf32>
    %c0_5 = arith.constant 0 : index
    %c0_6 = arith.constant 0 : index
    %4 = vector.load %arg4[%c0_5, %c0_6] : memref<32x16xf32, #tpu.memory_space<vmem>>, vector<32x16xf32>
    %cst_7 = arith.constant dense<0.000000e+00> : vector<32x1024xf32>
    %5 = tpu.matmul %4, %1, %cst_7 {dimension_numbers = #tpu.dot_dimension_numbers<[1], [0], [0], [1], [0, 0, 1, 1], [], []>} : vector<32x16xf32>, vector<16x1024xf32>, vector<32x1024xf32> -> vector<32x1024xf32>
    %6 = arith.addf %3, %5 : vector<32x1024xf32>
    %c0_8 = arith.constant 0 : index
    %c0_9 = arith.constant 0 : index
    %7 = vector.load %arg5[%c0_8, %c0_9] : memref<32x1xf32, #tpu.memory_space<vmem>>, vector<32x1xf32>
    %8 = vector.broadcast %7 : vector<32x1xf32> to vector<32x1024xf32>
    %9 = arith.addf %6, %8 : vector<32x1024xf32>
    %cst_10 = arith.constant 0.000000e+00 : f32
    %10 = vector.broadcast %cst_10 : f32 to vector<32x1024xf32>
    %11 = arith.cmpf ogt, %9, %10 : vector<32x1024xf32>
    %cst_11 = arith.constant 0.000000e+00 : f32
    %12 = vector.broadcast %cst_11 : f32 to vector<32x1024xf32>
    %13 = arith.minimumf %9, %12 : vector<32x1024xf32>
    %14 = math.exp %13 : vector<32x1024xf32>
    %cst_12 = arith.constant 1.000000e+00 : f32
    %15 = vector.broadcast %cst_12 : f32 to vector<32x1024xf32>
    %16 = arith.subf %14, %15 : vector<32x1024xf32>
    %17 = arith.select %11, %9, %16 : vector<32x1024xi1>, vector<32x1024xf32>
    %c0_13 = arith.constant 0 : index
    %c0_14 = arith.constant 0 : index
    %18 = vector.load %arg6[%c0_13, %c0_14] : memref<64x32xf32, #tpu.memory_space<vmem>>, vector<64x32xf32>
    %cst_15 = arith.constant dense<0.000000e+00> : vector<64x1024xf32>
    %19 = tpu.matmul %18, %17, %cst_15 {dimension_numbers = #tpu.dot_dimension_numbers<[1], [0], [0], [1], [0, 0, 1, 1], [], []>} : vector<64x32xf32>, vector<32x1024xf32>, vector<64x1024xf32> -> vector<64x1024xf32>
    %c0_16 = arith.constant 0 : index
    %c0_17 = arith.constant 0 : index
    %20 = vector.load %arg7[%c0_16, %c0_17] : memref<64x1xf32, #tpu.memory_space<vmem>>, vector<64x1xf32>
    %21 = vector.broadcast %20 : vector<64x1xf32> to vector<64x1024xf32>
    %22 = arith.addf %19, %21 : vector<64x1024xf32>
    %23 = vector.extract_strided_slice %22 {offsets = [0, 0], sizes = [32, 1024], strides = [1, 1]} : vector<64x1024xf32> to vector<32x1024xf32>
    %24 = vector.extract_strided_slice %22 {offsets = [32, 0], sizes = [32, 1024], strides = [1, 1]} : vector<64x1024xf32> to vector<32x1024xf32>
    %25 = arith.negf %24 : vector<32x1024xf32>
    %26 = math.exp %25 : vector<32x1024xf32>
    %cst_18 = arith.constant 1.000000e+00 : f32
    %27 = vector.broadcast %cst_18 : f32 to vector<32x1024xf32>
    %28 = arith.addf %27, %26 : vector<32x1024xf32>
    %29 = arith.divf %27, %28 : vector<32x1024xf32>
    %30 = arith.mulf %23, %29 : vector<32x1024xf32>
    %c0_19 = arith.constant 0 : index
    %c0_20 = arith.constant 0 : index
    %31 = vector.load %arg1[%c0_19, %c0_20] : memref<32x1024xf32, #tpu.memory_space<vmem>>, vector<32x1024xf32>
    %32 = arith.addf %30, %31 : vector<32x1024xf32>
    %cst_21 = arith.constant dense<0.000000e+00> : vector<1024xf32>
    %33 = vector.multi_reduction <add>, %32, %cst_21 [0] : vector<32x1024xf32> to vector<1024xf32>
    %34 = vector.shape_cast %33 : vector<1024xf32> to vector<1x1024xf32>
    %cst_22 = arith.constant 3.200000e+01 : f32
    %35 = vector.broadcast %cst_22 : f32 to vector<1x1024xf32>
    %36 = arith.divf %34, %35 : vector<1x1024xf32>
    %37 = arith.mulf %32, %32 : vector<32x1024xf32>
    %cst_23 = arith.constant dense<0.000000e+00> : vector<1024xf32>
    %38 = vector.multi_reduction <add>, %37, %cst_23 [0] : vector<32x1024xf32> to vector<1024xf32>
    %39 = vector.shape_cast %38 : vector<1024xf32> to vector<1x1024xf32>
    %cst_24 = arith.constant 3.200000e+01 : f32
    %40 = vector.broadcast %cst_24 : f32 to vector<1x1024xf32>
    %41 = arith.divf %39, %40 : vector<1x1024xf32>
    %42 = arith.mulf %36, %36 : vector<1x1024xf32>
    %43 = arith.subf %41, %42 : vector<1x1024xf32>
    %cst_25 = arith.constant 9.99999974E-6 : f32
    %44 = vector.broadcast %cst_25 : f32 to vector<1x1024xf32>
    %45 = arith.addf %43, %44 : vector<1x1024xf32>
    %46 = math.rsqrt %45 : vector<1x1024xf32>
    %47 = vector.broadcast %36 : vector<1x1024xf32> to vector<32x1024xf32>
    %48 = arith.subf %32, %47 : vector<32x1024xf32>
    %49 = vector.broadcast %46 : vector<1x1024xf32> to vector<32x1024xf32>
    %50 = arith.mulf %48, %49 : vector<32x1024xf32>
    %c0_26 = arith.constant 0 : index
    %c0_27 = arith.constant 0 : index
    %51 = vector.load %arg8[%c0_26, %c0_27] : memref<32x1xf32, #tpu.memory_space<vmem>>, vector<32x1xf32>
    %52 = vector.broadcast %51 : vector<32x1xf32> to vector<32x1024xf32>
    %53 = arith.mulf %50, %52 : vector<32x1024xf32>
    %c0_28 = arith.constant 0 : index
    %c0_29 = arith.constant 0 : index
    %54 = vector.load %arg9[%c0_28, %c0_29] : memref<32x1xf32, #tpu.memory_space<vmem>>, vector<32x1xf32>
    %55 = vector.broadcast %54 : vector<32x1xf32> to vector<32x1024xf32>
    %56 = arith.addf %53, %55 : vector<32x1024xf32>
    %c0_30 = arith.constant 0 : index
    %c0_31 = arith.constant 0 : index
    %57 = vector.load %arg10[%c0_30, %c0_31] : memref<32x1024xf32, #tpu.memory_space<vmem>>, vector<32x1024xf32>
    tpu.vector_store %arg10[%c0_30, %c0_31], %56 {strides = array<i32>} : memref<32x1024xf32, #tpu.memory_space<vmem>>, vector<32x1024xf32>,
    return
  }
  func.func @transform_0(%arg0: i32) -> (i32, i32) {
    %c0_i32 = arith.constant 0 : i32
    %c0_i32_0 = arith.constant 0 : i32
    return %c0_i32, %arg0 : i32, i32
  }
  func.func @transform_1(%arg0: i32) -> (i32, i32) {
    %c0_i32 = arith.constant 0 : i32
    %c0_i32_0 = arith.constant 0 : i32
    return %c0_i32, %arg0 : i32, i32
  }
  func.func @transform_2(%arg0: i32) -> (i32, i32) {
    %c0_i32 = arith.constant 0 : i32
    %c0_i32_0 = arith.constant 0 : i32
    %c0_i32_1 = arith.constant 0 : i32
    return %c0_i32, %c0_i32_0 : i32, i32
  }
  func.func @transform_3(%arg0: i32) -> (i32, i32) {
    %c0_i32 = arith.constant 0 : i32
    %c0_i32_0 = arith.constant 0 : i32
    %c0_i32_1 = arith.constant 0 : i32
    return %c0_i32, %c0_i32_0 : i32, i32
  }
  func.func @transform_4(%arg0: i32) -> (i32, i32) {
    %c0_i32 = arith.constant 0 : i32
    %c0_i32_0 = arith.constant 0 : i32
    %c0_i32_1 = arith.constant 0 : i32
    return %c0_i32, %c0_i32_0 : i32, i32
  }
  func.func @transform_5(%arg0: i32) -> (i32, i32) {
    %c0_i32 = arith.constant 0 : i32
    %c0_i32_0 = arith.constant 0 : i32
    %c0_i32_1 = arith.constant 0 : i32
    return %c0_i32, %c0_i32_0 : i32, i32
  }
  func.func @transform_6(%arg0: i32) -> (i32, i32) {
    %c0_i32 = arith.constant 0 : i32
    %c0_i32_0 = arith.constant 0 : i32
    %c0_i32_1 = arith.constant 0 : i32
    return %c0_i32, %c0_i32_0 : i32, i32
  }
  func.func @transform_7(%arg0: i32) -> (i32, i32) {
    %c0_i32 = arith.constant 0 : i32
    %c0_i32_0 = arith.constant 0 : i32
    %c0_i32_1 = arith.constant 0 : i32
    return %c0_i32, %c0_i32_0 : i32, i32
  }
  func.func @transform_8(%arg0: i32) -> (i32, i32) {
    %c0_i32 = arith.constant 0 : i32
    %c0_i32_0 = arith.constant 0 : i32
    %c0_i32_1 = arith.constant 0 : i32
    return %c0_i32, %c0_i32_0 : i32, i32
  }
  func.func @transform_9(%arg0: i32) -> (i32, i32) {
    %c0_i32 = arith.constant 0 : i32
    %c0_i32_0 = arith.constant 0 : i32
    return %c0_i32, %arg0 : i32, i32
  }
}

</mosaic_0001>

<bundles_post_ra>
// kernel: tpu_custom_call.1
= control target key start
LH: loop header
LB: loop body
LE: loop exit
PB: predicated region body
PF: predicated region fallthrough
CT: control target
= control target key end

     0   :  { %14 = vsyncpa [#allocation3], 0  ;;  %s5881_s0 = inlined_call_operand.hbm [shape: f32[32,2048], index: 0, kind: input, shape index: {}]   ;;  %s5882_s1 = inlined_call_operand.vmem [shape: f32[16,2048], index: 1, kind: input, shape index: {}]   ;;  %s5883_s2 = inlined_call_operand.vmem [shape: f32[32,32], index: 2, kind: input, shape index: {}]   ;;  %s5884_s3 = inlined_call_operand.vmem [shape: f32[32,16], index: 3, kind: input, shape index: {}]   ;;  %s5885_s4 = inlined_call_operand.vmem [shape: f32[32,1], index: 4, kind: input, shape index: {}]   ;;  %s5886_s5 = inlined_call_operand.vmem [shape: f32[64,32], index: 5, kind: input, shape index: {}]   ;;  %s5887_s6 = inlined_call_operand.vmem [shape: f32[64,1], index: 6, kind: input, shape index: {}]   ;;  %s5888_s7 = inlined_call_operand.vmem [shape: f32[32,1], index: 7, kind: input, shape index: {}]   ;;  %s5889_s8 = inlined_call_operand.vmem [shape: f32[32,1], index: 8, kind: input, shape index: {}]   ;;  %s5890_s9 = inlined_call_operand.hbm [shape: f32[32,2048], index: 9, kind: output, shape index: {}]  }
   0x1   :  { %16 = vsyncpa [#allocation3 + $0x1], 0 }
   0x2   :  { %17 = vsyncpa [#allocation4], 0 }
   0x3   :  { %19 = vsyncpa [#allocation4 + $0x1], 0  ;;  %s3579_s30 = smov 0   ;;  %s3581_s10 = smov 0  }
   0x4   :  { %s3583_s11 = smov 0   ;;  %s3585_s12 = smov 0  }
   0x5 LB: > { %5914 = sst [smem:[#allocation9_spill]] %s3507_s30  ;;  %s3600_s13 = sadd.s32 4294967295, %s3519_s12   ;;  %s3519_s12 = sphi %s3585_s12, %s6047_s12   ;;  %s3515_s11 = sphi %s3583_s11, %s6049_s11   ;;  %s3511_s10 = sphi %s3581_s10, %s6051_s10   ;;  %s3507_s30 = sphi %s3579_s30, %s6050_s30  }
   0x6   : > { %5915 = sst [smem:[#allocation10_spill]] %s3515_s11  ;;  %s2918_s14 = sadd.s32 4294967294, %s3519_s12  }
   0x7   : > { %s3604_s15 = sadd.s32 1, %s3519_s12   ;;  %s32_s16 = sadd.s32 1, %s3515_s11 }
   0x8   : > { %5916 = sst [smem:[#allocation11_spill]] %s3604_s15  ;;  %s29_s17 = ssub.s32 %s3519_s12, %s3604_s15 }
   0x9   : > { %p39_p0 = scmp.ne.s32.totalorder %s3515_s11, %s3511_s10  ;;  %p30_p1 = scmp.eq.s32.totalorder %s29_s17, 0 }
   0xa   : > { %p40_p2 = scmp.eq.s32.totalorder %s3519_s12, 0  ;;  %p45_p3 = scmp.ne.s32.totalorder %s3511_s10, %s3507_s30 }
   0xb   : > { %p46_p4 = scmp.eq.s32.totalorder %s3600_s13, 0  ;;  %p242_p7 = scmp.eq.s32.totalorder %s3600_s13, 1 }
   0xc   : > { %s3616_s18 = scalar_select %p30_p1, %s3515_s11, %s32_s16  }
   0xd   : > { %p3618_p5 = por %p40_p2, %p39_p0  ;;  %p3622_p6 = por %p46_p4, %p45_p3 }
   0xe   : > { %5917 = sst [smem:[#allocation12_spill]] %s3616_s18  ;;  %p248_p8 = scmp.eq.s32.totalorder %s2918_s14, 1 }
   0xf   : > { %p3627_p9 = por %p242_p7, %p39_p0  ;;  %p2920_p11 = scmp.ge.s32.totalorder %s3519_s12, 2 }
  0x10   : > { %p3631_p10 = por %p248_p8, %p45_p3  ;;  %s3639_s23 = sand.u32 (!%p2920_p11), 1, %s3515_s11  }
  0x11   : > { %s5920_s21 = scalar_select %p3627_p9, 1, 0 }
  0x12   : > { %s5922_s22 = scalar_select %p3631_p10, 1, 0 }
  0x13   : > { %5921 = sst [smem:[#allocation13_spill]] %s5920_s21  ;;  %285 = sbr.rel (%p2920_p11) target bundleno = 56 (0x38), region = 44 }
  0x14   : > { %5923 = sst [smem:[#allocation14_spill]] %s5922_s22  ;;  %s3128_s24 = sshll.u32 (!%p2920_p11), %s3519_s12, 6 }
  0x15   : > { %s2921_s25 = sshll.u32 (!%p2920_p11), %s3639_s23, 8  ;;  %s298_s28 = scalar_lea.hbm (!%p2920_p11), %s5881_s0, %s3128_s24 }
  0x16   : > { %s299_s29 = sshll.u32 (!%p2920_p11), %s298_s28, 4  ;;  %s293_s14 = scalar_lea.vmem (!%p2920_p11), [#allocation2], %s2921_s25  ;;  %s300_s29 = int_to_ptr.hbm [resolvable:$true] %s299_s29 }
  0x17   : > { %s301_s16 = sshll.u32 (!%p2920_p11), %s293_s14, 4  ;;  %s290_s17 = scalar_lea.sflag (!%p2920_p11), [#allocation3], %s3639_s23  ;;  %s302_s16 = int_to_ptr.vmem [resolvable:$true] %s301_s16 }
  0x18   : > { %s3425_s18 = sshra.s32 %s300_s29, 4  ;;  %s3431_s30 = scalar_lea.hbm %s5881_s0, 512  ;;  %s3426_s18 = int_to_ptr.hbm [resolvable:$true] %s3425_s18 }
  0x19   : > { %s3427_s15 = scalar_lea.hbm %s3426_s18, 256  ;;  %p3432_p1 = scmp.lt.s32.totalorder %s3426_s18, %s5881_s0 }
  0x1a   : > { %p3428_p12 = scmp.ne.s32.totalorder %s3426_s18, %s3427_s15  ;;  %p3433_p2 = scmp.lt.s32.totalorder %s3431_s30, %s3427_s15 }
  0x1c   : > { %p3429_p13 = pnand %p3428_p12, %p3618_p5  ;;  %p3434_p3 = por %p3433_p2, %p3432_p1 }
  0x1e   : > { %p3430_p0 = pneg %p3429_p13 }
  0x20   : > { %p3435_p4 = pnand %p3434_p3, %p3430_p0 }
  0x22   : > { %3438 = shalt.err (!%p3435_p4)
}
  0x23   : > { %s3521_s25 = smov 2048   ;;  %s3522_s27 = smov 1024  }
  0x24   : > { %s3523_s28 = smov 64   ;;  %310 = sbr.rel (!%p3618_p5) target bundleno = 56 (0x38), region = 52 }
  0x25   : > { %3131 = dma.hbm_to_vmem [thread:$0]  (%p3618_p5), %s300_s29, 4096, %s302_s16, %s290_s17, %s3521_s25, %s3522_s27, %s3523_s28  }
  0x26   : > { %s2924_s11 = sshll.u32 (%p3618_p5), %s3639_s23, 7  ;;  %s3667_s30 = scalar_lea.vmem (%p3618_p5), %s5882_s1, %s3128_s24 }
  0x27   : > { %v330_v0 = vld [vmem:[%s3667_s30] sm:$0xff] (%p3618_p5)  ;;  %v332_v1 = vld [vmem:[%s3667_s30 + $0x8] sm:$0xff] (%p3618_p5)  ;;  %v334_v2 = vld [vmem:[%s3667_s30 + $0x10] sm:$0xff] (%p3618_p5)  ;;  %s314_s15 = scalar_lea.vmem (%p3618_p5), [#allocation5], %s2924_s11 }
  0x28   : > { %331 = vst [vmem:[%s314_s15] sm:$0xff] (%p3618_p5), %v330_v0  ;;  %v336_v3 = vld [vmem:[%s3667_s30 + $0x18] sm:$0xff] (%p3618_p5)  ;;  %v338_v4 = vld [vmem:[%s3667_s30 + $0x20] sm:$0xff] (%p3618_p5)  ;;  %v340_v5 = vld [vmem:[%s3667_s30 + $0x28] sm:$0xff] (%p3618_p5) }
  0x29   : > { %333 = vst [vmem:[%s314_s15 + $0x8] sm:$0xff] %v332_v1  ;;  %v342_v6 = vld [vmem:[%s3667_s30 + $0x30] sm:$0xff]  ;;  %v344_v7 = vld [vmem:[%s3667_s30 + $0x38] sm:$0xff]  ;;  %v346_v8 = vld [vmem:[%s3667_s30 + $0x80] sm:$0xff] }
  0x2a   : > { %335 = vst [vmem:[%s314_s15 + $0x10] sm:$0xff] %v334_v2  ;;  %v348_v9 = vld [vmem:[%s3667_s30 + $0x88] sm:$0xff]  ;;  %v350_v10 = vld [vmem:[%s3667_s30 + $0x90] sm:$0xff]  ;;  %v352_v11 = vld [vmem:[%s3667_s30 + $0x98] sm:$0xff] }
  0x2b   : > { %337 = vst [vmem:[%s314_s15 + $0x18] sm:$0xff] %v336_v3  ;;  %v354_v12 = vld [vmem:[%s3667_s30 + $0xa0] sm:$0xff]  ;;  %v356_v13 = vld [vmem:[%s3667_s30 + $0xa8] sm:$0xff]  ;;  %v358_v14 = vld [vmem:[%s3667_s30 + $0xb0] sm:$0xff] }
  0x2c   : > { %339 = vst [vmem:[%s314_s15 + $0x20] sm:$0xff] %v338_v4  ;;  %v360_v15 = vld [vmem:[%s3667_s30 + $0xb8] sm:$0xff] }
  0x2d   : > { %341 = vst [vmem:[%s314_s15 + $0x28] sm:$0xff] %v340_v5 }
  0x2e   : > { %343 = vst [vmem:[%s314_s15 + $0x30] sm:$0xff] %v342_v6 }
  0x2f   : > { %345 = vst [vmem:[%s314_s15 + $0x38] sm:$0xff] %v344_v7 }
  0x30   : > { %347 = vst [vmem:[%s314_s15 + $0x40] sm:$0xff] %v346_v8 }
  0x31   : > { %349 = vst [vmem:[%s314_s15 + $0x48] sm:$0xff] %v348_v9 }
  0x32   : > { %351 = vst [vmem:[%s314_s15 + $0x50] sm:$0xff] %v350_v10 }
  0x33   : > { %353 = vst [vmem:[%s314_s15 + $0x58] sm:$0xff] %v352_v11 }
  0x34   : > { %355 = vst [vmem:[%s314_s15 + $0x60] sm:$0xff] %v354_v12 }
  0x35   : > { %357 = vst [vmem:[%s314_s15 + $0x68] sm:$0xff] %v356_v13 }
  0x36   : > { %359 = vst [vmem:[%s314_s15 + $0x70] sm:$0xff] %v358_v14 }
  0x37   : > { %361 = vst [vmem:[%s314_s15 + $0x78] sm:$0xff] %v360_v15 }
  0x38 PF: > { %p2927_p5 = scmp.ge.s32.totalorder %s3519_s12, 1  ;;  %p366_p7 = scmp.lt.s32.totalorder %s3519_s12, 3 }
  0x3a   : > { %p367_p8 = pnand %p2927_p5, %p366_p7 }
  0x3c   : > { %370 = sbr.rel (%p367_p8) target bundleno = 795 (0x31b), region = 75 }
  0x41   : > { %s3688_s18 = sand.u32 1, %s3511_s10  }
  0x42   : > { %s2928_s19 = sshll.u32 %s3688_s18, 8  ;;  %s373_s23 = scalar_lea.sflag [#allocation3], %s3688_s18 }
  0x43   : > { %s3694_s24 = scalar_lea.vmem [#allocation2], %s2928_s19 }
  0x44   : > { %3498 = dma.done.wait (%p3622_p6), %s373_s23, 4096  }
  0x45   : > { %3500 = vsyncadd (%p3622_p6), %s373_s23, 4294963200  ;;  %s2929_s29 = sshll.u32 %s3688_s18, 7  ;;  %v3714_v24 = vld [vmem:[%s5884_s3] sm:$0xff]  ;;  %vm482_vm0 = vcmask 130048   ;;  %v3735_v33 = vld [vmem:[%s5884_s3 + $0x8] sm:$0xff]  ;;  %v3524_v36 = vmov 0  }
  0x46   : > { %s3701_s14 = scalar_lea.vmem [#allocation5], %s2929_s29  ;;  %v3748_v34 = vld [vmem:[%s5884_s3 + $0x10] sm:$0xff]  ;;  %v3761_v35 = vld [vmem:[%s5884_s3 + $0x18] sm:$0xff]  ;;  %3180 = vset.pattern.permute.xlu0 %v3524_v36  ;;  %3181 = vset.pattern.permute.xlu1 %v3524_v36  ;;  %v450_v38 = vld [vmem:[%s3694_s24 + $0xc0] sm:$0xff]  ;;  %vm727_vm1 = vcmask 261120   ;;  %s5672_s23 = scalar_lea.vmem [#allocation6], %s2928_s19 }
  0x47   : > { %v466_v16 = vld [vmem:[%s3701_s14 + $0x40] sm:$0xff]  ;;  %v467_v17 = vld [vmem:[%s3701_s14 + $0x48] sm:$0xff]  ;;  %v468_v18 = vld [vmem:[%s3701_s14 + $0x50] sm:$0xff]  ;;  %3182 = vset.pattern.permute.xlu2 %v3524_v36  ;;  %s3130_s19 = sshll.u32 %s3600_s13, 6  ;;  %s2812_s17 = scalar_lea.sflag [#allocation4], %s3688_s18 }
  0x48   : > { %509 = vmatpush.msra.mxu0 %v466_v16  ;;  %538 = vmatpush.msra.mxu1 %v467_v17  ;;  %v469_v19 = vld [vmem:[%s3701_s14 + $0x58] sm:$0xff]  ;;  %v458_v20 = vld [vmem:[%s3701_s14] sm:$0xff]  ;;  %v459_v21 = vld [vmem:[%s3701_s14 + $0x8] sm:$0xff]  ;;  %s2823_s29 = scalar_lea.hbm %s5890_s9, %s3130_s19  ;;  %s3473_s11 = scalar_lea.hbm %s5890_s9, 512 }
  0x49   : > { %567 = vmatpush.msra.mxu2 %v468_v18  ;;  %596 = vmatpush.msra.mxu3 %v469_v19  ;;  %v460_v22 = vld [vmem:[%s3701_s14 + $0x10] sm:$0xff]  ;;  %v461_v23 = vld [vmem:[%s3701_s14 + $0x18] sm:$0xff]  ;;  %v470_v27 = vld [vmem:[%s3701_s14 + $0x60] sm:$0xff]  ;;  %s2826_s20 = sshll.u32 %s2823_s29, 4  ;;  %s2827_s20 = int_to_ptr.hbm [resolvable:$true] %s2826_s20 }
  0x4a   : > { %510 = vmatpush.msra.mxu0 %v458_v20  ;;  %539 = vmatpush.msra.mxu1 %v459_v21  ;;  %v472_v25 = vld [vmem:[%s3701_s14 + $0x70] sm:$0xff]  ;;  %v473_v26 = vld [vmem:[%s3701_s14 + $0x78] sm:$0xff]  ;;  %v471_v28 = vld [vmem:[%s3701_s14 + $0x68] sm:$0xff]  ;;  %s3467_s26 = sshra.s32 %s2827_s20, 4  ;;  %s3468_s26 = int_to_ptr.hbm [resolvable:$true] %s3467_s26 }
  0x4b   : > { %568 = vmatpush.msra.mxu2 %v460_v22  ;;  %597 = vmatpush.msra.mxu3 %v461_v23  ;;  %v464_v29 = vld [vmem:[%s3701_s14 + $0x30] sm:$0xff]  ;;  %v465_v30 = vld [vmem:[%s3701_s14 + $0x38] sm:$0xff]  ;;  %v462_v31 = vld [vmem:[%s3701_s14 + $0x20] sm:$0xff]  ;;  %s3469_s25 = scalar_lea.hbm %s3468_s26, 256  ;;  %p3474_p0 = scmp.lt.s32.totalorder %s3468_s26, %s5890_s9 }
  0x4c   : > { %2931 = vmatmul.msk.f32.vlgmr.msra.gmra.mxu0 %vm482_vm0, %v3714_v24  ;;  %2935 = vmatmul.msk.f32.vlgmr.msra.gmra.mxu1 %vm482_vm0, %v3714_v24  ;;  %v463_v32 = vld [vmem:[%s3701_s14 + $0x28] sm:$0xff]  ;;  %v975_v37 = vld [vmem:[%s5885_s4 + $0x18] sm:$0xff]  ;;  %v452_v40 = vld [vmem:[%s3694_s24 + $0xd0] sm:$0xff]  ;;  %s2824_s14 = sshll.u32 %s5672_s23, 4  ;;  %p3470_p6 = scmp.ne.s32.totalorder %s3468_s26, %s3469_s25  ;;  %s2825_s14 = int_to_ptr.vmem [resolvable:$true] %s2824_s14 }
  0x4d   : > { %2939 = vmatmul.msk.f32.vlgmr.msra.gmra.mxu2 %vm482_vm0, %v3714_v24  ;;  %2943 = vmatmul.msk.f32.vlgmr.msra.gmra.mxu3 %vm482_vm0, %v3714_v24  ;;  %v451_v39 = vld [vmem:[%s3694_s24 + $0xc8] sm:$0xff]  ;;  %v453_v41 = vld [vmem:[%s3694_s24 + $0xd8] sm:$0xff]  ;;  %v442_v42 = vld [vmem:[%s3694_s24 + $0x80] sm:$0xff]  ;;  %p3475_p1 = scmp.lt.s32.totalorder %s3473_s11, %s3469_s25 }
  0x4e   : > { %683 = vmatpush.msrb.mxu2 %v472_v25  ;;  %712 = vmatpush.msrb.mxu3 %v473_v26  ;;  %v443_v43 = vld [vmem:[%s3694_s24 + $0x88] sm:$0xff]  ;;  %v444_v44 = vld [vmem:[%s3694_s24 + $0x90] sm:$0xff]  ;;  %v445_v45 = vld [vmem:[%s3694_s24 + $0x98] sm:$0xff]  ;;  %p3471_p12 = pnand %p3470_p6, %p3627_p9 }
  0x4f   : > { %625 = vmatpush.msrb.mxu0 %v470_v27  ;;  %654 = vmatpush.msrb.mxu1 %v471_v28  ;;  %v434_v46 = vld [vmem:[%s3694_s24 + $0x40] sm:$0xff]  ;;  %v435_v47 = vld [vmem:[%s3694_s24 + $0x48] sm:$0xff]  ;;  %v436_v48 = vld [vmem:[%s3694_s24 + $0x50] sm:$0xff]  ;;  %p3476_p2 = por %p3475_p1, %p3474_p0 }
  0x50   : > { %684 = vmatpush.msrb.mxu2 %v464_v29  ;;  %713 = vmatpush.msrb.mxu3 %v465_v30  ;;  %v437_v49 = vld [vmem:[%s3694_s24 + $0x58] sm:$0xff]  ;;  %v426_v50 = vld [vmem:[%s3694_s24] sm:$0xff]  ;;  %v427_v51 = vld [vmem:[%s3694_s24 + $0x8] sm:$0xff]  ;;  %p3472_p13 = pneg %p3471_p12 }
  0x51   : > { %626 = vmatpush.msrb.mxu0 %v462_v31  ;;  %655 = vmatpush.msrb.mxu1 %v463_v32  ;;  %v428_v52 = vld [vmem:[%s3694_s24 + $0x10] sm:$0xff]  ;;  %v429_v53 = vld [vmem:[%s3694_s24 + $0x18] sm:$0xff]  ;;  %v973_v55 = vld [vmem:[%s5885_s4 + $0x8] sm:$0xff] }
  0x52   : > { %993 = vperm.xlu0 %3180, %v975_v37   ;;  %810 = vmatpush.msra.mxu2 %v452_v40  ;;  %v974_v54 = vld [vmem:[%s5885_s4 + $0x10] sm:$0xff]  ;;  %v972_v57 = vld [vmem:[%s5885_s4] sm:$0xff]  ;;  %v1229_v58 = vld [vmem:[%s5887_s6 + $0x8] sm:$0xff]  ;;  %p3477_p3 = pnand %p3476_p2, %p3472_p13 }
  0x53   : > { %752 = vmatpush.msra.mxu0 %v450_v38  ;;  %781 = vmatpush.msra.mxu1 %v451_v39  ;;  %v1234_v56 = vld [vmem:[%s5887_s6 + $0x30] sm:$0xff]  ;;  %v1235_v59 = vld [vmem:[%s5887_s6 + $0x38] sm:$0xff]  ;;  %v2667_v60 = vld [vmem:[%s5888_s7] sm:$0xff] }
  0x54   : > { %2932 = vmatmul.msk.f32.gmra.mxu0 %vm482_vm0, %v3735_v33  ;;  %2936 = vmatmul.msk.f32.gmra.mxu1 %vm482_vm0, %v3735_v33  ;;  %v454_v61 = vld [vmem:[%s3694_s24 + $0xe0] sm:$0xff]  ;;  %v455_v62 = vld [vmem:[%s3694_s24 + $0xe8] sm:$0xff]  ;;  %v456_v63 = vld [vmem:[%s3694_s24 + $0xf0] sm:$0xff] }
  0x55   : > { %2940 = vmatmul.msk.f32.gmra.mxu2 %vm482_vm0, %v3735_v33  ;;  %2944 = vmatmul.msk.f32.gmra.mxu3 %vm482_vm0, %v3735_v33  ;;  %v457_v0 = vld [vmem:[%s3694_s24 + $0xf8] sm:$0xff]  ;;  %v446_v1 = vld [vmem:[%s3694_s24 + $0xa0] sm:$0xff]  ;;  %v447_v2 = vld [vmem:[%s3694_s24 + $0xa8] sm:$0xff] }
  0x56   : > { %839 = vmatpush.msra.mxu3 %v453_v41  ;;  %753 = vmatpush.msra.mxu0 %v442_v42  ;;  %v448_v3 = vld [vmem:[%s3694_s24 + $0xb0] sm:$0xff]  ;;  %v449_v4 = vld [vmem:[%s3694_s24 + $0xb8] sm:$0xff]  ;;  %v438_v5 = vld [vmem:[%s3694_s24 + $0x60] sm:$0xff] }
  0x57   : > { %782 = vmatpush.msra.mxu1 %v443_v43  ;;  %811 = vmatpush.msra.mxu2 %v444_v44  ;;  %v439_v6 = vld [vmem:[%s3694_s24 + $0x68] sm:$0xff]  ;;  %v440_v7 = vld [vmem:[%s3694_s24 + $0x70] sm:$0xff]  ;;  %v474_v8 = vld [vmem:[%s5883_s2] sm:$0xff] }
  0x58   : > { %840 = vmatpush.msra.mxu3 %v445_v45  ;;  %754 = vmatpush.msra.mxu0 %v434_v46  ;;  %v441_v9 = vld [vmem:[%s3694_s24 + $0x78] sm:$0xff]  ;;  %v430_v10 = vld [vmem:[%s3694_s24 + $0x20] sm:$0xff]  ;;  %v431_v11 = vld [vmem:[%s3694_s24 + $0x28] sm:$0xff] }
  0x59   : > { %783 = vmatpush.msra.mxu1 %v435_v47  ;;  %812 = vmatpush.msra.mxu2 %v436_v48  ;;  %v432_v12 = vld [vmem:[%s3694_s24 + $0x30] sm:$0xff]  ;;  %v433_v13 = vld [vmem:[%s3694_s24 + $0x38] sm:$0xff]  ;;  %v475_v16 = vld [vmem:[%s5883_s2 + $0x8] sm:$0xff] }
  0x5a   : > { %841 = vmatpush.msra.mxu3 %v437_v49  ;;  %755 = vmatpush.msra.mxu0 %v426_v50  ;;  %v2670_v14 = vld [vmem:[%s5888_s7 + $0x18] sm:$0xff]  ;;  %v1230_v15 = vld [vmem:[%s5887_s6 + $0x10] sm:$0xff]  ;;  %v2668_v18 = vld [vmem:[%s5888_s7 + $0x8] sm:$0xff] }
  0x5b   : > { %784 = vmatpush.msra.mxu1 %v427_v51  ;;  %813 = vmatpush.msra.mxu2 %v428_v52  ;;  %v2725_v17 = vld [vmem:[%s5889_s8 + $0x10] sm:$0xff]  ;;  %v2723_v20 = vld [vmem:[%s5889_s8] sm:$0xff]  ;;  %v477_v21 = vld [vmem:[%s5883_s2 + $0x18] sm:$0xff] }
  0x5c   : > { %2933 = vmatmul.msk.f32.gmra.mxu0 %vm482_vm0, %v3748_v34  ;;  %2937 = vmatmul.msk.f32.gmra.mxu1 %vm482_vm0, %v3748_v34  ;;  %v476_v19 = vld [vmem:[%s5883_s2 + $0x10] sm:$0xff]  ;;  %v2726_v22 = vld [vmem:[%s5889_s8 + $0x18] sm:$0xff] }
  0x5d   : > { %2941 = vmatmul.msk.f32.gmra.mxu2 %vm482_vm0, %v3748_v34  ;;  %2945 = vmatmul.msk.f32.gmra.mxu3 %vm482_vm0, %v3748_v34 }
  0x5e   : > { %842 = vmatpush.msra.mxu3 %v429_v53  ;;  %988 = vperm.xlu0 %3180, %v974_v54  }
  0x5f   : > { %983 = vperm.xlu1 %3181, %v973_v55  }
  0x64   : > { %2934 = vmatmul.msk.f32.gmra.mxu0 %vm482_vm0, %v3761_v35  ;;  %2938 = vmatmul.msk.f32.gmra.mxu1 %vm482_vm0, %v3761_v35 }
  0x65   : > { %2942 = vmatmul.msk.f32.gmra.mxu2 %vm482_vm0, %v3761_v35  ;;  %2946 = vmatmul.msk.f32.gmra.mxu3 %vm482_vm0, %v3761_v35 }
  0x66   : > { %1268 = vperm.xlu0 %3180, %v1234_v56  }
  0x67   : > { %978 = vperm.xlu1 %3181, %v972_v57  }
  0x6c   : > { %2947 = vmatmul.msk.f32.vlgmr.msrb.gmra.mxu0 %vm482_vm0, %v3714_v24  ;;  %2951 = vmatmul.msk.f32.vlgmr.msrb.gmra.mxu1 %vm482_vm0, %v3714_v24 }
  0x6d   : > { %2955 = vmatmul.msk.f32.vlgmr.msrb.gmra.mxu2 %vm482_vm0, %v3714_v24  ;;  %2959 = vmatmul.msk.f32.vlgmr.msrb.gmra.mxu3 %vm482_vm0, %v3714_v24 }
  0x6e   : > { %1243 = vperm.xlu0 %3180, %v1229_v58   ;;  %868 = vmatpush.msrb.mxu0 %v454_v61 }
  0x6f   : > { %1273 = vperm.xlu1 %3181, %v1235_v59   ;;  %897 = vmatpush.msrb.mxu1 %v455_v62 }
  0x70   : > { %926 = vmatpush.msrb.mxu2 %v456_v63  ;;  %955 = vmatpush.msrb.mxu3 %v457_v0 }
  0x71   : > { %869 = vmatpush.msrb.mxu0 %v446_v1  ;;  %898 = vmatpush.msrb.mxu1 %v447_v2 }
  0x72   : > { %927 = vmatpush.msrb.mxu2 %v448_v3  ;;  %956 = vmatpush.msrb.mxu3 %v449_v4 }
  0x73   : > { %870 = vmatpush.msrb.mxu0 %v438_v5  ;;  %899 = vmatpush.msrb.mxu1 %v439_v6 }
  0x74   : > { %2948 = vmatmul.msk.f32.gmra.mxu0 %vm482_vm0, %v3735_v33  ;;  %2952 = vmatmul.msk.f32.gmra.mxu1 %vm482_vm0, %v3735_v33 }
  0x75   : > { %2956 = vmatmul.msk.f32.gmra.mxu2 %vm482_vm0, %v3735_v33  ;;  %2960 = vmatmul.msk.f32.gmra.mxu3 %vm482_vm0, %v3735_v33 }
  0x76   : > { %2673 = vperm.xlu0 %3180, %v2667_v60   ;;  %928 = vmatpush.msrb.mxu2 %v440_v7 }
  0x77   : > { %957 = vmatpush.msrb.mxu3 %v441_v9  ;;  %871 = vmatpush.msrb.mxu0 %v430_v10 }
  0x78   : > { %900 = vmatpush.msrb.mxu1 %v431_v11  ;;  %929 = vmatpush.msrb.mxu2 %v432_v12 }
  0x79   : > { %958 = vmatpush.msrb.mxu3 %v433_v13  ;;  %1248 = vperm.xlu1 %3181, %v1230_v15  }
  0x7c   : > { %2949 = vmatmul.msk.f32.gmra.mxu0 %vm482_vm0, %v3748_v34  ;;  %2953 = vmatmul.msk.f32.gmra.mxu1 %vm482_vm0, %v3748_v34 }
  0x7d   : > { %2957 = vmatmul.msk.f32.gmra.mxu2 %vm482_vm0, %v3748_v34  ;;  %2961 = vmatmul.msk.f32.gmra.mxu3 %vm482_vm0, %v3748_v34 }
  0x7e   : > { %2688 = vperm.xlu0 %3180, %v2670_v14  }
  0x81   : > { %2678 = vperm.xlu1 %3181, %v2668_v18  }
  0x84   : > { %2950 = vmatmul.msk.f32.gmra.mxu0 %vm482_vm0, %v3761_v35  ;;  %2954 = vmatmul.msk.f32.gmra.mxu1 %vm482_vm0, %v3761_v35 }
  0x85   : > { %2958 = vmatmul.msk.f32.gmra.mxu2 %vm482_vm0, %v3761_v35  ;;  %2962 = vmatmul.msk.f32.gmra.mxu3 %vm482_vm0, %v3761_v35 }
  0x86   : > { %2739 = vperm.xlu0 %3180, %v2725_v17  }
  0x89   : > { %2729 = vperm.xlu1 %3181, %v2723_v20  }
  0x8c   : > { %2963 = vmatmul.msk.f32.vlgmr.msra.gmra.mxu0 %vm727_vm1, %v474_v8  ;;  %2967 = vmatmul.msk.f32.vlgmr.msra.gmra.mxu1 %vm727_vm1, %v474_v8 }
  0x8d   : > { %2971 = vmatmul.msk.f32.vlgmr.msra.gmra.mxu2 %vm727_vm1, %v474_v8  ;;  %2975 = vmatmul.msk.f32.vlgmr.msra.gmra.mxu3 %vm727_vm1, %v474_v8 }
  0x91   : > { %2744 = vperm.xlu1 %3181, %v2726_v22  }
  0x94   : > { %2964 = vmatmul.msk.f32.gmra.mxu0 %vm727_vm1, %v475_v16  ;;  %2968 = vmatmul.msk.f32.gmra.mxu1 %vm727_vm1, %v475_v16 }
  0x95   : > { %2972 = vmatmul.msk.f32.gmra.mxu2 %vm727_vm1, %v475_v16  ;;  %2976 = vmatmul.msk.f32.gmra.mxu3 %vm727_vm1, %v475_v16 }
  0x9c   : > { %2965 = vmatmul.msk.f32.gmra.mxu0 %vm727_vm1, %v476_v19  ;;  %2969 = vmatmul.msk.f32.gmra.mxu1 %vm727_vm1, %v476_v19 }
  0x9d   : > { %2973 = vmatmul.msk.f32.gmra.mxu2 %vm727_vm1, %v476_v19  ;;  %2977 = vmatmul.msk.f32.gmra.mxu3 %vm727_vm1, %v476_v19 }
  0xa4   : > { %2966 = vmatmul.msk.f32.gmra.mxu0 %vm727_vm1, %v477_v21  ;;  %2970 = vmatmul.msk.f32.gmra.mxu1 %vm727_vm1, %v477_v21 }
  0xa5   : > { %2974 = vmatmul.msk.f32.gmra.mxu2 %vm727_vm1, %v477_v21  ;;  %2978 = vmatmul.msk.f32.gmra.mxu3 %vm727_vm1, %v477_v21 }
  0xac   : > { %2979 = vmatmul.msk.f32.vlgmr.msrb.gmra.mxu0 %vm727_vm1, %v474_v8  ;;  %2983 = vmatmul.msk.f32.vlgmr.msrb.gmra.mxu1 %vm727_vm1, %v474_v8 }
  0xad   : > { %2987 = vmatmul.msk.f32.vlgmr.msrb.gmra.mxu2 %vm727_vm1, %v474_v8  ;;  %2991 = vmatmul.msk.f32.vlgmr.msrb.gmra.mxu3 %vm727_vm1, %v474_v8 }
  0xb4   : > { %2980 = vmatmul.msk.f32.gmra.mxu0 %vm727_vm1, %v475_v16  ;;  %2984 = vmatmul.msk.f32.gmra.mxu1 %vm727_vm1, %v475_v16 }
  0xb5   : > { %2988 = vmatmul.msk.f32.gmra.mxu2 %vm727_vm1, %v475_v16  ;;  %2992 = vmatmul.msk.f32.gmra.mxu3 %vm727_vm1, %v475_v16 }
  0xbc   : > { %2981 = vmatmul.msk.f32.gmra.mxu0 %vm727_vm1, %v476_v19  ;;  %2985 = vmatmul.msk.f32.gmra.mxu1 %vm727_vm1, %v476_v19 }
  0xbd   : > { %2989 = vmatmul.msk.f32.gmra.mxu2 %vm727_vm1, %v476_v19  ;;  %2993 = vmatmul.msk.f32.gmra.mxu3 %vm727_vm1, %v476_v19 }
  0xc4   : > { %2982 = vmatmul.msk.f32.gmra.mxu0 %vm727_vm1, %v477_v21  ;;  %2986 = vmatmul.msk.f32.gmra.mxu1 %vm727_vm1, %v477_v21  ;;  %v3967_v58 = vpop.permute.xlu0 %993 }
  0xc5   : > { %2990 = vmatmul.msk.f32.gmra.mxu2 %vm727_vm1, %v477_v21  ;;  %2994 = vmatmul.msk.f32.gmra.mxu3 %vm727_vm1, %v477_v21 }
  0xc9   : > { %v512_v23 = vpop.f32.mrf.mxu0  ;;  %v541_v24 = vpop.f32.mrf.mxu1 }
  0xd0   : > { %v570_v25 = vpop.f32.mrf.mxu2  ;;  %v599_v26 = vpop.f32.mrf.mxu3 }
  0xd1   : > { %v515_v27 = vpop.f32.mrf.mxu0  ;;  %v544_v28 = vpop.f32.mrf.mxu1 }
  0xd2   : > { %v3961_v53 = vpop.permute.xlu1 %983  ;;  %v3984_v16 = vpop.permute.xlu0 %988 }
  0xd8   : > { %v573_v29 = vpop.f32.mrf.mxu2  ;;  %v602_v30 = vpop.f32.mrf.mxu3 }
  0xd9   : > { %v518_v31 = vpop.f32.mrf.mxu0  ;;  %v547_v32 = vpop.f32.mrf.mxu1 }
  0xda   : > { %v3969_v1 = vpop.permute.xlu1 %978 }
  0xe0   : > { %v3921_v33 = vpop.f32.mrf.mxu2  ;;  %v3923_v34 = vpop.f32.mrf.mxu3 }
  0xe1   : > { %v3925_v35 = vpop.f32.mrf.mxu0  ;;  %v3927_v36 = vpop.f32.mrf.mxu1 }
  0xe8   : > { %v3929_v37 = vpop.f32.mrf.mxu2  ;;  %v3931_v38 = vpop.f32.mrf.mxu3 }
  0xe9   : > { %v3933_v39 = vpop.f32.mrf.mxu0  ;;  %v3935_v40 = vpop.f32.mrf.mxu1 }
  0xf0   : > { %v3937_v41 = vpop.f32.mrf.mxu2  ;;  %v3939_v42 = vpop.f32.mrf.mxu3 }
  0xf1   : > { %v3941_v43 = vpop.f32.mrf.mxu0  ;;  %v3943_v44 = vpop.f32.mrf.mxu1 }
  0xf8   : > { %v3945_v45 = vpop.f32.mrf.mxu2  ;;  %v3947_v46 = vpop.f32.mrf.mxu3 }
  0xf9   : > { %v3949_v47 = vpop.f32.mrf.mxu0  ;;  %v3951_v48 = vpop.f32.mrf.mxu1 }
 0x100   : > { %v3953_v49 = vpop.f32.mrf.mxu2  ;;  %v3955_v50 = vpop.f32.mrf.mxu3 }
 0x101   : > { %v3957_v51 = vpop.f32.mrf.mxu0  ;;  %v3959_v52 = vpop.f32.mrf.mxu1 }
 0x108   : > { %v3963_v54 = vpop.f32.mrf.mxu2  ;;  %v3965_v55 = vpop.f32.mrf.mxu3 }
 0x109   : > { %5924 = vst [vmem:[#allocation15_spill] sm:$0xff] %v3965_v55  ;;  %v757_v56 = vpop.f32.mrf.mxu0  ;;  %v786_v57 = vpop.f32.mrf.mxu1 }
 0x10a   : > { %v758_v59 = vadd.f32 %v757_v56, %v512_v23  ;;  %v787_v0 = vadd.f32 %v786_v57, %v541_v24 }
 0x10c   : > { %v3972_v3 = vadd.f32 %v3969_v1, %v758_v59  ;;  %v3975_v6 = vadd.f32 %v3969_v1, %v787_v0 }
 0x10e   : > { %v1060_v10 = vmin.f32 %v3972_v3, 0.0  ;;  %v1061_v19 = vmin.f32 %v3975_v6, 0.0  ;;  %vm1028_vm2 = vcmp.gt.f32.partialorder %v3972_v3, 0.0  ;;  %vm1029_vm6 = vcmp.gt.f32.partialorder %v3975_v6, 0.0 }
 0x110   : > { %v815_v60 = vpop.f32.mrf.mxu2  ;;  %v844_v61 = vpop.f32.mrf.mxu3  ;;  %v1092_v22 = vmul.f32 1.442695, %v1060_v10 }
 0x111   : > { %v760_v62 = vpop.f32.mrf.mxu0  ;;  %v789_v63 = vpop.f32.mrf.mxu1  ;;  %v816_v2 = vadd.f32 %v815_v60, %v570_v25  ;;  %v845_v17 = vadd.f32 %v844_v61, %v599_v26 }
 0x112   : > { %v761_v4 = vadd.f32 %v760_v62, %v515_v27  ;;  %v790_v5 = vadd.f32 %v789_v63, %v544_v28  ;;  %3183 = vpow2.f32 %v1092_v22 }
 0x113   : > { %v3978_v7 = vadd.f32 %v3969_v1, %v816_v2  ;;  %v3999_v26 = vadd.f32 %v3969_v1, %v845_v17 }
 0x114   : > { %v3982_v13 = vadd.f32 %v3961_v53, %v761_v4  ;;  %v3987_v18 = vadd.f32 %v3961_v53, %v790_v5 }
 0x115   : > { %v1062_v20 = vmin.f32 %v3978_v7, 0.0  ;;  %vm1030_vm15 = vcmp.gt.f32.partialorder %v3978_v7, 0.0 }
 0x116   : > { %v1068_v25 = vmin.f32 %v3982_v13, 0.0  ;;  %v1069_v28 = vmin.f32 %v3987_v18, 0.0  ;;  %vm1036_vm5 = vcmp.gt.f32.partialorder %v3982_v13, 0.0  ;;  %vm1037_vm8 = vcmp.gt.f32.partialorder %v3987_v18, 0.0 }
 0x118   : > { %v818_v8 = vpop.f32.mrf.mxu2  ;;  %v847_v9 = vpop.f32.mrf.mxu3  ;;  %v1108_v0 = vmul.f32 1.442695, %v1068_v25 }
 0x119   : > { %v763_v11 = vpop.f32.mrf.mxu0  ;;  %v792_v12 = vpop.f32.mrf.mxu1  ;;  %v819_v23 = vadd.f32 %v818_v8, %v573_v29  ;;  %v848_v27 = vadd.f32 %v847_v9, %v602_v30  ;;  %v1063_v8 = vmin.f32 %v3999_v26, 0.0  ;;  %v1110_v9 = vmul.f32 1.442695, %v1069_v28 }
 0x11a   : > { %v764_v14 = vadd.f32 %v763_v11, %v518_v31  ;;  %v793_v15 = vadd.f32 %v792_v12, %v547_v32  ;;  %v1094_v31 = vmul.f32 1.442695, %v1061_v19  ;;  %v1096_v32 = vmul.f32 1.442695, %v1062_v20 }
 0x11b   : > { %v4004_v29 = vadd.f32 %v3961_v53, %v819_v23  ;;  %v4010_v2 = vadd.f32 %v3961_v53, %v848_v27  ;;  %v1098_v20 = vmul.f32 1.442695, %v1063_v8 }
 0x11c   : > { %v3992_v21 = vadd.f32 %v3984_v16, %v764_v14  ;;  %v3995_v24 = vadd.f32 %v3984_v16, %v793_v15  ;;  %3185 = vpow2.f32 %v1094_v31  ;;  %v3184_v14 = vpop.eup %3183 }
 0x11d   : > { %3187 = vpow2.f32 %v1096_v32  ;;  %v1071_v15 = vmin.f32 %v4010_v2, 0.0  ;;  %vm1038_vm14 = vcmp.gt.f32.partialorder %v4004_v29, 0.0  ;;  %vm1039_vm0 = vcmp.gt.f32.partialorder %v4010_v2, 0.0 }
 0x11e   : > { %v1076_v56 = vmin.f32 %v3992_v21, 0.0  ;;  %v1077_v60 = vmin.f32 %v3995_v24, 0.0  ;;  %3189 = vpow2.f32 %v1108_v0  ;;  %vm1044_vm7 = vcmp.gt.f32.partialorder %v3992_v21, 0.0 }
 0x11f   : > { %3191 = vpow2.f32 %v1110_v9  ;;  %vm1045_vm9 = vcmp.gt.f32.partialorder %v3995_v24, 0.0 }
 0x120   : > { %v821_v57 = vpop.f32.mrf.mxu2  ;;  %v850_v59 = vpop.f32.mrf.mxu3 }
 0x121   : > { %v822_v61 = vadd.f32 %v821_v57, %v3921_v33  ;;  %v851_v30 = vadd.f32 %v850_v59, %v3923_v34  ;;  %v766_v62 = vpop.f32.mrf.mxu0  ;;  %v795_v63 = vpop.f32.mrf.mxu1  ;;  %v1124_v33 = vmul.f32 1.442695, %v1076_v56 }
 0x122   : > { %v767_v4 = vadd.f32 %v766_v62, %v3925_v35  ;;  %v796_v5 = vadd.f32 %v795_v63, %v3927_v36  ;;  %v1070_v35 = vmin.f32 %v4004_v29, 0.0  ;;  %v1126_v36 = vmul.f32 1.442695, %v1077_v60  ;;  %v3186_v32 = vpop.eup %3185 }
 0x123   : > { %v4016_v10 = vadd.f32 %v3984_v16, %v822_v61  ;;  %v4019_v34 = vadd.f32 %v3984_v16, %v851_v30  ;;  %3193 = vpow2.f32 %v1124_v33  ;;  %v1114_v30 = vmul.f32 1.442695, %v1071_v15  ;;  %v3188_v62 = vpop.eup %3187 }
 0x124   : > { %v4022_v11 = vadd.f32 %v3967_v58, %v767_v4  ;;  %v4025_v12 = vadd.f32 %v3967_v58, %v796_v5  ;;  %v1112_v56 = vmul.f32 1.442695, %v1070_v35  ;;  %3195 = vpow2.f32 %v1126_v36  ;;  %v3190_v5 = vpop.eup %3189 }
 0x125   : > { %v1078_v22 = vmin.f32 %v4016_v10, 0.0  ;;  %v1079_v23 = vmin.f32 %v4019_v34, 0.0  ;;  %vm1046_vm10 = vcmp.gt.f32.partialorder %v4016_v10, 0.0  ;;  %vm1047_vm11 = vcmp.gt.f32.partialorder %v4019_v34, 0.0 }
 0x126   : > { %v1084_v17 = vmin.f32 %v4022_v11, 0.0  ;;  %v1085_v19 = vmin.f32 %v4025_v12, 0.0  ;;  %vm1052_vm3 = vcmp.gt.f32.partialorder %v4022_v11, 0.0  ;;  %vm1053_vm4 = vcmp.gt.f32.partialorder %v4025_v12, 0.0 }
 0x127   : > { %v1128_v63 = vmul.f32 1.442695, %v1078_v22  ;;  %v1130_v8 = vmul.f32 1.442695, %v1079_v23  ;;  %v2995_v23 = vadd.f32 -1.0, %v3184_v14 }
 0x128   : > { %v1140_v25 = vmul.f32 1.442695, %v1084_v17  ;;  %v1142_v27 = vmul.f32 1.442695, %v1085_v19  ;;  %v824_v28 = vpop.f32.mrf.mxu2  ;;  %v853_v31 = vpop.f32.mrf.mxu3 }
 0x129   : > { %v825_v57 = vadd.f32 %v824_v28, %v3929_v37  ;;  %v854_v59 = vadd.f32 %v853_v31, %v3931_v38  ;;  %v873_v60 = vpop.f32.mrf.mxu0  ;;  %v4035_v61 = vpop.f32.mrf.mxu1 }
 0x12a   : > { %3197 = vpow2.f32 %v1140_v25  ;;  %v3192_v37 = vpop.eup %3191  ;;  %v2996_v25 = vadd.f32 -1.0, %v3186_v32  ;;  %v874_v32 = vadd.f32 %v873_v60, %v3933_v39 }
 0x12b   : > { %3199 = vpow2.f32 %v1142_v27  ;;  %v4038_v0 = vadd.f32 %v3967_v58, %v825_v57  ;;  %v4041_v4 = vadd.f32 %v3967_v58, %v854_v59  ;;  %v3194_v33 = vpop.eup %3193  ;;  %v3004_v59 = vadd.f32 -1.0, %v3192_v37 }
 0x12c   : > { %3201 = vpow2.f32 %v1098_v20  ;;  %v3196_v35 = vpop.eup %3195  ;;  %v3003_v20 = vadd.f32 -1.0, %v3190_v5  ;;  %v3011_v57 = vadd.f32 -1.0, %v3194_v33  ;;  %v1188_v37 = vsel %vm1028_vm2, %v3972_v3, %v2995_v23 }
 0x12d   : > { %v1086_v38 = vmin.f32 %v4038_v0, 0.0  ;;  %v1087_v9 = vmin.f32 %v4041_v4, 0.0  ;;  %3203 = vpow2.f32 %v1112_v56  ;;  %v1189_v33 = vsel %vm1029_vm6, %v3975_v6, %v2996_v25  ;;  %v4082_v25 = vld [vmem:[%s5886_s5] sm:$0xff] }
 0x12e   : > { %3205 = vpow2.f32 %v1114_v30  ;;  %v1197_v60 = vsel %vm1037_vm8, %v3987_v18, %v3004_v59  ;;  %vm1054_vm12 = vcmp.gt.f32.partialorder %v4038_v0, 0.0  ;;  %vm1055_vm13 = vcmp.gt.f32.partialorder %v4041_v4, 0.0 }
 0x12f   : > { %v1144_v36 = vmul.f32 1.442695, %v1086_v38  ;;  %v1146_v15 = vmul.f32 1.442695, %v1087_v9  ;;  %3207 = vpow2.f32 %v1128_v63  ;;  %v3012_v38 = vadd.f32 -1.0, %v3196_v35 }
 0x130   : > { %v3198_v17 = vpop.eup %3197  ;;  %v4046_v19 = vpop.f32.mrf.mxu2  ;;  %3209 = vpow2.f32 %v1130_v8  ;;  %v2997_v35 = vadd.f32 -1.0, %v3188_v62  ;;  %vm1031_vm2 = vcmp.gt.f32.partialorder %v3999_v26, 0.0 }
 0x131   : > { %v4048_v22 = vpop.f32.mrf.mxu3  ;;  %v3200_v27 = vpop.eup %3199  ;;  %3211 = vpow2.f32 %v1144_v36  ;;  %v3019_v56 = vadd.f32 -1.0, %v3198_v17 }
 0x132   : > { %v876_v28 = vpop.f32.mrf.mxu0  ;;  %v905_v31 = vpop.f32.mrf.mxu1  ;;  %3213 = vpow2.f32 %v1146_v15  ;;  %v3020_v63 = vadd.f32 -1.0, %v3200_v27  ;;  %v4074_v15 = vadd.f32 %v3969_v1, %v874_v32  ;;  %v1190_v32 = vsel %vm1030_vm15, %v3978_v7, %v2997_v35 }
 0x133   : > { %v3202_v30 = vpop.eup %3201  ;;  %v1212_v55 = vsel %vm1052_vm3, %v4022_v11, %v3019_v56  ;;  %v1204_v11 = vsel %vm1044_vm7, %v3992_v21, %v3011_v57  ;;  %v877_v36 = vadd.f32 %v876_v28, %v3941_v43  ;;  %v906_v59 = vadd.f32 %v905_v31, %v3943_v44 }
 0x134   : > { %v3204_v9 = vpop.eup %3203  ;;  %1312 = vmatpush.msra.mxu0 %v1212_v55  ;;  %v1213_v5 = vsel %vm1053_vm4, %v4025_v12, %v3020_v63  ;;  %v1205_v55 = vsel %vm1045_vm9, %v3995_v24, %v3012_v38  ;;  %v1196_v12 = vsel %vm1036_vm5, %v3982_v13, %v3003_v20  ;;  %v2998_v3 = vadd.f32 -1.0, %v3202_v30 }
 0x135   : > { %v3206_v14 = vpop.eup %3205  ;;  %1353 = vmatpush.msra.mxu1 %v1213_v5  ;;  %v903_v24 = vadd.f32 %v4035_v61, %v3935_v40  ;;  %v3005_v28 = vadd.f32 -1.0, %v3204_v9  ;;  %v4089_v57 = vadd.f32 %v3961_v53, %v877_v36  ;;  %v1064_v38 = vmin.f32 %v4074_v15, 0.0 }
 0x136   : > { %v3208_v8 = vpop.eup %3207  ;;  %1313 = vmatpush.msra.mxu0 %v1204_v11  ;;  %v3006_v63 = vadd.f32 -1.0, %v3206_v14  ;;  %v4121_v14 = vadd.f32 %v3961_v53, %v906_v59  ;;  %vm1032_vm8 = vcmp.gt.f32.partialorder %v4074_v15, 0.0 }
 0x137   : > { %v3210_v39 = vpop.eup %3209  ;;  %1354 = vmatpush.msra.mxu1 %v1205_v55  ;;  %v3013_v62 = vadd.f32 -1.0, %v3208_v8  ;;  %v1072_v9 = vmin.f32 %v4089_v57, 0.0  ;;  %v1100_v5 = vmul.f32 1.442695, %v1064_v38  ;;  %vm1040_vm7 = vcmp.gt.f32.partialorder %v4089_v57, 0.0 }
 0x138   : > { %v3212_v21 = vpop.eup %3211  ;;  %v934_v13 = vpop.f32.mrf.mxu2  ;;  %1314 = vmatpush.msra.mxu0 %v1196_v12  ;;  %v3014_v27 = vadd.f32 -1.0, %v3210_v39  ;;  %vm1041_vm9 = vcmp.gt.f32.partialorder %v4121_v14, 0.0 }
 0x139   : > { %v3214_v6 = vpop.eup %3213  ;;  %v963_v17 = vpop.f32.mrf.mxu3  ;;  %v3021_v18 = vadd.f32 -1.0, %v3212_v21  ;;  %1355 = vmatpush.msra.mxu1 %v1197_v60  ;;  %v1206_v44 = vsel %vm1046_vm10, %v4016_v10, %v3013_v62  ;;  %v935_v31 = vadd.f32 %v934_v13, %v3945_v45  ;;  %v1198_v10 = vsel %vm1038_vm14, %v4004_v29, %v3005_v28  ;;  %v4135_v60 = vld [vmem:[%s5886_s5 + $0x8] sm:$0xff] }
 0x13a   : > { %v879_v43 = vpop.f32.mrf.mxu0  ;;  %v908_v20 = vpop.f32.mrf.mxu1  ;;  %v3022_v23 = vadd.f32 -1.0, %v3214_v6  ;;  %1315 = vmatpush.msra.mxu0 %v1188_v37  ;;  %v1191_v37 = vsel %vm1031_vm2, %v3999_v26, %v2998_v3  ;;  %v1073_v21 = vmin.f32 %v4121_v14, 0.0  ;;  %3215 = vpow2.f32 %v1100_v5 }
 0x13b   : > { %v880_v40 = vadd.f32 %v879_v43, %v3949_v47  ;;  %v909_v61 = vadd.f32 %v908_v20, %v3951_v48  ;;  %v1214_v56 = vsel %vm1054_vm12, %v4038_v0, %v3021_v18  ;;  %1356 = vmatpush.msra.mxu1 %v1189_v33  ;;  %v4095_v47 = vadd.f32 %v3969_v1, %v903_v24 }
 0x13c   : > { %1394 = vmatpush.msra.mxu2 %v1214_v56  ;;  %v1215_v30 = vsel %vm1055_vm13, %v4041_v4, %v3022_v23  ;;  %3027 = vmatmul.msk.f32.vlgmr.msra.gmra.mxu0 %vm727_vm1, %v4082_v25  ;;  %v1207_v4 = vsel %vm1047_vm11, %v4019_v34, %v3014_v27  ;;  %v1199_v34 = vsel %vm1039_vm0, %v4010_v2, %v3006_v63  ;;  %v1118_v43 = vmul.f32 1.442695, %v1073_v21  ;;  %v5925_v56 = vld [vmem:[#allocation15_spill] sm:$0xff] }
 0x13d   : > { %v4098_v48 = vadd.f32 %v3984_v16, %v880_v40  ;;  %1435 = vmatpush.msra.mxu3 %v1215_v30  ;;  %v4106_v0 = vadd.f32 %v3984_v16, %v909_v61  ;;  %3035 = vmatmul.msk.f32.vlgmr.msra.gmra.mxu1 %vm727_vm1, %v4082_v25  ;;  %v1065_v45 = vmin.f32 %v4095_v47, 0.0  ;;  %v964_v33 = vadd.f32 %v963_v17, %v3947_v46  ;;  %v4189_v30 = vld [vmem:[%s5886_s5 + $0x10] sm:$0xff] }
 0x13e   : > { %1395 = vmatpush.msra.mxu2 %v1206_v44  ;;  %v4138_v35 = vadd.f32 %v3961_v53, %v935_v31  ;;  %vm1033_vm10 = vcmp.gt.f32.partialorder %v4095_v47, 0.0 }
 0x13f   : > { %1436 = vmatpush.msra.mxu3 %v1207_v4  ;;  %v1080_v8 = vmin.f32 %v4098_v48, 0.0  ;;  %v1081_v39 = vmin.f32 %v4106_v0, 0.0  ;;  %v4169_v13 = vadd.f32 %v3961_v53, %v964_v33  ;;  %vm1048_vm5 = vcmp.gt.f32.partialorder %v4098_v48, 0.0 }
 0x140   : > { %1396 = vmatpush.msra.mxu2 %v1198_v10  ;;  %v937_v29 = vpop.f32.mrf.mxu2  ;;  %v3216_v44 = vpop.eup %3215  ;;  %vm1049_vm6 = vcmp.gt.f32.partialorder %v4106_v0, 0.0  ;;  %vm1042_vm15 = vcmp.gt.f32.partialorder %v4138_v35, 0.0 }
 0x141   : > { %1437 = vmatpush.msra.mxu3 %v1199_v34  ;;  %v966_v11 = vpop.f32.mrf.mxu3  ;;  %v938_v55 = vadd.f32 %v937_v29, %v3953_v49  ;;  %v932_v49 = vadd.f32 %v4046_v19, %v3937_v41  ;;  %v1132_v3 = vmul.f32 1.442695, %v1080_v8  ;;  %v1102_v41 = vmul.f32 1.442695, %v1065_v45 }
 0x142   : > { %v967_v2 = vadd.f32 %v966_v11, %v3955_v50  ;;  %1397 = vmatpush.msra.mxu2 %v1190_v32  ;;  %v882_v7 = vpop.f32.mrf.mxu0  ;;  %v911_v12 = vpop.f32.mrf.mxu1  ;;  %v1116_v50 = vmul.f32 1.442695, %v1072_v9  ;;  %v961_v19 = vadd.f32 %v4048_v22, %v3939_v42  ;;  %v1134_v24 = vmul.f32 1.442695, %v1081_v39  ;;  %v1232_v22 = vld [vmem:[%s5887_s6 + $0x20] sm:$0xff] }
 0x143   : > { %1438 = vmatpush.msra.mxu3 %v1191_v37  ;;  %v883_v46 = vadd.f32 %v882_v7, %v3957_v51  ;;  %v912_v26 = vadd.f32 %v911_v12, %v3959_v52  ;;  %3043 = vmatmul.msk.f32.vlgmr.msra.gmra.mxu2 %vm727_vm1, %v4082_v25  ;;  %v4148_v36 = vadd.f32 %v3984_v16, %v938_v55  ;;  %v1075_v38 = vmin.f32 %v4169_v13, 0.0  ;;  %v1233_v37 = vld [vmem:[%s5887_s6 + $0x28] sm:$0xff]  ;;  %v4216_v7 = vld [vmem:[%s5886_s5 + $0x18] sm:$0xff] }
 0x144   : > { %3051 = vmatmul.msk.f32.vlgmr.msra.gmra.mxu3 %vm727_vm1, %v4082_v25  ;;  %v4153_v51 = vadd.f32 %v3984_v16, %v967_v2  ;;  %3028 = vmatmul.msk.f32.gmra.mxu0 %vm727_vm1, %v4135_v60  ;;  %v1074_v16 = vmin.f32 %v4138_v35, 0.0  ;;  %v4174_v62 = vadd.f32 %v3969_v1, %v932_v49  ;;  %3217 = vpow2.f32 %v1116_v50 }
 0x145   : > { %v4156_v52 = vadd.f32 %v3967_v58, %v883_v46  ;;  %v4159_v6 = vadd.f32 %v3967_v58, %v912_v26  ;;  %3036 = vmatmul.msk.f32.gmra.mxu1 %vm727_vm1, %v4135_v60  ;;  %v1082_v42 = vmin.f32 %v4148_v36, 0.0  ;;  %3219 = vpow2.f32 %v1132_v3  ;;  %1258 = vperm.xlu2 %3182, %v1232_v22  }
 0x146   : > { %v1083_v20 = vmin.f32 %v4153_v51, 0.0  ;;  %v4182_v40 = vadd.f32 %v3969_v1, %v961_v19  ;;  %3221 = vpow2.f32 %v1134_v24  ;;  %v1120_v63 = vmul.f32 1.442695, %v1074_v16 }
 0x147   : > { %v1088_v17 = vmin.f32 %v4156_v52, 0.0  ;;  %v1089_v18 = vmin.f32 %v4159_v6, 0.0  ;;  %v1136_v1 = vmul.f32 1.442695, %v1082_v42  ;;  %v1066_v31 = vmin.f32 %v4174_v62, 0.0 }
 0x148   : > { %v940_v27 = vpop.f32.mrf.mxu2  ;;  %v1138_v10 = vmul.f32 1.442695, %v1083_v20  ;;  %v1067_v34 = vmin.f32 %v4182_v40, 0.0  ;;  %v1122_v45 = vmul.f32 1.442695, %v1075_v38  ;;  %vm1056_vm3 = vcmp.gt.f32.partialorder %v4156_v52, 0.0 }
 0x149   : > { %v1148_v23 = vmul.f32 1.442695, %v1088_v17  ;;  %v1150_v53 = vmul.f32 1.442695, %v1089_v18  ;;  %v969_v28 = vpop.f32.mrf.mxu3  ;;  %v941_v61 = vadd.f32 %v940_v27, %v3963_v54  ;;  %v1104_v39 = vmul.f32 1.442695, %v1066_v31 }
 0x14a   : > { %v970_v59 = vadd.f32 %v969_v28, %v5925_v56  ;;  %v3218_v9 = vpop.eup %3217  ;;  %v1106_v2 = vmul.f32 1.442695, %v1067_v34  ;;  %vm1057_vm4 = vcmp.gt.f32.partialorder %v4159_v6, 0.0  ;;  %v1228_v20 = vld [vmem:[%s5887_s6] sm:$0xff]  ;;  %vm1050_vm13 = vcmp.gt.f32.partialorder %v4148_v36, 0.0 }
 0x14b   : > { %3223 = vpow2.f32 %v1148_v23  ;;  %3044 = vmatmul.msk.f32.gmra.mxu2 %vm727_vm1, %v4135_v60  ;;  %v4195_v54 = vadd.f32 %v3967_v58, %v941_v61  ;;  %v3007_v24 = vadd.f32 -1.0, %v3218_v9  ;;  %vm1051_vm14 = vcmp.gt.f32.partialorder %v4153_v51, 0.0 }
 0x14c   : > { %3225 = vpow2.f32 %v1150_v53  ;;  %v4198_v4 = vadd.f32 %v3967_v58, %v970_v59  ;;  %3052 = vmatmul.msk.f32.gmra.mxu3 %vm727_vm1, %v4135_v60  ;;  %3029 = vmatmul.msk.f32.gmra.mxu0 %vm727_vm1, %v4189_v30  ;;  %v3220_v58 = vpop.eup %3219  ;;  %vm1043_vm0 = vcmp.gt.f32.partialorder %v4169_v13, 0.0  ;;  %vm1034_vm2 = vcmp.gt.f32.partialorder %v4174_v62, 0.0 }
 0x14d   : > { %3227 = vpow2.f32 %v1118_v43  ;;  %v1090_v32 = vmin.f32 %v4195_v54, 0.0  ;;  %3037 = vmatmul.msk.f32.gmra.mxu1 %vm727_vm1, %v4189_v30  ;;  %v3222_v8 = vpop.eup %3221  ;;  %1263 = vperm.xlu2 %3182, %v1233_v37   ;;  %v3015_v49 = vadd.f32 -1.0, %v3220_v58  ;;  %v2999_v43 = vadd.f32 -1.0, %v3216_v44  ;;  %v2724_v58 = vld [vmem:[%s5889_s8 + $0x8] sm:$0xff] }
 0x14e   : > { %v1091_v5 = vmin.f32 %v4198_v4, 0.0  ;;  %3229 = vpow2.f32 %v1102_v41  ;;  %v3016_v3 = vadd.f32 -1.0, %v3222_v8  ;;  %vm1058_vm11 = vcmp.gt.f32.partialorder %v4195_v54, 0.0 }
 0x14f   : > { %3231 = vpow2.f32 %v1120_v63  ;;  %v1152_v29 = vmul.f32 1.442695, %v1090_v32  ;;  %v1208_v18 = vsel %vm1048_vm5, %v4098_v48, %v3015_v49  ;;  %v1200_v48 = vsel %vm1040_vm7, %v4089_v57, %v3007_v24  ;;  %v1225_v32 = vld [vmem:[%s5886_s5 + $0x28] sm:$0xff] }
 0x150   : > { %v1154_v11 = vmul.f32 1.442695, %v1091_v5  ;;  %3233 = vpow2.f32 %v1136_v1  ;;  %v1192_v57 = vsel %vm1032_vm8, %v4074_v15, %v2999_v43  ;;  %vm1059_vm12 = vcmp.gt.f32.partialorder %v4198_v4, 0.0 }
 0x151   : > { %v3224_v33 = vpop.eup %3223  ;;  %3235 = vpow2.f32 %v1138_v10 }
 0x152   : > { %v3226_v55 = vpop.eup %3225  ;;  %3237 = vpow2.f32 %v1152_v29  ;;  %v3023_v12 = vadd.f32 -1.0, %v3224_v33 }
 0x153   : > { %v3228_v46 = vpop.eup %3227  ;;  %3239 = vpow2.f32 %v1154_v11  ;;  %3045 = vmatmul.msk.f32.gmra.mxu2 %vm727_vm1, %v4189_v30  ;;  %v3024_v26 = vadd.f32 -1.0, %v3226_v55 }
 0x154   : > { %v3230_v50 = vpop.eup %3229  ;;  %3053 = vmatmul.msk.f32.gmra.mxu3 %vm727_vm1, %v4189_v30  ;;  %v1216_v21 = vsel %vm1056_vm3, %v4156_v52, %v3023_v12  ;;  %3241 = vpow2.f32 %v1122_v45  ;;  %3030 = vmatmul.msk.f32.gmra.mxu0 %vm727_vm1, %v4216_v7  ;;  %v3008_v52 = vadd.f32 -1.0, %v3228_v46  ;;  %vm1035_vm3 = vcmp.gt.f32.partialorder %v4182_v40, 0.0 }
 0x155   : > { %v3232_v41 = vpop.eup %3231  ;;  %v1217_v19 = vsel %vm1057_vm4, %v4159_v6, %v3024_v26  ;;  %3243 = vpow2.f32 %v1104_v39  ;;  %3038 = vmatmul.msk.f32.gmra.mxu1 %vm727_vm1, %v4216_v7  ;;  %1476 = vmatpush.msrb.mxu0 %v1216_v21  ;;  %v1209_v6 = vsel %vm1049_vm6, %v4106_v0, %v3016_v3  ;;  %v3000_v22 = vadd.f32 -1.0, %v3230_v50 }
 0x156   : > { %v3234_v16 = vpop.eup %3233  ;;  %3245 = vpow2.f32 %v1106_v2  ;;  %1517 = vmatpush.msrb.mxu1 %v1217_v19  ;;  %1238 = vperm.xlu2 %3182, %v1228_v20   ;;  %v1201_v27 = vsel %vm1041_vm9, %v4121_v14, %v3008_v52  ;;  %v4254_v14 = vld [vmem:[%s5886_s5 + $0x20] sm:$0xff]  ;;  %v3009_v1 = vadd.f32 -1.0, %v3232_v41  ;;  %v4382_v52 = vpop.permute.xlu1 %1273 }
 0x157   : > { %v3236_v17 = vpop.eup %3235  ;;  %1477 = vmatpush.msrb.mxu0 %v1208_v18  ;;  %v3017_v61 = vadd.f32 -1.0, %v3234_v16  ;;  %v1193_v44 = vsel %vm1033_vm10, %v4095_v47, %v3000_v22  ;;  %v4380_v16 = vpop.permute.xlu0 %1268 }
 0x158   : > { %v3238_v42 = vpop.eup %3237  ;;  %1518 = vmatpush.msrb.mxu1 %v1209_v6  ;;  %v3018_v63 = vadd.f32 -1.0, %v3236_v17  ;;  %v1202_v9 = vsel %vm1042_vm15, %v4138_v35, %v3009_v1  ;;  %v1226_v35 = vld [vmem:[%s5886_s5 + $0x30] sm:$0xff] }
 0x159   : > { %v3240_v23 = vpop.eup %3239  ;;  %v3025_v53 = vadd.f32 -1.0, %v3238_v42  ;;  %1478 = vmatpush.msrb.mxu0 %v1200_v48  ;;  %v1210_v31 = vsel %vm1050_vm13, %v4148_v36, %v3017_v61 }
 0x15a   : > { %v3242_v0 = vpop.eup %3241  ;;  %v3026_v28 = vadd.f32 -1.0, %v3240_v23  ;;  %1519 = vmatpush.msrb.mxu1 %v1201_v27  ;;  %v1211_v47 = vsel %vm1051_vm14, %v4153_v51, %v3018_v63 }
 0x15b   : > { %v3244_v56 = vpop.eup %3243  ;;  %3046 = vmatmul.msk.f32.gmra.mxu2 %vm727_vm1, %v4216_v7  ;;  %v1218_v59 = vsel %vm1058_vm11, %v4195_v54, %v3025_v53  ;;  %1479 = vmatpush.msrb.mxu0 %v1192_v57  ;;  %v3010_v54 = vadd.f32 -1.0, %v3242_v0 }
 0x15c   : > { %v3246_v38 = vpop.eup %3245  ;;  %3054 = vmatmul.msk.f32.gmra.mxu3 %vm727_vm1, %v4216_v7  ;;  %v1219_v15 = vsel %vm1059_vm12, %v4198_v4, %v3026_v28  ;;  %1520 = vmatpush.msrb.mxu1 %v1193_v44  ;;  %v3001_v10 = vadd.f32 -1.0, %v3244_v56 }
 0x15d   : > { %1558 = vmatpush.msrb.mxu2 %v1218_v59  ;;  %1599 = vmatpush.msrb.mxu3 %v1219_v15  ;;  %v3002_v4 = vadd.f32 -1.0, %v3246_v38  ;;  %v1203_v36 = vsel %vm1043_vm0, %v4169_v13, %v3010_v54  ;;  %v1231_v13 = vld [vmem:[%s5887_s6 + $0x18] sm:$0xff] }
 0x15e   : > { %3031 = vmatmul.msk.f32.gmra.mxu0 %vm727_vm1, %v4254_v14  ;;  %3039 = vmatmul.msk.f32.gmra.mxu1 %vm727_vm1, %v4254_v14  ;;  %v1194_v34 = vsel %vm1034_vm2, %v4174_v62, %v3001_v10  ;;  %v1227_v62 = vld [vmem:[%s5886_s5 + $0x38] sm:$0xff] }
 0x15f   : > { %1559 = vmatpush.msrb.mxu2 %v1210_v31  ;;  %1600 = vmatpush.msrb.mxu3 %v1211_v47  ;;  %v1195_v51 = vsel %vm1035_vm3, %v4182_v40, %v3002_v4  ;;  %v2669_v40 = vld [vmem:[%s5888_s7 + $0x10] sm:$0xff]  ;;  %v4394_v56 = vpop.permute.xlu0 %1243 }
 0x160   : > { %1253 = vperm.xlu2 %3182, %v1231_v13  }
 0x161   : > { %1560 = vmatpush.msrb.mxu2 %v1202_v9  ;;  %1601 = vmatpush.msrb.mxu3 %v1203_v36 }
 0x163   : > { %1561 = vmatpush.msrb.mxu2 %v1194_v34  ;;  %1602 = vmatpush.msrb.mxu3 %v1195_v51 }
 0x164   : > { %3047 = vmatmul.msk.f32.gmra.mxu2 %vm727_vm1, %v4254_v14  ;;  %3055 = vmatmul.msk.f32.gmra.mxu3 %vm727_vm1, %v4254_v14 }
 0x166   : > { %3032 = vmatmul.msk.f32.gmra.mxu0 %vm727_vm1, %v1225_v32  ;;  %3040 = vmatmul.msk.f32.gmra.mxu1 %vm727_vm1, %v1225_v32 }
 0x168   : > { %2683 = vperm.xlu2 %3182, %v2669_v40  }
 0x16c   : > { %3048 = vmatmul.msk.f32.gmra.mxu2 %vm727_vm1, %v1225_v32  ;;  %3056 = vmatmul.msk.f32.gmra.mxu3 %vm727_vm1, %v1225_v32 }
 0x16e   : > { %3033 = vmatmul.msk.f32.gmra.mxu0 %vm727_vm1, %v1226_v35  ;;  %3041 = vmatmul.msk.f32.gmra.mxu1 %vm727_vm1, %v1226_v35 }
 0x170   : > { %2734 = vperm.xlu2 %3182, %v2724_v58  }
 0x174   : > { %3049 = vmatmul.msk.f32.gmra.mxu2 %vm727_vm1, %v1226_v35  ;;  %3057 = vmatmul.msk.f32.gmra.mxu3 %vm727_vm1, %v1226_v35 }
 0x176   : > { %3034 = vmatmul.msk.f32.gmra.mxu0 %vm727_vm1, %v1227_v62  ;;  %3042 = vmatmul.msk.f32.gmra.mxu1 %vm727_vm1, %v1227_v62 }
 0x17c   : > { %3050 = vmatmul.msk.f32.gmra.mxu2 %vm727_vm1, %v1227_v62  ;;  %3058 = vmatmul.msk.f32.gmra.mxu3 %vm727_vm1, %v1227_v62 }
 0x17e   : > { %3059 = vmatmul.msk.f32.vlgmr.msrb.gmra.mxu0 %vm727_vm1, %v4082_v25  ;;  %3067 = vmatmul.msk.f32.vlgmr.msrb.gmra.mxu1 %vm727_vm1, %v4082_v25 }
 0x184   : > { %3075 = vmatmul.msk.f32.vlgmr.msrb.gmra.mxu2 %vm727_vm1, %v4082_v25  ;;  %3083 = vmatmul.msk.f32.vlgmr.msrb.gmra.mxu3 %vm727_vm1, %v4082_v25 }
 0x186   : > { %3060 = vmatmul.msk.f32.gmra.mxu0 %vm727_vm1, %v4135_v60  ;;  %3068 = vmatmul.msk.f32.gmra.mxu1 %vm727_vm1, %v4135_v60 }
 0x18c   : > { %3076 = vmatmul.msk.f32.gmra.mxu2 %vm727_vm1, %v4135_v60  ;;  %3084 = vmatmul.msk.f32.gmra.mxu3 %vm727_vm1, %v4135_v60 }
 0x18e   : > { %3061 = vmatmul.msk.f32.gmra.mxu0 %vm727_vm1, %v4189_v30  ;;  %3069 = vmatmul.msk.f32.gmra.mxu1 %vm727_vm1, %v4189_v30 }
 0x194   : > { %3077 = vmatmul.msk.f32.gmra.mxu2 %vm727_vm1, %v4189_v30  ;;  %3085 = vmatmul.msk.f32.gmra.mxu3 %vm727_vm1, %v4189_v30 }
 0x196   : > { %3062 = vmatmul.msk.f32.gmra.mxu0 %vm727_vm1, %v4216_v7  ;;  %3070 = vmatmul.msk.f32.gmra.mxu1 %vm727_vm1, %v4216_v7 }
 0x19c   : > { %3078 = vmatmul.msk.f32.gmra.mxu2 %vm727_vm1, %v4216_v7  ;;  %3086 = vmatmul.msk.f32.gmra.mxu3 %vm727_vm1, %v4216_v7 }
 0x19e   : > { %3063 = vmatmul.msk.f32.gmra.mxu0 %vm727_vm1, %v4254_v14  ;;  %3071 = vmatmul.msk.f32.gmra.mxu1 %vm727_vm1, %v4254_v14 }
 0x19f   : > { %v4366_v55 = vpop.permute.xlu2 %1258 }
 0x1a4   : > { %3079 = vmatmul.msk.f32.gmra.mxu2 %vm727_vm1, %v4254_v14  ;;  %3087 = vmatmul.msk.f32.gmra.mxu3 %vm727_vm1, %v4254_v14  ;;  %v4403_v14 = vpop.permute.xlu1 %1248 }
 0x1a6   : > { %3064 = vmatmul.msk.f32.gmra.mxu0 %vm727_vm1, %v1225_v32  ;;  %3072 = vmatmul.msk.f32.gmra.mxu1 %vm727_vm1, %v1225_v32 }
 0x1a7   : > { %v4373_v50 = vpop.permute.xlu2 %1263 }
 0x1ac   : > { %3080 = vmatmul.msk.f32.gmra.mxu2 %vm727_vm1, %v1225_v32  ;;  %3088 = vmatmul.msk.f32.gmra.mxu3 %vm727_vm1, %v1225_v32 }
 0x1ae   : > { %3065 = vmatmul.msk.f32.gmra.mxu0 %vm727_vm1, %v1226_v35  ;;  %3073 = vmatmul.msk.f32.gmra.mxu1 %vm727_vm1, %v1226_v35 }
 0x1b0   : > { %v4388_v48 = vpop.permute.xlu2 %1238 }
 0x1b4   : > { %3081 = vmatmul.msk.f32.gmra.mxu2 %vm727_vm1, %v1226_v35  ;;  %3089 = vmatmul.msk.f32.gmra.mxu3 %vm727_vm1, %v1226_v35 }
 0x1b6   : > { %3066 = vmatmul.msk.f32.gmra.mxu0 %vm727_vm1, %v1227_v62  ;;  %3074 = vmatmul.msk.f32.gmra.mxu1 %vm727_vm1, %v1227_v62 }
 0x1b9   : > { %v1317_v25 = vpop.f32.mrf.mxu0 }
 0x1ba   : > { %v1358_v60 = vpop.f32.mrf.mxu1  ;;  %v4398_v57 = vadd.f32 %v1317_v25, %v4388_v48 }
 0x1bb   : > { %v4401_v59 = vadd.f32 %v1358_v60, %v4388_v48 }
 0x1bc   : > { %3082 = vmatmul.msk.f32.gmra.mxu2 %vm727_vm1, %v1227_v62  ;;  %3090 = vmatmul.msk.f32.gmra.mxu3 %vm727_vm1, %v1227_v62 }
 0x1c1   : > { %v1320_v30 = vpop.f32.mrf.mxu0 }
 0x1c2   : > { %v1361_v5 = vpop.f32.mrf.mxu1  ;;  %v4406_v63 = vadd.f32 %v1320_v30, %v4394_v56 }
 0x1c3   : > { %v4409_v38 = vadd.f32 %v1361_v5, %v4394_v56 }
 0x1c6   : > { %v1399_v45 = vpop.f32.mrf.mxu2 }
 0x1c7   : > { %v1440_v8 = vpop.f32.mrf.mxu3  ;;  %v4415_v54 = vadd.f32 %v1399_v45, %v4388_v48 }
 0x1c8   : > { %v4418_v31 = vadd.f32 %v1440_v8, %v4388_v48 }
 0x1c9   : > { %v1323_v29 = vpop.f32.mrf.mxu0 }
 0x1ca   : > { %v1364_v11 = vpop.f32.mrf.mxu1  ;;  %v4412_v1 = vadd.f32 %v1323_v29, %v4403_v14 }
 0x1cb   : > { %v4422_v47 = vadd.f32 %v1364_v11, %v4403_v14 }
 0x1ce   : > { %v1402_v37 = vpop.f32.mrf.mxu2 }
 0x1cf   : > { %v1443_v33 = vpop.f32.mrf.mxu3  ;;  %v4425_v4 = vadd.f32 %v1402_v37, %v4394_v56 }
 0x1d0   : > { %v4429_v34 = vadd.f32 %v1443_v33, %v4394_v56 }
 0x1d1   : > { %v4364_v39 = vpop.f32.mrf.mxu0 }
 0x1d2   : > { %v4368_v2 = vpop.f32.mrf.mxu1 }
 0x1d6   : > { %v1405_v7 = vpop.f32.mrf.mxu2 }
 0x1d7   : > { %v4370_v12 = vpop.f32.mrf.mxu3  ;;  %v4432_v51 = vadd.f32 %v1405_v7, %v4403_v14 }
 0x1db   : > { %v1329_v46 = vpop.f32.mrf.mxu0  ;;  %v1370_v49 = vpop.f32.mrf.mxu1 }
 0x1dc   : > { %v1330_v26 = vadd.f32 %v1329_v46, %v4366_v55  ;;  %v1371_v21 = vadd.f32 %v1370_v49, %v4366_v55 }
 0x1de   : > { %v3091_v3 = vmul.f32 -1.442695, %v1330_v26  ;;  %v4376_v41 = vpop.f32.mrf.mxu2  ;;  %v3092_v19 = vmul.f32 -1.442695, %v1371_v21 }
 0x1df   : > { %v4378_v24 = vpop.f32.mrf.mxu3 }
 0x1e0   : > { %3247 = vpow2.f32 %v3091_v3 }
 0x1e1   : > { %3249 = vpow2.f32 %v3092_v19 }
 0x1e3   : > { %v1332_v17 = vpop.f32.mrf.mxu0  ;;  %v1373_v43 = vpop.f32.mrf.mxu1 }
 0x1e4   : > { %v1333_v18 = vadd.f32 %v1332_v17, %v4373_v50  ;;  %v1374_v42 = vadd.f32 %v1373_v43, %v4373_v50 }
 0x1e6   : > { %v3248_v6 = vpop.eup %3247  ;;  %v3099_v22 = vmul.f32 -1.442695, %v1333_v18  ;;  %v3100_v53 = vmul.f32 -1.442695, %v1374_v42  ;;  %v3396_v18 = vld [vmem:[%s3694_s24 + $0x48] sm:$0xff] }
 0x1e7   : > { %v3250_v20 = vpop.eup %3249  ;;  %v4386_v23 = vadd.f32 1.0, %v3248_v6  ;;  %v1411_v0 = vpop.f32.mrf.mxu2 }
 0x1e8   : > { %v4390_v27 = vadd.f32 1.0, %v3250_v20  ;;  %3251 = vpow2.f32 %v3099_v22  ;;  %v1412_v28 = vadd.f32 %v1411_v0, %v4366_v55  ;;  %v1452_v61 = vpop.f32.mrf.mxu3 }
 0x1e9   : > { %3253 = vrcp.f32 %v4386_v23  ;;  %v1453_v10 = vadd.f32 %v1452_v61, %v4366_v55  ;;  %v1765_v32 = vand.u32 2147483647, %v4386_v23  ;;  %vm1761_vm1 = vweird.f32 %v4386_v23 }
 0x1ea   : > { %3255 = vrcp.f32 %v4390_v27  ;;  %v3093_v44 = vmul.f32 -1.442695, %v1412_v28  ;;  %v1767_v25 = vand.u32 2147483648, %v4386_v23  ;;  %vm1776_vm4 = vweird.f32 %v4390_v27 }
 0x1eb   : > { %3257 = vpow2.f32 %v3100_v53  ;;  %v1335_v15 = vpop.f32.mrf.mxu0  ;;  %v3094_v35 = vmul.f32 -1.442695, %v1453_v10  ;;  %v1376_v13 = vpop.f32.mrf.mxu1  ;;  %v1780_v5 = vand.u32 2147483647, %v4390_v27  ;;  %v1782_v58 = vand.u32 2147483648, %v4390_v27 }
 0x1ec   : > { %3259 = vpow2.f32 %v3093_v44  ;;  %v1336_v9 = vadd.f32 %v1335_v15, %v4380_v16  ;;  %v1377_v37 = vadd.f32 %v1376_v13, %v4380_v16  ;;  %vm4446_vm6 = vcmp.eq.f32.partialorder %v1765_v32, 8.507059e+37 }
 0x1ed   : > { %3261 = vpow2.f32 %v3094_v35  ;;  %v1768_v17 = vor.u32 1.1754944e-38, %v1767_v25  ;;  %vm4454_vm8 = vcmp.eq.f32.partialorder %v1780_v5, 8.507059e+37  ;;  %v1783_v22 = vor.u32 1.1754944e-38, %v1782_v58 }
 0x1ee   : > { %v3252_v36 = vpop.eup %3251  ;;  %v3107_v11 = vmul.f32 -1.442695, %v1336_v9  ;;  %v3108_v20 = vmul.f32 -1.442695, %v1377_v37 }
 0x1ef   : > { %v3254_v62 = vpop.eup %3253  ;;  %v4438_v60 = vadd.f32 1.0, %v3252_v36  ;;  %v1414_v45 = vpop.f32.mrf.mxu2 }
 0x1f0   : > { %v3256_v40 = vpop.eup %3255  ;;  %v1757_v30 = vmul.f32 %v3254_v62, %v4386_v23  ;;  %vm1762_vm5 = vweird.f32 %v3254_v62  ;;  %v1415_v3 = vadd.f32 %v1414_v45, %v4373_v50  ;;  %v1455_v43 = vpop.f32.mrf.mxu3 }
 0x1f1   : > { %v3258_v8 = vpop.eup %3257  ;;  %v1772_v29 = vmul.f32 %v3256_v40, %v4390_v27  ;;  %3263 = vrcp.f32 %v4438_v60  ;;  %vm1777_vm7 = vweird.f32 %v3256_v40  ;;  %v1885_v21 = vand.u32 2147483647, %v4438_v60  ;;  %vm4461_vm9 = vmor %vm1761_vm1, %vm1762_vm5 }
 0x1f2   : > { %v1758_v33 = vsub.f32 1.0, %v1757_v30  ;;  %v4450_v46 = vadd.f32 1.0, %v3258_v8  ;;  %v3260_v26 = vpop.eup %3259  ;;  %vm4468_vm10 = vmor %vm1776_vm4, %vm1777_vm7  ;;  %vm1881_vm11 = vweird.f32 %v4438_v60  ;;  %v1887_v23 = vand.u32 2147483648, %v4438_v60 }
 0x1f3   : > { %v1773_v49 = vsub.f32 1.0, %v1772_v29  ;;  %v3262_v53 = vpop.eup %3261  ;;  %v4474_v61 = vadd.f32 1.0, %v3260_v26  ;;  %vm4476_vm12 = vcmp.eq.f32.partialorder %v1885_v21, 8.507059e+37  ;;  %v4480_v9 = vmul.f32 -1.442695, %v1415_v3  ;;  %v3393_v3 = vld [vmem:[%s3694_s24] sm:$0xff] }
 0x1f4   : > { %v1759_v19 = vmul.f32 %v3254_v62, %v1758_v33  ;;  %3265 = vrcp.f32 %v4450_v46  ;;  %v1456_v27 = vadd.f32 %v1455_v43, %v4373_v50  ;;  %v4487_v35 = vadd.f32 1.0, %v3262_v53 }
 0x1f5   : > { %v1774_v6 = vmul.f32 %v3256_v40, %v1773_v49  ;;  %3267 = vpow2.f32 %v3107_v11  ;;  %v1900_v30 = vand.u32 2147483647, %v4450_v46  ;;  %v1888_v11 = vor.u32 1.1754944e-38, %v1887_v23 }
 0x1f6   : > { %v1760_v0 = vadd.f32 %v3254_v62, %v1759_v19  ;;  %3269 = vrcp.f32 %v4474_v61  ;;  %vm1896_vm14 = vweird.f32 %v4450_v46  ;;  %v1797_v7 = vand.u32 2147483648, %v4474_v61 }
 0x1f7   : > { %v3264_v44 = vpop.eup %3263  ;;  %v1775_v15 = vadd.f32 %v3256_v40, %v1774_v6  ;;  %3271 = vpow2.f32 %v3108_v20  ;;  %v1795_v26 = vand.u32 2147483647, %v4474_v61  ;;  %v4510_v49 = vmul.f32 -1.442695, %v1456_v27  ;;  %v3394_v20 = vld [vmem:[%s3694_s24 + $0x8] sm:$0xff]  ;;  %v1417_v28 = vpop.f32.mrf.mxu2 }
 0x1f8   : > { %v1764_v36 = vsel %vm4461_vm9, %v3254_v62, %v1760_v0  ;;  %v1877_v32 = vmul.f32 %v3264_v44, %v4438_v60  ;;  %vm1882_vm13 = vweird.f32 %v3264_v44  ;;  %3273 = vrcp.f32 %v4487_v35 }
 0x1f9   : > { %v1769_v13 = vsel %vm4446_vm6, %v1768_v17, %v1764_v36  ;;  %v1779_v25 = vsel %vm4468_vm10, %v3256_v40, %v1775_v15  ;;  %v1902_v40 = vand.u32 2147483648, %v4450_v46  ;;  %vm4505_vm15 = vmor %vm1881_vm11, %vm1882_vm13  ;;  %vm4517_vm2 = vcmp.eq.f32.partialorder %v1900_v30, 8.507059e+37 }
 0x1fa   : > { %v3266_v5 = vpop.eup %3265  ;;  %v1784_v58 = vsel %vm4454_vm8, %v1783_v22, %v1779_v25  ;;  %v2236_v62 = vmul.f32 %v1769_v13, %v4398_v57  ;;  %v1878_v45 = vsub.f32 1.0, %v1877_v32  ;;  %vm1791_vm3 = vweird.f32 %v4474_v61  ;;  %v1379_v57 = vpop.f32.mrf.mxu1 }
 0x1fb   : > { %v3268_v8 = vpop.eup %3267  ;;  %v2237_v29 = vmul.f32 %v1784_v58, %v4401_v59  ;;  %v1892_v37 = vmul.f32 %v3266_v5, %v4450_v46  ;;  %vm1897_vm0 = vweird.f32 %v3266_v5  ;;  %v1903_v6 = vor.u32 1.1754944e-38, %v1902_v40  ;;  %v1338_v58 = vpop.f32.mrf.mxu0 }
 0x1fc   : > { %v1879_v33 = vmul.f32 %v3264_v44, %v1878_v45  ;;  %v4512_v21 = vpop.eup %3269  ;;  %v4515_v19 = vadd.f32 %v3393_v3, %v2236_v62  ;;  %v4521_v60 = vadd.f32 1.0, %v3268_v8  ;;  %vm4534_vm1 = vmor %vm1896_vm14, %vm1897_vm0  ;;  %v1798_v23 = vor.u32 1.1754944e-38, %v1797_v7 }
 0x1fd   : > { %v1893_v59 = vsub.f32 1.0, %v1892_v37  ;;  %v3272_v43 = vpop.eup %3271  ;;  %v1787_v22 = vmul.f32 %v4512_v21, %v4474_v61  ;;  %v4527_v53 = vadd.f32 %v3394_v20, %v2237_v29  ;;  %vm4541_vm4 = vcmp.eq.f32.partialorder %v1795_v26, 8.507059e+37 }
 0x1fe   : > { %v1880_v17 = vadd.f32 %v3264_v44, %v1879_v33  ;;  %3275 = vrcp.f32 %v4521_v60  ;;  %vm1806_vm5 = vweird.f32 %v4487_v35  ;;  %v1810_v46 = vand.u32 2147483647, %v4487_v35 }
 0x1ff   : > { %v1894_v42 = vmul.f32 %v3266_v5, %v1893_v59  ;;  %5940 = vst [vmem:[#allocation15_spill] sm:$0xff] %v4527_v53  ;;  %v1788_v36 = vsub.f32 1.0, %v1787_v22  ;;  %v2387_v13 = vmul.f32 %v4515_v19, %v4515_v19  ;;  %v1812_v10 = vand.u32 2147483648, %v4487_v35 }
 0x200   : > { %v1884_v0 = vsel %vm4505_vm15, %v3264_v44, %v1880_v17  ;;  %v3274_v44 = vpop.eup %3273  ;;  %v4551_v30 = vadd.f32 1.0, %v3272_v43  ;;  %vm1792_vm6 = vweird.f32 %v4512_v21  ;;  %v2388_v29 = vmul.f32 %v4527_v53, %v4527_v53 }
 0x201   : > { %v1889_v15 = vsel %vm4476_vm12, %v1888_v11, %v1884_v0  ;;  %v1895_v27 = vadd.f32 %v3266_v5, %v1894_v42  ;;  %v1789_v45 = vmul.f32 %v4512_v21, %v1788_v36  ;;  %v1802_v8 = vmul.f32 %v3274_v44, %v4487_v35  ;;  %v3395_v11 = vld [vmem:[%s3694_s24 + $0x40] sm:$0xff]  ;;  %vm4579_vm7 = vmor %vm1791_vm3, %vm1792_vm6 }
 0x202   : > { %v2244_v25 = vmul.f32 %v1889_v15, %v4406_v63  ;;  %v2005_v40 = vand.u32 2147483647, %v4521_v60  ;;  %3277 = vrcp.f32 %v4551_v30  ;;  %vm1807_vm8 = vweird.f32 %v3274_v44 }
 0x203   : > { %v1899_v62 = vsel %vm4534_vm1, %v3266_v5, %v1895_v27  ;;  %v1790_v33 = vadd.f32 %v4512_v21, %v1789_v45  ;;  %v1803_v7 = vsub.f32 1.0, %v1802_v8  ;;  %v2007_v17 = vand.u32 2147483648, %v4521_v60  ;;  %vm1808_vm12 = vmor %vm1806_vm5, %vm1807_vm8 }
 0x204   : > { %v4561_v63 = vadd.f32 %v3395_v11, %v2244_v25  ;;  %v1904_v37 = vsel %vm4517_vm2, %v1903_v6, %v1899_v62  ;;  %v3276_v59 = vpop.eup %3275  ;;  %vm4593_vm9 = vcmp.eq.f32.partialorder %v1810_v46, 8.507059e+37  ;;  %v1813_v0 = vor.u32 1.1754944e-38, %v1812_v10  ;;  %v1458_v10 = vpop.f32.mrf.mxu3 }
 0x205   : > { %v2245_v5 = vmul.f32 %v1904_v37, %v4409_v38  ;;  %v1794_v42 = vsel %vm4579_vm7, %v4512_v21, %v1790_v33  ;;  %v1804_v6 = vmul.f32 %v3274_v44, %v1803_v7  ;;  %v1997_v22 = vmul.f32 %v3276_v59, %v4521_v60  ;;  %v4621_v37 = vpop.f32.mrf.mxu0  ;;  %v4632_v7 = vpop.f32.mrf.mxu1 }
 0x206   : > { %5945 = vst [vmem:[#allocation16_spill] sm:$0xff] %v4561_v63  ;;  %v4571_v26 = vadd.f32 %v4561_v63, %v4515_v19  ;;  %v2395_v3 = vmul.f32 %v4561_v63, %v4561_v63  ;;  %vm2001_vm10 = vweird.f32 %v4521_v60  ;;  %vm4604_vm11 = vcmp.eq.f32.partialorder %v2005_v40, 8.507059e+37 }
 0x207   : > { %v4585_v43 = vadd.f32 %v3396_v18, %v2245_v5  ;;  %v1805_v27 = vadd.f32 %v3274_v44, %v1804_v6  ;;  %v1799_v46 = vsel %vm4541_vm4, %v1798_v23, %v1794_v42  ;;  %3279 = vpow2.f32 %v4480_v9 }
 0x208   : > { %v4591_v20 = vadd.f32 %v2395_v3, %v2387_v13  ;;  %v1998_v13 = vsub.f32 1.0, %v1997_v22  ;;  %v1339_v25 = vadd.f32 %v1338_v58, %v4382_v52  ;;  %v3278_v62 = vpop.eup %3277  ;;  %v2008_v11 = vor.u32 1.1754944e-38, %v2007_v17 }
 0x209   : > { %5948 = vst [vmem:[#allocation17_spill] sm:$0xff] %v4585_v43  ;;  %v4600_v15 = vadd.f32 %v4585_v43, %v4527_v53  ;;  %v2396_v21 = vmul.f32 %v4585_v43, %v4585_v43  ;;  %v1809_v8 = vsel %vm1808_vm12, %v3274_v44, %v1805_v27  ;;  %3281 = vpow2.f32 %v4510_v49  ;;  %v4651_v27 = vpop.f32.mrf.mxu2 }
 0x20a   : > { %v1814_v23 = vsel %vm4593_vm9, %v1813_v0, %v1809_v8  ;;  %v1999_v32 = vmul.f32 %v3276_v59, %v1998_v13  ;;  %vm2002_vm13 = vweird.f32 %v3276_v59  ;;  %v2012_v35 = vmul.f32 %v3278_v62, %v4551_v30 }
 0x20b   : > { %v4615_v45 = vadd.f32 %v2396_v21, %v2388_v29  ;;  %v2238_v9 = vmul.f32 %v1799_v46, %v4415_v54  ;;  %vm2016_vm14 = vweird.f32 %v4551_v30  ;;  %v2020_v58 = vand.u32 2147483647, %v4551_v30  ;;  %vm2003_vm15 = vmor %vm2001_vm10, %vm2002_vm13  ;;  %v4649_v21 = vpop.permute.xlu2 %1253  ;;  %v3398_v46 = vld [vmem:[%s3694_s24 + $0x18] sm:$0xff] }
 0x20c   : > { %v3115_v29 = vmul.f32 -1.442695, %v1339_v25  ;;  %v2000_v44 = vadd.f32 %v3276_v59, %v1999_v32  ;;  %v2013_v40 = vsub.f32 1.0, %v2012_v35  ;;  %v2022_v49 = vand.u32 2147483648, %v4551_v30 }
 0x20d   : > { %v1380_v5 = vadd.f32 %v1379_v57, %v4382_v52  ;;  %v2239_v33 = vmul.f32 %v1814_v23, %v4418_v31  ;;  %vm2017_vm0 = vweird.f32 %v3278_v62  ;;  %v1418_v54 = vadd.f32 %v1417_v28, %v4380_v16  ;;  %v3280_v3 = vpop.eup %3279  ;;  %v3397_v57 = vld [vmem:[%s3694_s24 + $0x10] sm:$0xff]  ;;  %v4664_v23 = vpop.f32.mrf.mxu3 }
 0x20e   : > { %3283 = vpow2.f32 %v3115_v29  ;;  %v2004_v38 = vsel %vm2003_vm15, %v3276_v59, %v2000_v44  ;;  %v2014_v17 = vmul.f32 %v3278_v62, %v2013_v40  ;;  %v1459_v42 = vadd.f32 %v1458_v10, %v4380_v16  ;;  %vm2018_vm3 = vmor %vm2016_vm14, %vm2017_vm0  ;;  %v4691_v40 = vpop.f32.mrf.mxu0 }
 0x20f   : > { %v3116_v18 = vmul.f32 -1.442695, %v1380_v5  ;;  %v3282_v6 = vpop.eup %3281  ;;  %v4636_v22 = vadd.f32 %v3397_v57, %v2238_v9  ;;  %v2009_v31 = vsel %vm4604_vm11, %v2008_v11, %v2004_v38  ;;  %vm4640_vm2 = vcmp.eq.f32.partialorder %v2020_v58, 8.507059e+37 }
 0x210   : > { %v4644_v61 = vadd.f32 1.0, %v3280_v3  ;;  %v2252_v59 = vmul.f32 %v2009_v31, %v4412_v1  ;;  %v2015_v0 = vadd.f32 %v3278_v62, %v2014_v17  ;;  %v4647_v28 = vadd.f32 1.0, %v3282_v6  ;;  %v3399_v1 = vld [vmem:[%s3694_s24 + $0x80] sm:$0xff]  ;;  %v4711_v17 = vpop.f32.mrf.mxu1 }
 0x211   : > { %5953 = vst [vmem:[#allocation18_spill] sm:$0xff] %v4636_v22  ;;  %3285 = vpow2.f32 %v3116_v18  ;;  %v4654_v36 = vadd.f32 %v3398_v46, %v2239_v33  ;;  %v2023_v13 = vor.u32 1.1754944e-38, %v2022_v49  ;;  %v3109_v25 = vmul.f32 -1.442695, %v1418_v54  ;;  %v3400_v54 = vld [vmem:[%s3694_s24 + $0x88] sm:$0xff] }
 0x212   : > { %3287 = vrcp.f32 %v4644_v61  ;;  %v4661_v10 = vadd.f32 %v3399_v1, %v2252_v59  ;;  %v2019_v8 = vsel %vm2018_vm3, %v3278_v62, %v2015_v0  ;;  %v3110_v11 = vmul.f32 -1.442695, %v1459_v42 }
 0x213   : > { %5956 = vst [vmem:[#allocation19_spill] sm:$0xff] %v4654_v36  ;;  %3289 = vrcp.f32 %v4647_v28  ;;  %v4668_v35 = vadd.f32 %v4370_v12, %v4403_v14  ;;  %v2024_v30 = vsel %vm4640_vm2, %v2023_v13, %v2019_v8  ;;  %v4674_v9 = vadd.f32 %v4364_v39, %v4649_v21 }
 0x214   : > { %5957 = vst [vmem:[#allocation20_spill] sm:$0xff] %v4661_v10  ;;  %v3284_v32 = vpop.eup %3283  ;;  %v4678_v62 = vadd.f32 %v4368_v2, %v4649_v21  ;;  %v4682_v58 = vmul.f32 %v4636_v22, %v4636_v22  ;;  %v4686_v12 = vadd.f32 %v4571_v26, %v4661_v10  ;;  %v2403_v29 = vmul.f32 %v4661_v10, %v4661_v10 }
 0x215   : > { %v2253_v44 = vmul.f32 %v2024_v30, %v4422_v47  ;;  %v1915_v39 = vand.u32 2147483647, %v4644_v61  ;;  %v1917_v2 = vand.u32 2147483648, %v4644_v61  ;;  %v4695_v49 = vadd.f32 1.0, %v3284_v32 }
 0x216   : > { %3291 = vpow2.f32 %v3109_v25  ;;  %v4699_v33 = vmul.f32 %v4654_v36, %v4654_v36  ;;  %v4702_v26 = vadd.f32 %v4591_v20, %v2403_v29  ;;  %vm1911_vm1 = vweird.f32 %v4644_v61  ;;  %v4732_v25 = vpop.f32.mrf.mxu2 }
 0x217   : > { %v3286_v5 = vpop.eup %3285  ;;  %v4705_v3 = vadd.f32 %v3400_v54, %v2253_v44  ;;  %3293 = vpow2.f32 %v3110_v11  ;;  %vm1926_vm4 = vweird.f32 %v4647_v28  ;;  %v1930_v38 = vand.u32 2147483647, %v4647_v28 }
 0x218   : > { %v3288_v47 = vpop.eup %3287  ;;  %3295 = vrcp.f32 %v4695_v49  ;;  %v1932_v57 = vand.u32 2147483648, %v4647_v28  ;;  %vm4721_vm5 = vcmp.eq.f32.partialorder %v1915_v39, 8.507059e+37  ;;  %v1918_v60 = vor.u32 1.1754944e-38, %v1917_v2  ;;  %v4740_v39 = vpop.f32.mrf.mxu3 }
 0x219   : > { %5958 = vst [vmem:[#allocation21_spill] sm:$0xff] %v4705_v3  ;;  %v3290_v18 = vpop.eup %3289  ;;  %v4715_v20 = vadd.f32 %v4600_v15, %v4705_v3  ;;  %v2404_v42 = vmul.f32 %v4705_v3, %v4705_v3  ;;  %v1907_v6 = vmul.f32 %v3288_v47, %v4644_v61  ;;  %v2127_v0 = vand.u32 2147483648, %v4695_v49 }
 0x21a   : > { %v1922_v59 = vmul.f32 %v3290_v18, %v4647_v28  ;;  %v4730_v13 = vadd.f32 1.0, %v3286_v5  ;;  %vm4734_vm6 = vcmp.eq.f32.partialorder %v1930_v38, 8.507059e+37  ;;  %v2125_v32 = vand.u32 2147483647, %v4695_v49  ;;  %v4779_v28 = vpop.f32.mrf.mxu1 }
 0x21b   : > { %v4728_v46 = vadd.f32 %v4615_v45, %v2404_v42  ;;  %v1908_v15 = vsub.f32 1.0, %v1907_v6  ;;  %v3525_v30 = vmov 32.0   ;;  %vm1912_vm7 = vweird.f32 %v3288_v47 }
 0x21c   : > { %v3292_v1 = vpop.eup %3291  ;;  %v1923_v8 = vsub.f32 1.0, %v1922_v59  ;;  %3297 = vrcp.f32 %v3525_v30  ;;  %v1933_v45 = vor.u32 1.1754944e-38, %v1932_v57  ;;  %vm1927_vm8 = vweird.f32 %v3290_v18  ;;  %v4751_v57 = vpop.f32.mrf.mxu0  ;;  %vm1913_vm10 = vmor %vm1911_vm1, %vm1912_vm7 }
 0x21d   : > { %v3294_v29 = vpop.eup %3293  ;;  %v1909_v44 = vmul.f32 %v3288_v47, %v1908_v15  ;;  %3299 = vrcp.f32 %v4730_v13  ;;  %v4744_v54 = vadd.f32 1.0, %v3292_v1  ;;  %vm2121_vm9 = vweird.f32 %v4695_v49  ;;  %vm1928_vm12 = vmor %vm1926_vm4, %vm1927_vm8 }
 0x21e   : > { %v4742_v2 = vpop.eup %3295  ;;  %v1924_v5 = vmul.f32 %v3290_v18, %v1923_v8  ;;  %v4746_v38 = vadd.f32 1.0, %v3294_v29  ;;  %v2128_v59 = vor.u32 1.1754944e-38, %v2127_v0  ;;  %vm4755_vm11 = vcmp.eq.f32.partialorder %v2125_v32, 8.507059e+37 }
 0x21f   : > { %v1910_v42 = vadd.f32 %v3288_v47, %v1909_v44  ;;  %v2117_v6 = vmul.f32 %v4742_v2, %v4695_v49  ;;  %v2140_v1 = vand.u32 2147483647, %v4730_v13  ;;  %3301 = vrcp.f32 %v4744_v54 }
 0x220   : > { %v1925_v15 = vadd.f32 %v3290_v18, %v1924_v5  ;;  %v4763_v30 = vadd.f32 %v4651_v27, %v4382_v52  ;;  %v2142_v0 = vand.u32 2147483648, %v4730_v13  ;;  %v4771_v32 = vadd.f32 %v4664_v23, %v4382_v52 }
 0x221   : > { %v1914_v29 = vsel %vm1913_vm10, %v3288_v47, %v1910_v42  ;;  %v2118_v61 = vsub.f32 1.0, %v2117_v6  ;;  %vm2122_vm13 = vweird.f32 %v4742_v2  ;;  %3303 = vrcp.f32 %v4746_v38 }
 0x222   : > { %v4773_v44 = vpop.eup %3297  ;;  %v1919_v5 = vsel %vm4721_vm5, %v1918_v60, %v1914_v29  ;;  %v1929_v27 = vsel %vm1928_vm12, %v3290_v18, %v1925_v15  ;;  %v2035_v43 = vand.u32 2147483647, %v4744_v54  ;;  %vm2136_vm14 = vweird.f32 %v4730_v13  ;;  %v3401_v15 = vld [vmem:[%s3694_s24 + $0x50] sm:$0xff]  ;;  %vm4807_vm2 = vmor %vm2121_vm9, %vm2122_vm13 }
 0x223   : > { %v3300_v47 = vpop.eup %3299  ;;  %v2246_v42 = vmul.f32 %v1919_v5, %v4425_v4  ;;  %v1934_v23 = vsel %vm4734_vm6, %v1933_v45, %v1929_v27  ;;  %v2119_v6 = vmul.f32 %v4742_v2, %v2118_v61  ;;  %vm4789_vm15 = vcmp.eq.f32.partialorder %v2140_v1, 8.507059e+37  ;;  %v4798_v45 = vpop.f32.mrf.mxu2 }
 0x224   : > { %v2247_v31 = vmul.f32 %v1934_v23, %v4429_v34  ;;  %v2132_v18 = vmul.f32 %v3300_v47, %v4730_v13  ;;  %v2143_v11 = vor.u32 1.1754944e-38, %v2142_v0  ;;  %vm2031_vm0 = vweird.f32 %v4744_v54  ;;  %v3402_v34 = vld [vmem:[%s3694_s24 + $0x58] sm:$0xff]  ;;  %v4842_v10 = vpop.f32.mrf.mxu0 }
 0x225   : > { %v4794_v29 = vadd.f32 %v3401_v15, %v2246_v42  ;;  %v2120_v4 = vadd.f32 %v4742_v2, %v2119_v6  ;;  %v3302_v61 = vpop.eup %3301  ;;  %v2037_v42 = vand.u32 2147483648, %v4744_v54  ;;  %v2373_v0 = vmul.f32 32.0, %v4773_v44 }
 0x226   : > { %v4801_v5 = vadd.f32 %v3402_v34, %v2247_v31  ;;  %v2133_v27 = vsub.f32 1.0, %v2132_v18  ;;  %v2027_v31 = vmul.f32 %v3302_v61, %v4744_v54  ;;  %vm4823_vm3 = vcmp.eq.f32.partialorder %v2035_v43, 8.507059e+37  ;;  %v4828_v18 = vpop.f32.mrf.mxu3 }
 0x227   : > { %5967 = vst [vmem:[#allocation22_spill] sm:$0xff] %v4794_v29  ;;  %v4815_v23 = vadd.f32 %v4794_v29, %v4636_v22  ;;  %v2397_v6 = vmul.f32 %v4794_v29, %v4794_v29  ;;  %v2124_v49 = vsel %vm4807_vm2, %v4742_v2, %v2120_v4  ;;  %vm2046_vm1 = vweird.f32 %v4746_v38  ;;  %v3304_v34 = vpop.eup %3303 }
 0x228   : > { %5968 = vst [vmem:[#allocation23_spill] sm:$0xff] %v4801_v5  ;;  %v4832_v63 = vadd.f32 %v4801_v5, %v4654_v36  ;;  %v2398_v29 = vmul.f32 %v4801_v5, %v4801_v5  ;;  %v2134_v1 = vmul.f32 %v3300_v47, %v2133_v27  ;;  %vm2137_vm4 = vweird.f32 %v3300_v47 }
 0x229   : > { %v4837_v2 = vadd.f32 %v2397_v6, %v4682_v58  ;;  %v2129_v43 = vsel %vm4755_vm11, %v2128_v59, %v2124_v49  ;;  %v2028_v4 = vsub.f32 1.0, %v2027_v31  ;;  %v2042_v3 = vmul.f32 %v3304_v34, %v4746_v38  ;;  %vm2138_vm5 = vmor %vm2136_vm14, %vm2137_vm4 }
 0x22a   : > { %v4845_v22 = vadd.f32 %v2398_v29, %v4699_v33  ;;  %v2135_v36 = vadd.f32 %v3300_v47, %v2134_v1  ;;  %v2050_v53 = vand.u32 2147483647, %v4746_v38  ;;  %v2052_v27 = vand.u32 2147483648, %v4746_v38  ;;  %v4853_v29 = vpop.f32.mrf.mxu1 }
 0x22b   : > { %v2029_v58 = vmul.f32 %v3302_v61, %v2028_v4  ;;  %vm2032_vm6 = vweird.f32 %v3302_v61  ;;  %v2043_v59 = vsub.f32 1.0, %v2042_v3  ;;  %v2374_v8 = vsub.f32 1.0, %v2373_v0 }
 0x22c   : > { %v2139_v6 = vsel %vm2138_vm5, %v3300_v47, %v2135_v36  ;;  %vm2047_vm7 = vweird.f32 %v3304_v34  ;;  %v2260_v49 = vmul.f32 %v2129_v43, %v4674_v9  ;;  %v3117_v33 = vmul.f32 -1.442695, %v4763_v30  ;;  %vm2033_vm8 = vmor %vm2031_vm0, %vm2032_vm6  ;;  %v3403_v47 = vld [vmem:[%s3694_s24 + $0xc0] sm:$0xff] }
 0x22d   : > { %v2144_v31 = vsel %vm4789_vm15, %v2143_v11, %v2139_v6  ;;  %v2030_v1 = vadd.f32 %v3302_v61, %v2029_v58  ;;  %v2044_v13 = vmul.f32 %v3304_v34, %v2043_v59  ;;  %v3118_v4 = vmul.f32 -1.442695, %v4771_v32  ;;  %v4865_v11 = vpop.f32.mrf.mxu2  ;;  %vm2048_vm9 = vmor %vm2046_vm1, %vm2047_vm7 }
 0x22e   : > { %v2038_v3 = vor.u32 1.1754944e-38, %v2037_v42  ;;  %v2261_v36 = vmul.f32 %v2144_v31, %v4678_v62  ;;  %v4862_v9 = vadd.f32 %v3403_v47, %v2260_v49  ;;  %3305 = vpow2.f32 %v3117_v33  ;;  %v3404_v62 = vld [vmem:[%s3694_s24 + $0xc8] sm:$0xff]  ;;  %v4880_v15 = vpop.f32.mrf.mxu3 }
 0x22f   : > { %v2034_v30 = vsel %vm2033_vm8, %v3302_v61, %v2030_v1  ;;  %v2045_v0 = vadd.f32 %v3304_v34, %v2044_v13  ;;  %v2053_v43 = vor.u32 1.1754944e-38, %v2052_v27  ;;  %v2375_v60 = vmul.f32 %v4773_v44, %v2374_v8 }
 0x230   : > { %v2039_v32 = vsel %vm4823_vm3, %v2038_v3, %v2034_v30  ;;  %v4873_v54 = vadd.f32 %v3404_v62, %v2261_v36  ;;  %v2302_v61 = vadd.f32 %v4686_v12, %v4862_v9  ;;  %v2411_v42 = vmul.f32 %v4862_v9, %v4862_v9  ;;  %v3405_v12 = vld [vmem:[%s3694_s24 + $0x90] sm:$0xff]  ;;  %v3406_v3 = vld [vmem:[%s3694_s24 + $0x98] sm:$0xff] }
 0x231   : > { %v2254_v27 = vmul.f32 %v2039_v32, %v4432_v51  ;;  %v2049_v58 = vsel %vm2048_vm9, %v3304_v34, %v2045_v0  ;;  %vm2051_vm10 = vcmp.eq.f32.partialorder %v2050_v53, 8.507059e+37  ;;  %3307 = vpow2.f32 %v3118_v4  ;;  %v4892_v53 = vpop.f32.mrf.mxu0 }
 0x232   : > { %5973 = vst [vmem:[#allocation24_spill] sm:$0xff] %v4873_v54  ;;  %v2054_v59 = vsel %vm2051_vm10, %v2053_v43, %v2049_v58  ;;  %v2303_v8 = vrot.slane %v2302_v61, 4  ;;  %v2311_v38 = vadd.f32 %v4715_v20, %v4873_v54  ;;  %v2412_v6 = vmul.f32 %v4873_v54, %v4873_v54 }
 0x233   : > { %v4887_v49 = vadd.f32 %v3405_v12, %v2254_v27  ;;  %v2255_v33 = vmul.f32 %v2054_v59, %v4668_v35  ;;  %vm2377_vm11 = vweird.f32 %v4773_v44  ;;  %v2421_v51 = vadd.f32 %v4702_v26, %v2411_v42 }
 0x234   : > { %v3306_v34 = vpop.eup %3305  ;;  %v2376_v31 = vadd.f32 %v4773_v44, %v2375_v60  ;;  %v2304_v1 = vadd.f32 %v2303_v8, %v2302_v61  ;;  %v2312_v13 = vrot.slane %v2311_v38, 4  ;;  %v2430_v20 = vadd.f32 %v4728_v46, %v2412_v6  ;;  %v1534_v60 = vpop.f32.mrf.mxu1 }
 0x235   : > { %v4898_v4 = vadd.f32 %v4815_v23, %v4887_v49  ;;  %v2405_v35 = vmul.f32 %v4887_v49, %v4887_v49  ;;  %v4903_v36 = vadd.f32 %v3406_v3, %v2255_v33  ;;  %v2422_v26 = vrot.slane %v2421_v51, 4  ;;  %v4920_v8 = vpop.f32.mrf.mxu2 }
 0x236   : > { %v2305_v47 = vrot.slane %v2304_v1, 2  ;;  %v2313_v30 = vadd.f32 %v2312_v13, %v2311_v38  ;;  %v2431_v0 = vrot.slane %v2430_v20, 4  ;;  %v4905_v43 = vadd.f32 1.0, %v3306_v34  ;;  %5974 = vst [vmem:[#allocation25_spill] sm:$0xff] %v4920_v8  ;;  %v4929_v33 = vpop.f32.mrf.mxu3 }
 0x237   : > { %v3308_v32 = vpop.eup %3307  ;;  %v4908_v46 = vadd.f32 %v4837_v2, %v2405_v35  ;;  %v4912_v23 = vadd.f32 %v4832_v63, %v4903_v36  ;;  %v2406_v62 = vmul.f32 %v4903_v36, %v4903_v36  ;;  %v2423_v61 = vadd.f32 %v2422_v26, %v2421_v51  ;;  %5975 = vst [vmem:[#allocation26_spill] sm:$0xff] %v4929_v33 }
 0x238   : > { %v2306_v42 = vadd.f32 %v2305_v47, %v2304_v1  ;;  %v2314_v27 = vrot.slane %v2313_v30, 2  ;;  %v2432_v58 = vadd.f32 %v2431_v0, %v2430_v20  ;;  %3309 = vrcp.f32 %v4905_v43 }
 0x239   : > { %v4918_v59 = vadd.f32 %v4845_v22, %v2406_v62  ;;  %v2424_v6 = vrot.slane %v2423_v61, 2  ;;  %v4925_v63 = vsel %vm2377_vm11, %v4773_v44, %v2376_v31  ;;  %v4927_v12 = vadd.f32 1.0, %v3308_v32  ;;  %v1496_v31 = vpop.f32.mrf.mxu0 }
 0x23a   : > { %v2307_v2 = vrot.slane %v2306_v42, 1  ;;  %v2315_v38 = vadd.f32 %v2314_v27, %v2313_v30  ;;  %v1409_v51 = vadd.f32 %v4376_v41, %v4649_v21  ;;  %v2433_v1 = vrot.slane %v2432_v58, 2 }
 0x23b   : > { %v4935_v13 = vadd.f32 %v4378_v24, %v4649_v21  ;;  %v4939_v20 = vadd.f32 %v4621_v37, %v4388_v48  ;;  %v2155_v44 = vand.u32 2147483647, %v4905_v43  ;;  %3311 = vrcp.f32 %v4927_v12 }
 0x23c   : > { %v2308_v34 = vadd.f32 %v2307_v2, %v2306_v42  ;;  %v2316_v22 = vrot.slane %v2315_v38, 1  ;;  %v2425_v26 = vadd.f32 %v2424_v6, %v2423_v61  ;;  %v2157_v47 = vand.u32 2147483648, %v4905_v43  ;;  %v1537_v42 = vpop.f32.mrf.mxu1 }
 0x23d   : > { %v4949_v24 = vadd.f32 %v4632_v7, %v4388_v48  ;;  %v4954_v30 = vadd.f32 %v4691_v40, %v4394_v56  ;;  %v4958_v0 = vadd.f32 %v4711_v17, %v4394_v56  ;;  %v2434_v62 = vadd.f32 %v2433_v1, %v2432_v58 }
 0x23e   : > { %v3310_v35 = vpop.eup %3309  ;;  %v2317_v3 = vadd.f32 %v2316_v22, %v2315_v38  ;;  %v4944_v41 = vmul.f32 %v4925_v63, %v2308_v34  ;;  %v4967_v7 = vadd.f32 %v4732_v25, %v4388_v48  ;;  %vm2151_vm12 = vweird.f32 %v4905_v43 }
 0x23f   : > { %v2147_v37 = vmul.f32 %v3310_v35, %v4905_v43  ;;  %vm4970_vm13 = vcmp.eq.f32.partialorder %v2155_v44, 8.507059e+37  ;;  %v4976_v17 = vadd.f32 %v4740_v39, %v4388_v48  ;;  %v2426_v58 = vrot.slane %v2425_v26, 1  ;;  %v1575_v44 = vpop.f32.mrf.mxu2 }
 0x240   : > { %v4961_v32 = vmul.f32 %v4925_v63, %v2317_v3  ;;  %v2158_v38 = vor.u32 1.1754944e-38, %v2157_v47  ;;  %v4982_v25 = vadd.f32 %v4751_v57, %v4403_v14  ;;  %vm2152_vm14 = vweird.f32 %v3310_v35 }
 0x241   : > { %v2148_v27 = vsub.f32 1.0, %v2147_v37  ;;  %v3312_v6 = vpop.eup %3311  ;;  %v1494_v22 = vadd.f32 %v4892_v53, %v4366_v55  ;;  %v1535_v1 = vadd.f32 %v1534_v60, %v4366_v55  ;;  %v2435_v48 = vrot.slane %v2434_v62, 1  ;;  %vm2153_vm0 = vmor %vm2151_vm12, %vm2152_vm14 }
 0x242   : > { %v2162_v39 = vmul.f32 %v3312_v6, %v4927_v12  ;;  %vm2166_vm15 = vweird.f32 %v4927_v12  ;;  %v2170_v3 = vand.u32 2147483647, %v4927_v12  ;;  %v1497_v2 = vadd.f32 %v1496_v31, %v4373_v50 }
 0x243   : > { %v2149_v34 = vmul.f32 %v3310_v35, %v2148_v27  ;;  %v3095_v37 = vmul.f32 -1.442695, %v1494_v22  ;;  %v3096_v57 = vmul.f32 -1.442695, %v1535_v1  ;;  %v1616_v27 = vpop.f32.mrf.mxu3  ;;  %vm2167_vm2 = vweird.f32 %v3312_v6  ;;  %v1499_v22 = vpop.f32.mrf.mxu0 }
 0x244   : > { %v2163_v53 = vsub.f32 1.0, %v2162_v39  ;;  %v2172_v60 = vand.u32 2147483648, %v4927_v12  ;;  %v1538_v61 = vadd.f32 %v1537_v42, %v4373_v50  ;;  %v3103_v8 = vmul.f32 -1.442695, %v1497_v2  ;;  %v1540_v40 = vpop.f32.mrf.mxu1  ;;  %vm2168_vm1 = vmor %vm2166_vm15, %vm2167_vm2 }
 0x245   : > { %v2150_v47 = vadd.f32 %v3310_v35, %v2149_v34  ;;  %3313 = vpow2.f32 %v3095_v37  ;;  %v1576_v34 = vadd.f32 %v1575_v44, %v4366_v55  ;;  %v1617_v43 = vadd.f32 %v1616_v27, %v4366_v55  ;;  %v3408_v27 = vld [vmem:[%s3694_s24 + $0xd8] sm:$0xff] }
 0x246   : > { %v2164_v1 = vmul.f32 %v3312_v6, %v2163_v53  ;;  %3315 = vpow2.f32 %v3096_v57  ;;  %v4999_v39 = vadd.f32 %v2426_v58, %v2425_v26  ;;  %v5001_v5 = vadd.f32 %v2435_v48, %v2434_v62 }
 0x247   : > { %v2154_v33 = vsel %vm2153_vm0, %v3310_v35, %v2150_v47  ;;  %vm5003_vm3 = vcmp.eq.f32.partialorder %v2170_v3, 8.507059e+37  ;;  %v2173_v2 = vor.u32 1.1754944e-38, %v2172_v60  ;;  %v3104_v44 = vmul.f32 -1.442695, %v1538_v61 }
 0x248   : > { %v2159_v31 = vsel %vm4970_vm13, %v2158_v38, %v2154_v33  ;;  %v2165_v42 = vadd.f32 %v3312_v6, %v2164_v1  ;;  %v1500_v47 = vadd.f32 %v1499_v22, %v4380_v16  ;;  %v3407_v33 = vld [vmem:[%s3694_s24 + $0xd0] sm:$0xff]  ;;  %v5016_v55 = vadd.f32 %v4779_v28, %v4403_v14 }
 0x249   : > { %v2262_v54 = vmul.f32 %v2159_v31, %v1409_v51  ;;  %3317 = vpow2.f32 %v3103_v8  ;;  %v3097_v51 = vmul.f32 -1.442695, %v1576_v34  ;;  %v5020_v62 = vadd.f32 %v4798_v45, %v4394_v56  ;;  %v1578_v45 = vpop.f32.mrf.mxu2 }
 0x24a   : > { %v2169_v26 = vsel %vm2168_vm1, %v3312_v6, %v2165_v42  ;;  %v5024_v61 = vadd.f32 %v4828_v18, %v4394_v56  ;;  %v1541_v6 = vadd.f32 %v1540_v40, %v4380_v16  ;;  %3319 = vpow2.f32 %v3104_v44 }
 0x24b   : > { %v5009_v38 = vadd.f32 %v3407_v33, %v2262_v54  ;;  %v3098_v54 = vmul.f32 -1.442695, %v1617_v43  ;;  %v3314_v58 = vpop.eup %3313  ;;  %v2174_v8 = vsel %vm5003_vm3, %v2173_v2, %v2169_v26  ;;  %v3111_v18 = vmul.f32 -1.442695, %v1500_v47  ;;  %v1619_v35 = vpop.f32.mrf.mxu3 }
 0x24c   : > { %v3316_v48 = vpop.eup %3315  ;;  %v2263_v3 = vmul.f32 %v2174_v8, %v4935_v13  ;;  %v5034_v56 = vadd.f32 1.0, %v3314_v58  ;;  %3321 = vpow2.f32 %v3097_v51  ;;  %v5044_v60 = vadd.f32 %v4842_v10, %v4649_v21 }
 0x24d   : > { %v2320_v12 = vadd.f32 %v4898_v4, %v5009_v38  ;;  %v2413_v28 = vmul.f32 %v5009_v38, %v5009_v38  ;;  %v5037_v4 = vadd.f32 1.0, %v3316_v48  ;;  %v1579_v13 = vadd.f32 %v1578_v45, %v4373_v50 }
 0x24e   : > { %v5040_v53 = vadd.f32 %v3408_v27, %v2263_v3  ;;  %3323 = vrcp.f32 %v5034_v56  ;;  %v5055_v10 = vadd.f32 %v4853_v29, %v4649_v21  ;;  %v5059_v2 = vadd.f32 %v4865_v11, %v4403_v14 }
 0x24f   : > { %v2321_v37 = vrot.slane %v2320_v12, 4  ;;  %v2439_v57 = vadd.f32 %v4908_v46, %v2413_v28  ;;  %v3318_v34 = vpop.eup %3317  ;;  %3325 = vrcp.f32 %v5037_v4  ;;  %v3112_v46 = vmul.f32 -1.442695, %v1541_v6 }
 0x250   : > { %v2329_v1 = vadd.f32 %v4912_v23, %v5040_v53  ;;  %v2414_v43 = vmul.f32 %v5040_v53, %v5040_v53  ;;  %3327 = vpow2.f32 %v3098_v54  ;;  %v5063_v44 = vadd.f32 %v4880_v15, %v4403_v14  ;;  %v3320_v23 = vpop.eup %3319 }
 0x251   : > { %v2322_v22 = vadd.f32 %v2321_v37, %v2320_v12  ;;  %v2440_v31 = vrot.slane %v2439_v57, 4  ;;  %3329 = vpow2.f32 %v3111_v18  ;;  %v5066_v51 = vadd.f32 1.0, %v3318_v34 }
 0x252   : > { %v2330_v40 = vrot.slane %v2329_v1, 4  ;;  %v2448_v33 = vadd.f32 %v4918_v59, %v2414_v43  ;;  %v5068_v29 = vpop.eup %3321  ;;  %3331 = vpow2.f32 %v3112_v46  ;;  %v5070_v54 = vmul.f32 -1.442695, %v1579_v13 }
 0x253   : > { %v2323_v42 = vrot.slane %v2322_v22, 2  ;;  %v2441_v47 = vadd.f32 %v2440_v31, %v2439_v57  ;;  %v5073_v11 = vadd.f32 %v1619_v35, %v4373_v50  ;;  %v1825_v12 = vand.u32 2147483647, %v5034_v56 }
 0x254   : > { %v3324_v58 = vpop.eup %3323  ;;  %v2331_v14 = vadd.f32 %v2330_v40, %v2329_v1  ;;  %v2449_v15 = vrot.slane %v2448_v33, 4  ;;  %3333 = vrcp.f32 %v5066_v51  ;;  %vm1821_vm4 = vweird.f32 %v5034_v56 }
 0x255   : > { %v2324_v26 = vadd.f32 %v2323_v42, %v2322_v22  ;;  %v3326_v28 = vpop.eup %3325  ;;  %v1817_v59 = vmul.f32 %v3324_v58, %v5034_v56  ;;  %v1827_v8 = vand.u32 2147483648, %v5034_v56  ;;  %v1840_v6 = vand.u32 2147483647, %v5037_v4 }
 0x256   : > { %v3328_v45 = vpop.eup %3327  ;;  %v2442_v50 = vrot.slane %v2441_v47, 2  ;;  %v1832_v3 = vmul.f32 %v3326_v28, %v5037_v4  ;;  %v1842_v18 = vand.u32 2147483648, %v5037_v4  ;;  %v2332_v57 = vrot.slane %v2331_v14, 2 }
 0x257   : > { %v2325_v48 = vrot.slane %v2324_v26, 1  ;;  %v5083_v37 = vpop.eup %3329  ;;  %v2450_v27 = vadd.f32 %v2449_v15, %v2448_v33  ;;  %v1818_v13 = vsub.f32 1.0, %v1817_v59  ;;  %vm1822_vm5 = vweird.f32 %v3324_v58 }
 0x258   : > { %vm5085_vm6 = vcmp.eq.f32.partialorder %v1825_v12, 8.507059e+37  ;;  %v1833_v22 = vsub.f32 1.0, %v1832_v3  ;;  %vm1836_vm7 = vweird.f32 %v5037_v4  ;;  %vm1837_vm8 = vweird.f32 %v3326_v28  ;;  %v5090_v31 = vpop.eup %3331  ;;  %vm5100_vm10 = vmor %vm1821_vm4, %vm1822_vm5 }
 0x259   : > { %v1819_v46 = vmul.f32 %v3324_v58, %v1818_v13  ;;  %v1828_v1 = vor.u32 1.1754944e-38, %v1827_v8  ;;  %vm5092_vm9 = vcmp.eq.f32.partialorder %v1840_v6, 8.507059e+37  ;;  %v5096_v35 = vadd.f32 1.0, %v3320_v23  ;;  %vm5107_vm11 = vmor %vm1836_vm7, %vm1837_vm8 }
 0x25a   : > { %v3334_v42 = vpop.eup %3333  ;;  %v2326_v40 = vadd.f32 %v2325_v48, %v2324_v26  ;;  %v2443_v33 = vadd.f32 %v2442_v50, %v2441_v47  ;;  %v1834_v12 = vmul.f32 %v3326_v28, %v1833_v22  ;;  %v1843_v59 = vor.u32 1.1754944e-38, %v1842_v18 }
 0x25b   : > { %v2333_v3 = vadd.f32 %v2332_v57, %v2331_v14  ;;  %v2451_v13 = vrot.slane %v2450_v27, 2  ;;  %v1820_v8 = vadd.f32 %v3324_v58, %v1819_v46  ;;  %v1937_v47 = vmul.f32 %v3334_v42, %v5066_v51 }
 0x25c   : > { %v1835_v26 = vadd.f32 %v3326_v28, %v1834_v12  ;;  %vm1941_vm12 = vweird.f32 %v5066_v51  ;;  %v1945_v56 = vand.u32 2147483647, %v5066_v51  ;;  %v1947_v6 = vand.u32 2147483648, %v5066_v51 }
 0x25d   : > { %v1824_v14 = vsel %vm5100_vm10, %v3324_v58, %v1820_v8  ;;  %v1938_v48 = vsub.f32 1.0, %v1937_v47  ;;  %vm1942_vm13 = vweird.f32 %v3334_v42  ;;  %3335 = vrcp.f32 %v5096_v35 }
 0x25e   : > { %v5119_v4 = vmul.f32 %v4925_v63, %v2326_v40  ;;  %v2444_v50 = vrot.slane %v2443_v33, 1  ;;  %v1829_v18 = vsel %vm5085_vm6, %v1828_v1, %v1824_v14  ;;  %v1839_v57 = vsel %vm5107_vm11, %v3326_v28, %v1835_v26  ;;  %vm5132_vm14 = vmor %vm1941_vm12, %vm1942_vm13 }
 0x25f   : > { %v2334_v22 = vrot.slane %v2333_v3, 1  ;;  %v5125_v46 = vadd.f32 %v2451_v13, %v2450_v27  ;;  %v1844_v58 = vsel %vm5092_vm9, %v1843_v59, %v1839_v57  ;;  %v1939_v15 = vmul.f32 %v3334_v42, %v1938_v48  ;;  %v3411_v57 = vld [vmem:[%s3694_s24 + $0x60] sm:$0xff] }
 0x260   : > { %v2240_v12 = vmul.f32 %v1829_v18, %v4939_v20  ;;  %vm5136_vm15 = vcmp.eq.f32.partialorder %v1945_v56, 8.507059e+37  ;;  %v1948_v28 = vor.u32 1.1754944e-38, %v1947_v6  ;;  %v5141_v27 = vadd.f32 1.0, %v5068_v29 }
 0x261   : > { %v2241_v1 = vmul.f32 %v1844_v58, %v4949_v24  ;;  %v1940_v43 = vadd.f32 %v3334_v42, %v1939_v15  ;;  %v1960_v20 = vand.u32 2147483647, %v5096_v35  ;;  %v5145_v51 = vadd.f32 1.0, %v3328_v45  ;;  %v3409_v45 = vld [vmem:[%s3694_s24 + $0x20] sm:$0xff] }
 0x262   : > { %v5147_v59 = vadd.f32 %v2444_v50, %v2443_v33  ;;  %3337 = vrcp.f32 %v5141_v27  ;;  %v3106_v8 = vmul.f32 -1.442695, %v5073_v11  ;;  %v5153_v29 = vadd.f32 %v2334_v22, %v2333_v3  ;;  %v3410_v3 = vld [vmem:[%s3694_s24 + $0x28] sm:$0xff] }
 0x263   : > { %v3336_v23 = vpop.eup %3335  ;;  %v2453_v24 = vrot.slane %v5125_v46, 1  ;;  %v1944_v47 = vsel %vm5132_vm14, %v3334_v42, %v1940_v43  ;;  %vm1956_vm0 = vweird.f32 %v5096_v35  ;;  %v5160_v33 = vadd.f32 %v3409_v45, %v2240_v12 }
 0x264   : > { %v1949_v26 = vsel %vm5136_vm15, %v1948_v28, %v1944_v47  ;;  %v1952_v56 = vmul.f32 %v3336_v23, %v5096_v35  ;;  %v1962_v11 = vand.u32 2147483648, %v5096_v35  ;;  %v5167_v6 = vadd.f32 %v3410_v3, %v2241_v1 }
 0x265   : > { %v2248_v14 = vmul.f32 %v1949_v26, %v4954_v30  ;;  %vm5170_vm2 = vcmp.eq.f32.partialorder %v1960_v20, 8.507059e+37  ;;  %3339 = vrcp.f32 %v5145_v51  ;;  %vm1957_vm3 = vweird.f32 %v3336_v23 }
 0x266   : > { %v1953_v48 = vsub.f32 1.0, %v1952_v56  ;;  %v1855_v50 = vand.u32 2147483647, %v5141_v27  ;;  %v1857_v18 = vand.u32 2147483648, %v5141_v27  ;;  %v5181_v58 = vadd.f32 1.0, %v5083_v37  ;;  %vm5196_vm4 = vmor %vm1956_vm0, %vm1957_vm3 }
 0x267   : > { %v5178_v22 = vadd.f32 %v3411_v57, %v2248_v14  ;;  %v5184_v30 = vadd.f32 1.0, %v5090_v31  ;;  %3341 = vpow2.f32 %v5070_v54  ;;  %v2391_v12 = vmul.f32 %v5160_v33, %v5160_v33 }
 0x268   : > { %v3338_v15 = vpop.eup %3337  ;;  %v1954_v40 = vmul.f32 %v3336_v23, %v1953_v48  ;;  %v1963_v34 = vor.u32 1.1754944e-38, %v1962_v11  ;;  %vm1851_vm1 = vweird.f32 %v5141_v27  ;;  %v5192_v28 = vmul.f32 %v5167_v6, %v5167_v6 }
 0x269   : > { %v1847_v54 = vmul.f32 %v3338_v15, %v5141_v27  ;;  %v1870_v31 = vand.u32 2147483647, %v5145_v51  ;;  %3343 = vpow2.f32 %v3106_v8  ;;  %vm5202_vm5 = vcmp.eq.f32.partialorder %v1855_v50, 8.507059e+37 }
 0x26a   : > { %v1955_v1 = vadd.f32 %v3336_v23, %v1954_v40  ;;  %v1872_v20 = vand.u32 2147483648, %v5145_v51  ;;  %3345 = vrcp.f32 %v5181_v58  ;;  %v2399_v35 = vmul.f32 %v5178_v22, %v5178_v22 }
 0x26b   : > { %v3340_v47 = vpop.eup %3339  ;;  %v1848_v45 = vsub.f32 1.0, %v1847_v54  ;;  %v1858_v26 = vor.u32 1.1754944e-38, %v1857_v18  ;;  %3347 = vrcp.f32 %v5184_v30  ;;  %vm1852_vm6 = vweird.f32 %v3338_v15 }
 0x26c   : > { %v1959_v8 = vsel %vm5196_vm4, %v3336_v23, %v1955_v1  ;;  %v1862_v56 = vmul.f32 %v3340_v47, %v5145_v51  ;;  %vm1866_vm7 = vweird.f32 %v5145_v51  ;;  %vm5217_vm8 = vcmp.eq.f32.partialorder %v1870_v31, 8.507059e+37  ;;  %vm1853_vm10 = vmor %vm1851_vm1, %vm1852_vm6 }
 0x26d   : > { %v3342_v11 = vpop.eup %3341  ;;  %v1964_v3 = vsel %vm5170_vm2, %v1963_v34, %v1959_v8  ;;  %v1849_v14 = vmul.f32 %v3338_v15, %v1848_v45  ;;  %v2065_v50 = vand.u32 2147483647, %v5181_v58  ;;  %v2067_v18 = vand.u32 2147483648, %v5181_v58  ;;  %v3412_v45 = vld [vmem:[%s3694_s24 + $0x68] sm:$0xff] }
 0x26e   : > { %v5225_v23 = vadd.f32 %v5178_v22, %v5160_v33  ;;  %v2249_v57 = vmul.f32 %v1964_v3, %v4958_v0  ;;  %v1863_v40 = vsub.f32 1.0, %v1862_v56  ;;  %v1873_v37 = vor.u32 1.1754944e-38, %v1872_v20  ;;  %v1502_v20 = vpop.f32.mrf.mxu0 }
 0x26f   : > { %v3344_v42 = vpop.eup %3343  ;;  %v5228_v54 = vadd.f32 %v2399_v35, %v2391_v12  ;;  %v1850_v34 = vadd.f32 %v3338_v15, %v1849_v14  ;;  %vm2061_vm9 = vweird.f32 %v5181_v58  ;;  %v5231_v31 = vadd.f32 1.0, %v3342_v11 }
 0x270   : > { %v3346_v1 = vpop.eup %3345  ;;  %v5234_v8 = vadd.f32 %v3412_v45, %v2249_v57  ;;  %v1864_v13 = vmul.f32 %v3340_v47, %v1863_v40  ;;  %vm1867_vm11 = vweird.f32 %v3340_v47  ;;  %v2080_v0 = vand.u32 2147483647, %v5184_v30 }
 0x271   : > { %v3348_v12 = vpop.eup %3347  ;;  %v1854_v35 = vsel %vm1853_vm10, %v3338_v15, %v1850_v34  ;;  %v2057_v56 = vmul.f32 %v3346_v1, %v5181_v58  ;;  %vm5241_vm12 = vcmp.eq.f32.partialorder %v2065_v50, 8.507059e+37  ;;  %v2068_v3 = vor.u32 1.1754944e-38, %v2067_v18  ;;  %vm1868_vm13 = vmor %vm1866_vm7, %vm1867_vm11 }
 0x272   : > { %3349 = vrcp.f32 %v5231_v31  ;;  %v1859_v27 = vsel %vm5202_vm5, %v1858_v26, %v1854_v35  ;;  %v1865_v14 = vadd.f32 %v3340_v47, %v1864_v13  ;;  %v2082_v57 = vand.u32 2147483648, %v5184_v30 }
 0x273   : > { %v5249_v40 = vadd.f32 1.0, %v3344_v42  ;;  %v2058_v15 = vsub.f32 1.0, %v2057_v56  ;;  %v2072_v50 = vmul.f32 %v3348_v12, %v5184_v30  ;;  %vm2076_vm14 = vweird.f32 %v5184_v30 }
 0x274   : > { %v1503_v18 = vadd.f32 %v1502_v20, %v4382_v52  ;;  %v2400_v34 = vmul.f32 %v5234_v8, %v5234_v8  ;;  %v2242_v43 = vmul.f32 %v1859_v27, %v4967_v7  ;;  %v1869_v13 = vsel %vm1868_vm13, %v3340_v47, %v1865_v14 }
 0x275   : > { %vm5259_vm15 = vcmp.eq.f32.partialorder %v2080_v0, 8.507059e+37  ;;  %v2059_v51 = vmul.f32 %v3346_v1, %v2058_v15  ;;  %vm2062_vm0 = vweird.f32 %v3346_v1  ;;  %v2073_v42 = vsub.f32 1.0, %v2072_v50  ;;  %v3413_v15 = vld [vmem:[%s3694_s24 + $0x30] sm:$0xff] }
 0x276   : > { %v1975_v45 = vand.u32 2147483647, %v5231_v31  ;;  %v2345_v35 = vadd.f32 %v5234_v8, %v5167_v6  ;;  %v1874_v20 = vsel %vm5217_vm8, %v1873_v37, %v1869_v13  ;;  %v2083_v56 = vor.u32 1.1754944e-38, %v2082_v57  ;;  %vm2063_vm3 = vmor %vm2061_vm9, %vm2062_vm0 }
 0x277   : > { %3351 = vrcp.f32 %v5249_v40  ;;  %v2060_v47 = vadd.f32 %v3346_v1, %v2059_v51  ;;  %v2074_v0 = vmul.f32 %v3348_v12, %v2073_v42  ;;  %vm2077_vm2 = vweird.f32 %v3348_v12 }
 0x278   : > { %v3350_v7 = vpop.eup %3349  ;;  %v1977_v27 = vand.u32 2147483648, %v5231_v31  ;;  %v2464_v14 = vadd.f32 %v2400_v34, %v5192_v28  ;;  %v5272_v50 = vadd.f32 %v3413_v15, %v2242_v43  ;;  %vm1971_vm1 = vweird.f32 %v5231_v31  ;;  %v1543_v28 = vpop.f32.mrf.mxu1  ;;  %vm2078_vm5 = vmor %vm2076_vm14, %vm2077_vm2  ;;  %v3414_v15 = vld [vmem:[%s3694_s24 + $0xa0] sm:$0xff] }
 0x279   : > { %v1967_v48 = vmul.f32 %v3350_v7, %v5231_v31  ;;  %v2243_v37 = vmul.f32 %v1874_v20, %v4976_v17  ;;  %v2064_v57 = vsel %vm2063_vm3, %v3346_v1, %v2060_v47  ;;  %v2075_v13 = vadd.f32 %v3348_v12, %v2074_v0  ;;  %v1581_v20 = vpop.f32.mrf.mxu2  ;;  %v1622_v47 = vpop.f32.mrf.mxu3 }
 0x27a   : > { %vm5280_vm4 = vcmp.eq.f32.partialorder %v1975_v45, 8.507059e+37  ;;  %v2069_v34 = vsel %vm5241_vm12, %v2068_v3, %v2064_v57  ;;  %vm1972_vm6 = vweird.f32 %v3350_v7  ;;  %v3119_v43 = vmul.f32 -1.442695, %v1503_v18 }
 0x27b   : > { %v1968_v58 = vsub.f32 1.0, %v1967_v48  ;;  %v2256_v42 = vmul.f32 %v2069_v34, %v4982_v25  ;;  %v2079_v17 = vsel %vm2078_vm5, %v3348_v12, %v2075_v13  ;;  %v1978_v1 = vor.u32 1.1754944e-38, %v1977_v27  ;;  %v3415_v34 = vld [vmem:[%s3694_s24 + $0xa8] sm:$0xff]  ;;  %vm1973_vm7 = vmor %vm1971_vm1, %vm1972_vm6 }
 0x27c   : > { %v1990_v45 = vand.u32 2147483647, %v5249_v40  ;;  %v2084_v11 = vsel %vm5259_vm15, %v2083_v56, %v2079_v17  ;;  %3353 = vpow2.f32 %v3119_v43  ;;  %v1544_v30 = vadd.f32 %v1543_v28, %v4382_v52 }
 0x27d   : > { %v3352_v0 = vpop.eup %3351  ;;  %v1969_v3 = vmul.f32 %v3350_v7, %v1968_v58  ;;  %v5294_v48 = vadd.f32 %v3414_v15, %v2256_v42  ;;  %v2257_v25 = vmul.f32 %v2084_v11, %v5016_v55  ;;  %v1992_v18 = vand.u32 2147483648, %v5249_v40 }
 0x27e   : > { %v1982_v12 = vmul.f32 %v3352_v0, %v5249_v40  ;;  %v3120_v57 = vmul.f32 -1.442695, %v1544_v30  ;;  %v1582_v13 = vadd.f32 %v1581_v20, %v4380_v16  ;;  %v1623_v26 = vadd.f32 %v1622_v47, %v4380_v16  ;;  %v3416_v30 = vld [vmem:[%s3694_s24 + $0x70] sm:$0xff] }
 0x27f   : > { %v1970_v27 = vadd.f32 %v3350_v7, %v1969_v3  ;;  %v5303_v56 = vadd.f32 %v5225_v23, %v5294_v48  ;;  %v2407_v28 = vmul.f32 %v5294_v48, %v5294_v48  ;;  %v5308_v58 = vadd.f32 %v3415_v34, %v2257_v25 }
 0x280   : > { %v1983_v55 = vsub.f32 1.0, %v1982_v12  ;;  %3355 = vpow2.f32 %v3120_v57  ;;  %v3113_v42 = vmul.f32 -1.442695, %v1582_v13  ;;  %v3114_v16 = vmul.f32 -1.442695, %v1623_v26 }
 0x281   : > { %v1974_v43 = vsel %vm1973_vm7, %v3350_v7, %v1970_v27  ;;  %v5314_v17 = vadd.f32 %v5228_v54, %v2407_v28  ;;  %v5317_v23 = vadd.f32 %v2345_v35, %v5308_v58  ;;  %v2408_v20 = vmul.f32 %v5308_v58, %v5308_v58 }
 0x282   : > { %v1979_v31 = vsel %vm5280_vm4, %v1978_v1, %v1974_v43  ;;  %v3354_v47 = vpop.eup %3353  ;;  %v1984_v11 = vmul.f32 %v3352_v0, %v1983_v55  ;;  %vm1987_vm8 = vweird.f32 %v3352_v0  ;;  %3357 = vpow2.f32 %v3113_v42 }
 0x283   : > { %v2250_v7 = vmul.f32 %v1979_v31, %v5020_v62  ;;  %v5326_v54 = vmul.f32 %v4925_v63, %v5153_v29  ;;  %v5328_v3 = vadd.f32 %v2464_v14, %v2408_v20  ;;  %v5330_v35 = vadd.f32 1.0, %v3354_v47  ;;  %v3417_v62 = vld [vmem:[%s3694_s24 + $0x38] sm:$0xff] }
 0x284   : > { %3359 = vpow2.f32 %v3114_v16  ;;  %v2393_v51 = vmul.f32 %v5272_v50, %v5272_v50  ;;  %v1985_v15 = vadd.f32 %v3352_v0, %v1984_v11  ;;  %vm1986_vm9 = vweird.f32 %v5249_v40  ;;  %v3418_v16 = vld [vmem:[%s3694_s24 + $0x78] sm:$0xff] }
 0x285   : > { %v5335_v1 = vadd.f32 %v3416_v30, %v2250_v7  ;;  %v5339_v25 = vadd.f32 %v3417_v62, %v2243_v37  ;;  %vm1988_vm10 = vmor %vm1986_vm9, %vm1987_vm8  ;;  %vm1991_vm11 = vcmp.eq.f32.partialorder %v1990_v45, 8.507059e+37  ;;  %v1993_v29 = vor.u32 1.1754944e-38, %v1992_v18 }
 0x286   : > { %3361 = vrcp.f32 %v5330_v35  ;;  %v3356_v14 = vpop.eup %3355  ;;  %v1989_v57 = vsel %vm1988_vm10, %v3352_v0, %v1985_v15  ;;  %v2491_v40 = vmul.f32 %v4999_v39, %v4925_v63  ;;  %v2492_v45 = vmul.f32 %v5001_v5, %v4925_v63 }
 0x287   : > { %6006 = vst [vmem:[#allocation27_spill] sm:$0xff] %v5339_v25  ;;  %v5344_v12 = vadd.f32 %v5335_v1, %v5272_v50  ;;  %v2401_v27 = vmul.f32 %v5335_v1, %v5335_v1  ;;  %v1994_v37 = vsel %vm1991_vm11, %v1993_v29, %v1989_v57  ;;  %v5350_v13 = vadd.f32 1.0, %v3356_v14 }
 0x288   : > { %v2499_v18 = vmul.f32 %v4944_v41, %v4944_v41  ;;  %v3358_v26 = vpop.eup %3357  ;;  %v2454_v28 = vadd.f32 %v2453_v24, %v5125_v46  ;;  %v2251_v0 = vmul.f32 %v1994_v37, %v5024_v61  ;;  %v2500_v39 = vmul.f32 %v4961_v32, %v4961_v32 }
 0x289   : > { %v5359_v34 = vadd.f32 %v2401_v27, %v2393_v51  ;;  %v2394_v43 = vmul.f32 %v5339_v25, %v5339_v25  ;;  %v2185_v5 = vand.u32 2147483647, %v5330_v35  ;;  %3363 = vrcp.f32 %v5350_v13 }
 0x28a   : > { %v3360_v55 = vpop.eup %3359  ;;  %v2493_v42 = vmul.f32 %v5147_v59, %v4925_v63  ;;  %v5371_v46 = vadd.f32 %v3418_v16, %v2251_v0  ;;  %v2187_v24 = vand.u32 2147483648, %v5330_v35  ;;  %v5374_v61 = vadd.f32 1.0, %v3358_v26 }
 0x28b   : > { %v5376_v20 = vadd.f32 1.0, %v3360_v55  ;;  %v2202_v47 = vand.u32 2147483648, %v5350_v13  ;;  %v2501_v7 = vmul.f32 %v5119_v4, %v5119_v4  ;;  %v2507_v11 = vsub.f32 %v2491_v40, %v2499_v18 }
 0x28c   : > { %6007 = vst [vmem:[#allocation28_spill] sm:$0xff] %v5371_v46  ;;  %v3362_v31 = vpop.eup %3361  ;;  %v2508_v51 = vsub.f32 %v2492_v45, %v2500_v39  ;;  %v5383_v59 = vadd.f32 %v5371_v46, %v5339_v25  ;;  %v2402_v30 = vmul.f32 %v5371_v46, %v5371_v46  ;;  %v2200_v62 = vand.u32 2147483647, %v5350_v13 }
 0x28d   : > { %v2177_v15 = vmul.f32 %v3362_v31, %v5330_v35  ;;  %vm2181_vm12 = vweird.f32 %v5330_v35  ;;  %3365 = vrcp.f32 %v5374_v61  ;;  %v2494_v29 = vmul.f32 %v2454_v28, %v4925_v63 }
 0x28e   : > { %v2502_v14 = vmul.f32 %v5326_v54, %v5326_v54  ;;  %v5394_v27 = vadd.f32 %v2402_v30, %v2394_v43  ;;  %vm5396_vm13 = vcmp.eq.f32.partialorder %v2185_v5, 8.507059e+37  ;;  %3367 = vrcp.f32 %v5376_v20 }
 0x28f   : > { %v2178_v57 = vsub.f32 1.0, %v2177_v15  ;;  %v3364_v37 = vpop.eup %3363  ;;  %vm2182_vm14 = vweird.f32 %v3362_v31  ;;  %v2188_v45 = vor.u32 1.1754944e-38, %v2187_v24  ;;  %vm2196_vm15 = vweird.f32 %v5350_v13 }
 0x290   : > { %v2203_v18 = vor.u32 1.1754944e-38, %v2202_v47  ;;  %v2192_v28 = vmul.f32 %v3364_v37, %v5350_v13  ;;  %vm5403_vm0 = vcmp.eq.f32.partialorder %v2200_v62, 8.507059e+37  ;;  %v2095_v39 = vand.u32 2147483647, %v5374_v61  ;;  %vm2183_vm3 = vmor %vm2181_vm12, %vm2182_vm14 }
 0x291   : > { %v2179_v26 = vmul.f32 %v3362_v31, %v2178_v57  ;;  %v2509_v55 = vsub.f32 %v2493_v42, %v2501_v7  ;;  %v2097_v43 = vand.u32 2147483648, %v5374_v61  ;;  %v2110_v5 = vand.u32 2147483647, %v5376_v20 }
 0x292   : > { %v2510_v16 = vsub.f32 %v2494_v29, %v2502_v14  ;;  %v5410_v30 = vadd.f32 1e-05, %v2507_v11  ;;  %v2193_v15 = vsub.f32 1.0, %v2192_v28  ;;  %vm2091_vm2 = vweird.f32 %v5374_v61 }
 0x293   : > { %v2180_v24 = vadd.f32 %v3362_v31, %v2179_v26  ;;  %v2112_v47 = vand.u32 2147483648, %v5376_v20  ;;  %v5414_v62 = vadd.f32 1e-05, %v2508_v51  ;;  %v3366_v57 = vpop.eup %3365  ;;  %vm2197_vm1 = vweird.f32 %v3364_v37 }
 0x294   : > { %vm2106_vm4 = vweird.f32 %v5376_v20  ;;  %3369 = vrsqrt.f32 %v5410_v30  ;;  %v3368_v7 = vpop.eup %3367  ;;  %v2194_v29 = vmul.f32 %v3364_v37, %v2193_v15  ;;  %v2087_v14 = vmul.f32 %v3366_v57, %v5374_v61  ;;  %vm2198_vm7 = vmor %vm2196_vm15, %vm2197_vm1 }
 0x295   : > { %v2184_v11 = vsel %vm2183_vm3, %v3362_v31, %v2180_v24  ;;  %vm5424_vm5 = vcmp.eq.f32.partialorder %v2095_v39, 8.507059e+37  ;;  %v5428_v35 = vadd.f32 1e-05, %v2509_v55  ;;  %v2098_v28 = vor.u32 1.1754944e-38, %v2097_v43  ;;  %v3419_v55 = vld [vmem:[%s3694_s24 + $0xe0] sm:$0xff] }
 0x296   : > { %v2189_v26 = vsel %vm5396_vm13, %v2188_v45, %v2184_v11  ;;  %v2102_v46 = vmul.f32 %v3368_v7, %v5376_v20  ;;  %3371 = vrsqrt.f32 %v5414_v62  ;;  %v2195_v24 = vadd.f32 %v3364_v37, %v2194_v29  ;;  %v6016_v29 = vld [vmem:[#allocation15_spill] sm:$0xff] }
 0x297   : > { %v2264_v31 = vmul.f32 %v2189_v26, %v5044_v60  ;;  %v2088_v15 = vsub.f32 1.0, %v2087_v14  ;;  %vm5435_vm6 = vcmp.eq.f32.partialorder %v2110_v5, 8.507059e+37  ;;  %v2113_v42 = vor.u32 1.1754944e-38, %v2112_v47 }
 0x298   : > { %vm2092_vm8 = vweird.f32 %v3366_v57  ;;  %v2103_v40 = vsub.f32 1.0, %v2102_v46  ;;  %vm2107_vm9 = vweird.f32 %v3368_v7  ;;  %v5442_v45 = vadd.f32 1e-05, %v2510_v16  ;;  %v6017_v16 = vld [vmem:[#allocation18_spill] sm:$0xff] }
 0x299   : > { %v5445_v43 = vadd.f32 %v3419_v55, %v2264_v31  ;;  %v2199_v60 = vsel %vm2198_vm7, %v3364_v37, %v2195_v24  ;;  %v2089_v11 = vmul.f32 %v3366_v57, %v2088_v15  ;;  %3373 = vrsqrt.f32 %v5428_v35  ;;  %vm2093_vm10 = vmor %vm2091_vm2, %vm2092_vm8 }
 0x29a   : > { %v5448_v5 = vpop.eup %3369  ;;  %v2204_v47 = vsel %vm5403_vm0, %v2203_v18, %v2199_v60  ;;  %v2104_v13 = vmul.f32 %v3368_v7, %v2103_v40  ;;  %3375 = vrsqrt.f32 %v5442_v45  ;;  %vm2108_vm11 = vmor %vm2106_vm4, %vm2107_vm9  ;;  %vm2529_vm12 = vweird.f32 %v5410_v30 }
 0x29b   : > { %v2338_v26 = vadd.f32 %v5303_v56, %v5445_v43  ;;  %v2415_v37 = vmul.f32 %v5445_v43, %v5445_v43  ;;  %v2265_v31 = vmul.f32 %v2204_v47, %v5055_v10  ;;  %v2090_v24 = vadd.f32 %v3366_v57, %v2089_v11  ;;  %v6018_v56 = vld [vmem:[#allocation19_spill] sm:$0xff]  ;;  %v3420_v10 = vld [vmem:[%s3694_s24 + $0xe8] sm:$0xff] }
 0x29c   : > { %v5461_v15 = vpop.eup %3371  ;;  %v2105_v18 = vadd.f32 %v3368_v7, %v2104_v13  ;;  %v2524_v0 = vmul.f32 %v5448_v5, %v5410_v30  ;;  %vm2530_vm13 = vweird.f32 %v5448_v5  ;;  %vm2539_vm14 = vweird.f32 %v5414_v62 }
 0x29d   : > { %v2339_v55 = vrot.slane %v2338_v26, 4  ;;  %v2457_v60 = vadd.f32 %v5314_v17, %v2415_v37  ;;  %v5473_v11 = vadd.f32 %v3420_v10, %v2265_v31  ;;  %v2094_v47 = vsel %vm2093_vm10, %v3366_v57, %v2090_v24  ;;  %vm2531_vm0 = vmor %vm2529_vm12, %vm2530_vm13 }
 0x29e   : > { %v2099_v61 = vsel %vm5424_vm5, %v2098_v28, %v2094_v47  ;;  %v2109_v13 = vsel %vm2108_vm11, %v3368_v7, %v2105_v18  ;;  %v2525_v14 = vmul.f32 %v5448_v5, %v2524_v0  ;;  %v2534_v40 = vmul.f32 %v5461_v15, %v5414_v62  ;;  %v6020_v62 = vld [vmem:[#allocation20_spill] sm:$0xff] }
 0x29f   : > { %v5483_v46 = vpop.eup %3373  ;;  %v2340_v17 = vadd.f32 %v2339_v55, %v2338_v26  ;;  %v2458_v37 = vrot.slane %v2457_v60, 4  ;;  %v2347_v57 = vadd.f32 %v5317_v23, %v5473_v11  ;;  %v2416_v20 = vmul.f32 %v5473_v11, %v5473_v11  ;;  %v3421_v55 = vld [vmem:[%s3694_s24 + $0xb0] sm:$0xff] }
 0x2a0   : > { %v2258_v51 = vmul.f32 %v2099_v61, %v5059_v2  ;;  %v2114_v7 = vsel %vm5435_vm6, %v2113_v42, %v2109_v13  ;;  %v2526_v28 = vmul.f32 0.5, %v2525_v14  ;;  %v2535_v31 = vmul.f32 %v5461_v15, %v2534_v40  ;;  %v5495_v23 = vpop.eup %3375  ;;  %v3422_v61 = vld [vmem:[%s3694_s24 + $0xb8] sm:$0xff] }
 0x2a1   : > { %v2341_v24 = vrot.slane %v2340_v17, 2  ;;  %v2459_v18 = vadd.f32 %v2458_v37, %v2457_v60  ;;  %v2348_v0 = vrot.slane %v2347_v57, 4  ;;  %v2466_v26 = vadd.f32 %v5328_v3, %v2416_v20 }
 0x2a2   : > { %v5498_v10 = vadd.f32 %v3421_v55, %v2258_v51  ;;  %v2259_v2 = vmul.f32 %v2114_v7, %v5063_v44  ;;  %v2527_v39 = vsub.f32 1.5, %v2526_v28  ;;  %v2536_v44 = vmul.f32 0.5, %v2535_v31 }
 0x2a3   : > { %v2342_v42 = vadd.f32 %v2341_v24, %v2340_v17  ;;  %v2460_v14 = vrot.slane %v2459_v18, 2  ;;  %v2349_v40 = vadd.f32 %v2348_v0, %v2347_v57  ;;  %v2467_v60 = vrot.slane %v2466_v26, 4  ;;  %v5522_v24 = vpop.permute.xlu0 %2673 }
 0x2a4   : > { %v5505_v3 = vadd.f32 %v5344_v12, %v5498_v10  ;;  %v2409_v47 = vmul.f32 %v5498_v10, %v5498_v10  ;;  %v5510_v13 = vadd.f32 %v3422_v61, %v2259_v2  ;;  %v2528_v28 = vmul.f32 %v5448_v5, %v2527_v39  ;;  %v5530_v2 = vpop.permute.xlu1 %2678 }
 0x2a5   : > { %v2343_v37 = vrot.slane %v2342_v42, 1  ;;  %v2461_v20 = vadd.f32 %v2460_v14, %v2459_v18  ;;  %v2350_v51 = vrot.slane %v2349_v40, 2  ;;  %v2468_v17 = vadd.f32 %v2467_v60, %v2466_v26 }
 0x2a6   : > { %6019 = vst [vmem:[#allocation15_spill] sm:$0xff] %v5510_v13  ;;  %v5513_v57 = vadd.f32 %v5359_v34, %v2409_v47  ;;  %v5517_v7 = vadd.f32 %v5383_v59, %v5510_v13  ;;  %v2410_v12 = vmul.f32 %v5510_v13, %v5510_v13  ;;  %v2537_v34 = vsub.f32 1.5, %v2536_v44 }
 0x2a7   : > { %v2344_v0 = vadd.f32 %v2343_v37, %v2342_v42  ;;  %v2462_v31 = vrot.slane %v2461_v20, 1  ;;  %v2351_v55 = vadd.f32 %v2350_v51, %v2349_v40  ;;  %v2469_v18 = vrot.slane %v2468_v17, 2 }
 0x2a8   : > { %v5525_v26 = vadd.f32 %v5394_v27, %v2410_v12  ;;  %vm2540_vm15 = vweird.f32 %v5461_v15  ;;  %v2544_v59 = vmul.f32 %v5483_v46, %v5428_v35  ;;  %v2538_v27 = vmul.f32 %v5461_v15, %v2537_v34 }
 0x2a9   : > { %v5533_v14 = vmul.f32 %v4925_v63, %v2344_v0  ;;  %v2463_v39 = vadd.f32 %v2462_v31, %v2461_v20  ;;  %v2352_v60 = vrot.slane %v2351_v55, 1  ;;  %v2470_v42 = vadd.f32 %v2469_v18, %v2468_v17  ;;  %vm2541_vm3 = vmor %vm2539_vm14, %vm2540_vm15 }
 0x2aa   : > { %v2545_v40 = vmul.f32 %v5483_v46, %v2544_v59  ;;  %vm2549_vm2 = vweird.f32 %v5428_v35  ;;  %v2554_v47 = vmul.f32 %v5495_v23, %v5442_v45  ;;  %v5546_v20 = vsel %vm2531_vm0, %v5448_v5, %v2528_v28 }
 0x2ab   : > { %v2353_v61 = vadd.f32 %v2352_v60, %v2351_v55  ;;  %v2471_v44 = vrot.slane %v2470_v42, 1  ;;  %v2495_v37 = vmul.f32 %v2463_v39, %v4925_v63  ;;  %v2503_v30 = vmul.f32 %v5533_v14, %v5533_v14 }
 0x2ac   : > { %v2546_v51 = vmul.f32 0.5, %v2545_v40  ;;  %vm2550_vm1 = vweird.f32 %v5483_v46  ;;  %v2555_v17 = vmul.f32 %v5495_v23, %v2554_v47  ;;  %v5560_v5 = vsel %vm2541_vm3, %v5461_v15, %v2538_v27  ;;  %v6021_v40 = vld [vmem:[#allocation21_spill] sm:$0xff]  ;;  %v5595_v35 = vpop.permute.xlu1 %2729 }
 0x2ad   : > { %v5557_v12 = vmul.f32 %v4925_v63, %v2353_v61  ;;  %v2472_v0 = vadd.f32 %v2471_v44, %v2470_v42  ;;  %v2511_v31 = vsub.f32 %v2495_v37, %v2503_v30  ;;  %v2619_v34 = vsub.f32 %v6020_v62, %v4944_v41  ;;  %v5577_v61 = vpop.permute.xlu0 %2688  ;;  %vm2551_vm5 = vmor %vm2549_vm2, %vm2550_vm1 }
 0x2ae   : > { %v2547_v55 = vsub.f32 1.5, %v2546_v51  ;;  %v2556_v18 = vmul.f32 0.5, %v2555_v17  ;;  %vm2560_vm4 = vweird.f32 %v5495_v23  ;;  %v2620_v47 = vsub.f32 %v6021_v40, %v4961_v32 }
 0x2af   : > { %v2496_v59 = vmul.f32 %v2472_v0, %v4925_v63  ;;  %v2504_v39 = vmul.f32 %v5557_v12, %v5557_v12  ;;  %v5572_v60 = vadd.f32 1e-05, %v2511_v31  ;;  %v2621_v37 = vsub.f32 %v4887_v49, %v5119_v4 }
 0x2b0   : > { %v2548_v42 = vmul.f32 %v5483_v46, %v2547_v55  ;;  %v2557_v27 = vsub.f32 1.5, %v2556_v18  ;;  %v2622_v30 = vsub.f32 %v4903_v36, %v5326_v54  ;;  %vm2559_vm6 = vweird.f32 %v5442_v45 }
 0x2b1   : > { %v2512_v44 = vsub.f32 %v2496_v59, %v2504_v39  ;;  %3377 = vrsqrt.f32 %v5572_v60  ;;  %vm2561_vm7 = vmor %vm2559_vm6, %vm2560_vm4  ;;  %v6022_v36 = vsub.f32 %v4515_v19, %v4944_v41  ;;  %v6023_v45 = vsub.f32 %v6016_v29, %v4961_v32 }
 0x2b2   : > { %v5590_v17 = vsel %vm2551_vm5, %v5483_v46, %v2548_v42  ;;  %v2558_v0 = vmul.f32 %v5495_v23, %v2557_v27  ;;  %v6024_v62 = vsub.f32 %v6017_v16, %v5119_v4  ;;  %v2651_v39 = vmul.f32 %v2619_v34, %v5546_v20 }
 0x2b3   : > { %v5597_v31 = vadd.f32 1e-05, %v2512_v44  ;;  %v2635_v46 = vmul.f32 %v6022_v36, %v5546_v20  ;;  %v2636_v55 = vmul.f32 %v6023_v45, %v5560_v5  ;;  %v2652_v42 = vmul.f32 %v2620_v47, %v5560_v5  ;;  %v6027_v47 = vld [vmem:[#allocation24_spill] sm:$0xff]  ;;  %v5641_v36 = vpop.permute.xlu2 %2683 }
 0x2b4   : > { %v5612_v18 = vsel %vm2561_vm7, %v5495_v23, %v2558_v0  ;;  %v2637_v59 = vmul.f32 %v6024_v62, %v5590_v17  ;;  %v2630_v19 = vsub.f32 %v5040_v53, %v5326_v54  ;;  %v6025_v29 = vsub.f32 %v6018_v56, %v5326_v54 }
 0x2b5   : > { %3379 = vrsqrt.f32 %v5597_v31  ;;  %v2653_v27 = vmul.f32 %v2621_v37, %v5590_v17  ;;  %v2654_v40 = vmul.f32 %v2622_v30, %v5612_v18  ;;  %v6026_v16 = vsub.f32 %v4862_v9, %v4944_v41 }
 0x2b6   : > { %v2638_v23 = vmul.f32 %v6025_v29, %v5612_v18  ;;  %v6028_v53 = vsub.f32 %v6027_v47, %v4961_v32  ;;  %v6029_v0 = vsub.f32 %v5009_v38, %v5119_v4  ;;  %v2662_v37 = vmul.f32 %v2630_v19, %v5612_v18 }
 0x2b7   : > { %v2659_v34 = vmul.f32 %v6026_v16, %v5546_v20  ;;  %v2691_v30 = vmul.f32 %v5522_v24, %v2635_v46  ;;  %v2692_v45 = vmul.f32 %v5522_v24, %v2636_v55  ;;  %v2693_v9 = vmul.f32 %v5522_v24, %v2637_v59  ;;  %v3378_v62 = vpop.eup %3377 }
 0x2b8   : > { %v2660_v44 = vmul.f32 %v6028_v53, %v5560_v5  ;;  %v2661_v56 = vmul.f32 %v6029_v0, %v5590_v17  ;;  %v2694_v16 = vmul.f32 %v5522_v24, %v2638_v23  ;;  %v2707_v47 = vmul.f32 %v5641_v36, %v2651_v39  ;;  %v5661_v39 = vpop.permute.xlu0 %2739 }
 0x2b9   : > { %v2564_v38 = vmul.f32 %v3378_v62, %v5572_v60  ;;  %vm2569_vm8 = vweird.f32 %v5572_v60  ;;  %v2708_v19 = vmul.f32 %v5641_v36, %v2652_v42  ;;  %v2709_v46 = vmul.f32 %v5641_v36, %v2653_v27 }
 0x2ba   : > { %v2710_v55 = vmul.f32 %v5641_v36, %v2654_v40  ;;  %v2715_v59 = vmul.f32 %v5577_v61, %v2659_v34  ;;  %v2716_v53 = vmul.f32 %v5577_v61, %v2660_v44  ;;  %v2747_v0 = vadd.f32 %v5595_v35, %v2691_v30  ;;  %v1584_v44 = vpop.f32.mrf.mxu2  ;;  %v1625_v30 = vpop.f32.mrf.mxu3 }
 0x2bb   : > { %v5659_v23 = vpop.eup %3379  ;;  %v2565_v49 = vmul.f32 %v3378_v62, %v2564_v38  ;;  %v2748_v15 = vadd.f32 %v5595_v35, %v2692_v45  ;;  %v2749_v42 = vadd.f32 %v5595_v35, %v2693_v9  ;;  %v2750_v29 = vadd.f32 %v5595_v35, %v2694_v16  ;;  %v5675_v45 = vpop.permute.xlu1 %2744 }
 0x2bc   : > { %vm2570_vm9 = vweird.f32 %v3378_v62  ;;  %v2574_v27 = vmul.f32 %v5659_v23, %v5597_v31  ;;  %v2717_v40 = vmul.f32 %v5577_v61, %v2661_v56  ;;  %v2763_v34 = vadd.f32 %v5661_v39, %v2707_v47  ;;  %2779 = vst [vmem:[%s5672_s23] sm:$0xff] %v2747_v0 }
 0x2bd   : > { %v2566_v9 = vmul.f32 0.5, %v2565_v49  ;;  %v2718_v16 = vmul.f32 %v5577_v61, %v2662_v37  ;;  %v2764_v56 = vadd.f32 %v5661_v39, %v2708_v19  ;;  %v2765_v47 = vadd.f32 %v5661_v39, %v2709_v46  ;;  %2780 = vst [vmem:[%s5672_s23 + $0x8] sm:$0xff] %v2748_v15  ;;  %v6030_v19 = vld [vmem:[#allocation16_spill] sm:$0xff]  ;;  %vm2571_vm10 = vmor %vm2569_vm8, %vm2570_vm9 }
 0x2be   : > { %v2575_v38 = vmul.f32 %v5659_v23, %v2574_v27  ;;  %v2766_v51 = vadd.f32 %v5661_v39, %v2710_v55  ;;  %v2771_v0 = vadd.f32 %v5675_v45, %v2715_v59  ;;  %v2772_v28 = vadd.f32 %v5675_v45, %v2716_v53  ;;  %2781 = vst [vmem:[%s5672_s23 + $0x10] sm:$0xff] %v2749_v42  ;;  %v6031_v27 = vld [vmem:[#allocation17_spill] sm:$0xff]  ;;  %v6032_v59 = vld [vmem:[#allocation22_spill] sm:$0xff]  ;;  %v6033_v53 = vld [vmem:[#allocation23_spill] sm:$0xff] }
 0x2bf   : > { %v2567_v13 = vsub.f32 1.5, %v2566_v9  ;;  %2782 = vst [vmem:[%s5672_s23 + $0x18] sm:$0xff] %v2750_v29  ;;  %v1585_v49 = vadd.f32 %v1584_v44, %v4382_v52  ;;  %v1626_v37 = vadd.f32 %v1625_v30, %v4382_v52  ;;  %v2611_v15 = vsub.f32 %v6030_v19, %v4944_v41 }
 0x2c0   : > { %v2576_v46 = vmul.f32 0.5, %v2575_v38  ;;  %2795 = vst [vmem:[%s5672_s23 + $0x80] sm:$0xff] %v2763_v34  ;;  %v2612_v55 = vsub.f32 %v6031_v27, %v4961_v32  ;;  %v2613_v25 = vsub.f32 %v6032_v59, %v5119_v4  ;;  %v2614_v29 = vsub.f32 %v6033_v53, %v5326_v54 }
 0x2c1   : > { %v2568_v42 = vmul.f32 %v3378_v62, %v2567_v13  ;;  %2796 = vst [vmem:[%s5672_s23 + $0x88] sm:$0xff] %v2764_v56  ;;  %v3121_v44 = vmul.f32 -1.442695, %v1585_v49  ;;  %v3122_v52 = vmul.f32 -1.442695, %v1626_v37  ;;  %v2643_v30 = vmul.f32 %v2611_v15, %v5546_v20 }
 0x2c2   : > { %v2577_v41 = vsub.f32 1.5, %v2576_v46  ;;  %vm2580_vm11 = vweird.f32 %v5659_v23  ;;  %v2773_v32 = vadd.f32 %v5675_v45, %v2717_v40  ;;  %2797 = vst [vmem:[%s5672_s23 + $0x90] sm:$0xff] %v2765_v47  ;;  %v2644_v4 = vmul.f32 %v2612_v55, %v5560_v5 }
 0x2c3   : > { %v5707_v54 = vsel %vm2571_vm10, %v3378_v62, %v2568_v42  ;;  %vm2579_vm12 = vweird.f32 %v5597_v31  ;;  %v2774_v13 = vadd.f32 %v5675_v45, %v2718_v16  ;;  %2798 = vst [vmem:[%s5672_s23 + $0x98] sm:$0xff] %v2766_v51  ;;  %3381 = vpow2.f32 %v3121_v44 }
 0x2c4   : > { %v2578_v20 = vmul.f32 %v5659_v23, %v2577_v41  ;;  %v6034_v60 = vsub.f32 %v5160_v33, %v5533_v14  ;;  %v6035_v5 = vsub.f32 %v5294_v48, %v5533_v14  ;;  %v6036_v31 = vsub.f32 %v5445_v43, %v5533_v14  ;;  %2803 = vst [vmem:[%s5672_s23 + $0xc0] sm:$0xff] %v2771_v0  ;;  %vm2581_vm13 = vmor %vm2579_vm12, %vm2580_vm11 }
 0x2c5   : > { %v2632_v51 = vsub.f32 %v5473_v11, %v5557_v12  ;;  %2804 = vst [vmem:[%s5672_s23 + $0xc8] sm:$0xff] %v2772_v28  ;;  %3383 = vpow2.f32 %v3122_v52  ;;  %v2645_v33 = vmul.f32 %v2613_v25, %v5590_v17  ;;  %v2646_v48 = vmul.f32 %v2614_v29, %v5612_v18  ;;  %v5764_v29 = vpop.permute.xlu2 %2734 }
 0x2c6   : > { %v2639_v34 = vmul.f32 %v6034_v60, %v5707_v54  ;;  %v2655_v62 = vmul.f32 %v6035_v5, %v5707_v54  ;;  %v2663_v40 = vmul.f32 %v6036_v31, %v5707_v54  ;;  %v5734_v9 = vsel %vm2581_vm13, %v5659_v23, %v2578_v20  ;;  %2805 = vst [vmem:[%s5672_s23 + $0xd0] sm:$0xff] %v2773_v32 }
 0x2c7   : > { %v6037_v11 = vsub.f32 %v5167_v6, %v5557_v12  ;;  %v6038_v25 = vsub.f32 %v5308_v58, %v5557_v12  ;;  %v2664_v18 = vmul.f32 %v2632_v51, %v5734_v9  ;;  %2806 = vst [vmem:[%s5672_s23 + $0xd8] sm:$0xff] %v2774_v13  ;;  %v2699_v0 = vmul.f32 %v5530_v2, %v2643_v30 }
 0x2c8   : > { %v2695_v43 = vmul.f32 %v5522_v24, %v2639_v34  ;;  %v2711_v16 = vmul.f32 %v5641_v36, %v2655_v62  ;;  %v2719_v56 = vmul.f32 %v5577_v61, %v2663_v40  ;;  %v2700_v19 = vmul.f32 %v5530_v2, %v2644_v4 }
 0x2c9   : > { %v2640_v28 = vmul.f32 %v6037_v11, %v5734_v9  ;;  %v2656_v17 = vmul.f32 %v6038_v25, %v5734_v9  ;;  %v3382_v6 = vpop.eup %3381  ;;  %v2720_v58 = vmul.f32 %v5577_v61, %v2664_v18  ;;  %v2701_v46 = vmul.f32 %v5530_v2, %v2645_v33 }
 0x2ca   : > { %v2751_v23 = vadd.f32 %v5595_v35, %v2695_v43  ;;  %v2767_v47 = vadd.f32 %v5661_v39, %v2711_v16  ;;  %v2775_v38 = vadd.f32 %v5675_v45, %v2719_v56  ;;  %v1754_v15 = vadd.f32 1.0, %v3382_v6  ;;  %v6039_v56 = vld [vmem:[#allocation25_spill] sm:$0xff] }
 0x2cb   : > { %v2696_v49 = vmul.f32 %v5522_v24, %v2640_v28  ;;  %v2712_v37 = vmul.f32 %v5641_v36, %v2656_v17  ;;  %v3384_v27 = vpop.eup %3383  ;;  %v2776_v53 = vadd.f32 %v5675_v45, %v2720_v58  ;;  %v2702_v42 = vmul.f32 %v5530_v2, %v2646_v48  ;;  %v3423_v6 = vld [vmem:[%s3694_s24 + $0xf0] sm:$0xff] }
 0x2cc   : > { %2783 = vst [vmem:[%s5672_s23 + $0x20] sm:$0xff] %v2751_v23  ;;  %3385 = vrcp.f32 %v1754_v15  ;;  %v2755_v44 = vadd.f32 %v5764_v29, %v2699_v0  ;;  %v1755_v52 = vadd.f32 1.0, %v3384_v27  ;;  %v2756_v30 = vadd.f32 %v5764_v29, %v2700_v19 }
 0x2cd   : > { %v2752_v55 = vadd.f32 %v5595_v35, %v2696_v49  ;;  %v2768_v59 = vadd.f32 %v5661_v39, %v2712_v37  ;;  %2799 = vst [vmem:[%s5672_s23 + $0xa0] sm:$0xff] %v2767_v47  ;;  %v2757_v41 = vadd.f32 %v5764_v29, %v2701_v46  ;;  %v2758_v32 = vadd.f32 %v5764_v29, %v2702_v42  ;;  %v6040_v47 = vld [vmem:[#allocation26_spill] sm:$0xff] }
 0x2ce   : > { %2807 = vst [vmem:[%s5672_s23 + $0xe0] sm:$0xff] %v2775_v38  ;;  %3387 = vrcp.f32 %v1755_v52  ;;  %v2217_v34 = vand.u32 2147483648, %v1754_v15  ;;  %v2215_v31 = vand.u32 2147483647, %v1754_v15  ;;  %vm2211_vm15 = vweird.f32 %v1754_v15  ;;  %v3424_v46 = vld [vmem:[%s3694_s24 + $0xf8] sm:$0xff] }
 0x2cf   : > { %2784 = vst [vmem:[%s5672_s23 + $0x28] sm:$0xff] %v2752_v55  ;;  %v2232_v33 = vand.u32 2147483648, %v1755_v52  ;;  %v2230_v16 = vand.u32 2147483647, %v1755_v52  ;;  %v1573_v11 = vadd.f32 %v6039_v56, %v4649_v21  ;;  %vm2226_vm1 = vweird.f32 %v1755_v52 }
 0x2d0   : > { %2800 = vst [vmem:[%s5672_s23 + $0xa8] sm:$0xff] %v2768_v59  ;;  %v2218_v48 = vor.u32 1.1754944e-38, %v2217_v34  ;;  %vm2216_vm3 = vcmp.eq.f32.partialorder %v2215_v31, 8.507059e+37  ;;  %v1614_v38 = vadd.f32 %v6040_v47, %v4649_v21 }
 0x2d1   : > { %2808 = vst [vmem:[%s5672_s23 + $0xe8] sm:$0xff] %v2776_v53  ;;  %v2233_v23 = vor.u32 1.1754944e-38, %v2232_v33  ;;  %vm2231_vm5 = vcmp.eq.f32.partialorder %v2230_v16, 8.507059e+37 }
 0x2d2   : > { %2787 = vst [vmem:[%s5672_s23 + $0x40] sm:$0xff] %v2755_v44  ;;  %v3386_v4 = vpop.eup %3385 }
 0x2d3   : > { %2788 = vst [vmem:[%s5672_s23 + $0x48] sm:$0xff] %v2756_v30  ;;  %v2207_v13 = vmul.f32 %v3386_v4, %v1754_v15  ;;  %vm2212_vm14 = vweird.f32 %v3386_v4 }
 0x2d4   : > { %2789 = vst [vmem:[%s5672_s23 + $0x50] sm:$0xff] %v2757_v41  ;;  %v3388_v20 = vpop.eup %3387  ;;  %vm2213_vm0 = vmor %vm2211_vm15, %vm2212_vm14 }
 0x2d5   : > { %2790 = vst [vmem:[%s5672_s23 + $0x58] sm:$0xff] %v2758_v32  ;;  %v2208_v60 = vsub.f32 1.0, %v2207_v13  ;;  %v2222_v5 = vmul.f32 %v3388_v20, %v1755_v52  ;;  %vm2227_vm2 = vweird.f32 %v3388_v20 }
 0x2d6   : > { %vm2228_vm4 = vmor %vm2226_vm1, %vm2227_vm2 }
 0x2d7   : > { %v2209_v62 = vmul.f32 %v3386_v4, %v2208_v60  ;;  %v2223_v40 = vsub.f32 1.0, %v2222_v5 }
 0x2d9   : > { %v2210_v51 = vadd.f32 %v3386_v4, %v2209_v62  ;;  %v2224_v43 = vmul.f32 %v3388_v20, %v2223_v40 }
 0x2db   : > { %v2214_v28 = vsel %vm2213_vm0, %v3386_v4, %v2210_v51  ;;  %v2225_v17 = vadd.f32 %v3388_v20, %v2224_v43 }
 0x2dc   : > { %v2219_v25 = vsel %vm2216_vm3, %v2218_v48, %v2214_v28 }
 0x2dd   : > { %v2266_v18 = vmul.f32 %v2219_v25, %v1573_v11  ;;  %v2229_v0 = vsel %vm2228_vm4, %v3388_v20, %v2225_v17 }
 0x2de   : > { %v2234_v37 = vsel %vm2231_vm5, %v2233_v23, %v2229_v0 }
 0x2df   : > { %v5784_v49 = vadd.f32 %v3423_v6, %v2266_v18  ;;  %v2267_v58 = vmul.f32 %v2234_v37, %v1614_v38 }
 0x2e1   : > { %v2356_v19 = vadd.f32 %v5505_v3, %v5784_v49  ;;  %v2417_v15 = vmul.f32 %v5784_v49, %v5784_v49  ;;  %v5791_v27 = vadd.f32 %v3424_v46, %v2267_v58  ;;  %v6041_v58 = vld [vmem:[#allocation27_spill] sm:$0xff]  ;;  %v6042_v46 = vld [vmem:[#allocation28_spill] sm:$0xff] }
 0x2e3   : > { %v2357_v55 = vrot.slane %v2356_v19, 4  ;;  %v2475_v59 = vadd.f32 %v5513_v57, %v2417_v15  ;;  %v2365_v21 = vadd.f32 %v5517_v7, %v5791_v27  ;;  %v2418_v53 = vmul.f32 %v5791_v27, %v5791_v27 }
 0x2e4   : > { %v2615_v57 = vsub.f32 %v5178_v22, %v5533_v14  ;;  %v2616_v7 = vsub.f32 %v5234_v8, %v5557_v12 }
 0x2e5   : > { %v2358_v42 = vadd.f32 %v2357_v55, %v2356_v19  ;;  %v2476_v44 = vrot.slane %v2475_v59, 4  ;;  %v2366_v52 = vrot.slane %v2365_v21, 4  ;;  %v2484_v3 = vadd.f32 %v5525_v26, %v2418_v53 }
 0x2e6   : > { %v2647_v26 = vmul.f32 %v2615_v57, %v5707_v54  ;;  %v2648_v51 = vmul.f32 %v2616_v7, %v5734_v9 }
 0x2e7   : > { %v2359_v30 = vrot.slane %v2358_v42, 2  ;;  %v2477_v41 = vadd.f32 %v2476_v44, %v2475_v59  ;;  %v2367_v32 = vadd.f32 %v2366_v52, %v2365_v21  ;;  %v2485_v4 = vrot.slane %v2484_v3, 4  ;;  %v6043_v59 = vld [vmem:[#allocation15_spill] sm:$0xff] }
 0x2e8   : > { %v2703_v56 = vmul.f32 %v5530_v2, %v2647_v26  ;;  %v2704_v22 = vmul.f32 %v5530_v2, %v2648_v51 }
 0x2e9   : > { %v2360_v13 = vadd.f32 %v2359_v30, %v2358_v42  ;;  %v2478_v20 = vrot.slane %v2477_v41, 2  ;;  %v2368_v60 = vrot.slane %v2367_v32, 2  ;;  %v2486_v34 = vadd.f32 %v2485_v4, %v2484_v3 }
 0x2ea   : > { %v2759_v28 = vadd.f32 %v5764_v29, %v2703_v56  ;;  %v2760_v54 = vadd.f32 %v5764_v29, %v2704_v22 }
 0x2eb   : > { %v2361_v5 = vrot.slane %v2360_v13, 1  ;;  %v2479_v62 = vadd.f32 %v2478_v20, %v2477_v41  ;;  %v2369_v31 = vadd.f32 %v2368_v60, %v2367_v32  ;;  %v2487_v40 = vrot.slane %v2486_v34, 2 }
 0x2ec   : > { %2791 = vst [vmem:[%s5672_s23 + $0x60] sm:$0xff] %v2759_v28 }
 0x2ed   : > { %v2362_v33 = vadd.f32 %v2361_v5, %v2360_v13  ;;  %v2480_v48 = vrot.slane %v2479_v62, 1  ;;  %v2370_v43 = vrot.slane %v2369_v31, 1  ;;  %v2488_v16 = vadd.f32 %v2487_v40, %v2486_v34  ;;  %2792 = vst [vmem:[%s5672_s23 + $0x68] sm:$0xff] %v2760_v54 }
 0x2ef   : > { %v2385_v8 = vmul.f32 %v4925_v63, %v2362_v33  ;;  %v2481_v14 = vadd.f32 %v2480_v48, %v2479_v62  ;;  %v2371_v12 = vadd.f32 %v2370_v43, %v2369_v31  ;;  %v2489_v11 = vrot.slane %v2488_v16, 1 }
 0x2f1   : > { %v2497_v9 = vmul.f32 %v2481_v14, %v4925_v63  ;;  %v2505_v25 = vmul.f32 %v2385_v8, %v2385_v8  ;;  %v2609_v17 = vsub.f32 %v5272_v50, %v2385_v8  ;;  %v2386_v18 = vmul.f32 %v4925_v63, %v2371_v12 }
 0x2f2   : > { %v2490_v23 = vadd.f32 %v2489_v11, %v2488_v16  ;;  %v2617_v47 = vsub.f32 %v5335_v1, %v2385_v8  ;;  %v2625_v38 = vsub.f32 %v5498_v10, %v2385_v8  ;;  %v2633_v13 = vsub.f32 %v5784_v49, %v2385_v8 }
 0x2f3   : > { %v2513_v0 = vsub.f32 %v2497_v9, %v2505_v25  ;;  %v2506_v37 = vmul.f32 %v2386_v18, %v2386_v18  ;;  %v2610_v19 = vsub.f32 %v6041_v58, %v2386_v18  ;;  %v2618_v55 = vsub.f32 %v6042_v46, %v2386_v18 }
 0x2f4   : > { %v2498_v6 = vmul.f32 %v2490_v23, %v4925_v63  ;;  %v2626_v50 = vsub.f32 %v6043_v59, %v2386_v18  ;;  %v2634_v5 = vsub.f32 %v5791_v27, %v2386_v18 }
 0x2f5   : > { %v2521_v15 = vadd.f32 1e-05, %v2513_v0 }
 0x2f6   : > { %v2514_v21 = vsub.f32 %v2498_v6, %v2506_v37 }
 0x2f7   : > { %3389 = vrsqrt.f32 %v2521_v15  ;;  %vm2589_vm7 = vweird.f32 %v2521_v15 }
 0x2f8   : > { %v2522_v53 = vadd.f32 1e-05, %v2514_v21 }
 0x2fa   : > { %3391 = vrsqrt.f32 %v2522_v53  ;;  %vm2599_vm10 = vweird.f32 %v2522_v53 }
 0x2fd   : > { %v3390_v1 = vpop.eup %3389 }
 0x2fe   : > { %v2584_v42 = vmul.f32 %v3390_v1, %v2521_v15  ;;  %vm2590_vm6 = vweird.f32 %v3390_v1 }
 0x2ff   : > { %vm2591_vm8 = vmor %vm2589_vm7, %vm2590_vm6 }
 0x300   : > { %v3392_v10 = vpop.eup %3391  ;;  %v2585_v44 = vmul.f32 %v3390_v1, %v2584_v42 }
 0x301   : > { %v2594_v52 = vmul.f32 %v3392_v10, %v2522_v53  ;;  %vm2600_vm9 = vweird.f32 %v3392_v10 }
 0x302   : > { %v2586_v3 = vmul.f32 0.5, %v2585_v44  ;;  %vm2601_vm11 = vmor %vm2599_vm10, %vm2600_vm9 }
 0x303   : > { %v2595_v30 = vmul.f32 %v3392_v10, %v2594_v52 }
 0x304   : > { %v2587_v63 = vsub.f32 1.5, %v2586_v3 }
 0x305   : > { %v2596_v41 = vmul.f32 0.5, %v2595_v30 }
 0x306   : > { %v2588_v32 = vmul.f32 %v3390_v1, %v2587_v63 }
 0x307   : > { %v2597_v4 = vsub.f32 1.5, %v2596_v41 }
 0x308   : > { %v2592_v20 = vsel %vm2591_vm8, %v3390_v1, %v2588_v32 }
 0x309   : > { %v2598_v60 = vmul.f32 %v3392_v10, %v2597_v4  ;;  %v2641_v34 = vmul.f32 %v2609_v17, %v2592_v20  ;;  %v2649_v57 = vmul.f32 %v2617_v47, %v2592_v20  ;;  %v2657_v7 = vmul.f32 %v2625_v38, %v2592_v20 }
 0x30a   : > { %v2665_v62 = vmul.f32 %v2633_v13, %v2592_v20 }
 0x30b   : > { %v2602_v31 = vsel %vm2601_vm11, %v3392_v10, %v2598_v60  ;;  %v2697_v40 = vmul.f32 %v5522_v24, %v2641_v34  ;;  %v2705_v26 = vmul.f32 %v5530_v2, %v2649_v57  ;;  %v2713_v49 = vmul.f32 %v5641_v36, %v2657_v7 }
 0x30c   : > { %v2642_v51 = vmul.f32 %v2610_v19, %v2602_v31  ;;  %v2650_v33 = vmul.f32 %v2618_v55, %v2602_v31  ;;  %v2658_v48 = vmul.f32 %v2626_v50, %v2602_v31  ;;  %v2666_v43 = vmul.f32 %v2634_v5, %v2602_v31 }
 0x30d   : > { %v2721_v16 = vmul.f32 %v5577_v61, %v2665_v62  ;;  %v2753_v27 = vadd.f32 %v5595_v35, %v2697_v40  ;;  %v2761_v56 = vadd.f32 %v5764_v29, %v2705_v26  ;;  %v2769_v22 = vadd.f32 %v5661_v39, %v2713_v49 }
 0x30e   : > { %v2698_v8 = vmul.f32 %v5522_v24, %v2642_v51  ;;  %v2706_v14 = vmul.f32 %v5530_v2, %v2650_v33  ;;  %v2714_v12 = vmul.f32 %v5641_v36, %v2658_v48  ;;  %v2722_v11 = vmul.f32 %v5577_v61, %v2666_v43 }
 0x30f   : > { %2785 = vst [vmem:[%s5672_s23 + $0x30] sm:$0xff] %v2753_v27  ;;  %v2777_v24 = vadd.f32 %v5675_v45, %v2721_v16 }
 0x310   : > { %v2754_v28 = vadd.f32 %v5595_v35, %v2698_v8  ;;  %v2762_v54 = vadd.f32 %v5764_v29, %v2706_v14  ;;  %v2770_v9 = vadd.f32 %v5661_v39, %v2714_v12  ;;  %2793 = vst [vmem:[%s5672_s23 + $0x70] sm:$0xff] %v2761_v56  ;;  %v2778_v2 = vadd.f32 %v5675_v45, %v2722_v11 }
 0x311   : > { %2801 = vst [vmem:[%s5672_s23 + $0xb0] sm:$0xff] %v2769_v22 }
 0x312   : > { %2786 = vst [vmem:[%s5672_s23 + $0x38] sm:$0xff] %v2754_v28 }
 0x313   : > { %2794 = vst [vmem:[%s5672_s23 + $0x78] sm:$0xff] %v2762_v54 }
 0x314   : > { %2802 = vst [vmem:[%s5672_s23 + $0xb8] sm:$0xff] %v2770_v9 }
 0x315   : > { %2809 = vst [vmem:[%s5672_s23 + $0xf0] sm:$0xff] %v2777_v24 }
 0x316   : > { %2810 = vst [vmem:[%s5672_s23 + $0xf8] sm:$0xff] %v2778_v2 }
 0x317   : > { %3480 = shalt.err (!%p3477_p3)
}
 0x318   : > { %s3526_s18 = smov 1024   ;;  %s3527_s30 = smov 2048  }
 0x319   : > { %s3528_s15 = smov 64  }
 0x31a   : > { %3133 = dma.vmem_to_hbm [thread:$0]  (%p3627_p9), %s2825_s14, 4096, %s2827_s20, %s2812_s17, %s3526_s18, %s3527_s30, %s3528_s15  }
 0x31b PF: > { %s6045_s23 = sld [smem:[#allocation9_spill]]  ;;  %p3136_p4 = pnand %p2920_p11, %p3631_p10 }
 0x31d   : > { %p3137_p5 = pneg %p3136_p4 }
 0x321   : > { %s2841_s13 = sand.u32 1, %s6045_s23  }
 0x322   : > { %s2842_s24 = scalar_lea.sflag [#allocation4], %s2841_s13 }
 0x323   : > { %3502 = dma.done.wait (%p3137_p5), %s2842_s24, 4096  }
 0x324   : > { %3504 = vsyncadd (%p3137_p5), %s2842_s24, 4294963200  ;;  %s6047_s12 = sld [smem:[#allocation11_spill]]  ;;  %s6050_s30 = smov %s3511_s10 }
 0x325   : > { %s6048_s29 = sld [smem:[#allocation10_spill]] }
 0x326   : > { %s6049_s11 = sld [smem:[#allocation12_spill]] }
 0x32a   : > { %p22_p7 = scmp.ge.s32.totalorder %s6047_s12, 4  }
 0x32b   : > { %s6051_s10 = smov %s6048_s29 }
 0x32c   :  { %24 = sbr.rel (!%p22_p7) target bundleno = 5 (0x5), region = 132 }
 0x331   :  { %2848 = vsyncpa [#allocation3], 1 }
 0x332   :  { %2850 = vsyncpa [#allocation3 + $0x1], 1 }
 0x333   :  { %2851 = vsyncpa [#allocation4], 1 }
 0x334   :  { %2853 = vsyncpa [#allocation4 + $0x1], 1 }

</bundles_post_ra>
